<compile_context>
chip_gen: v6e
topology: v6e:2x2x1
jax: 0.10.0
libtpu: 0.0.40
codegen_flags: <defaults>
</compile_context>

<pallas_src>
import functools

import jax
import jax.numpy as jnp
from jax.experimental import pallas as pl
from jax.experimental.pallas import tpu as pltpu

BN_EPS = 1e-5
NEG_SLOPE = 0.2

IN_DIM = 5
IN_PAD = 8           # first Linear contraction padded 5 -> 8
H1 = 64
H2 = 128
H3 = 1024
OUT_DIM = 1

_VMEM_LIMIT = 32 * 1024 * 1024   # actual per-step footprint is a few MiB


def _leaky_relu(x):
    return jnp.where(x > 0, x, NEG_SLOPE * x)


def _pick_block_batch(batch, max_tile=512):
    """Largest batch tile <= max_tile (multiple of 8) that divides the batch."""
    if batch % 8 != 0:
        return batch              # tiny / odd batch: single full-size tile
    tile = min(batch, max_tile)
    while batch % tile != 0:
        tile -= 8
    return tile


# -----------------------------------------------------------------------------
# In-kernel building blocks (shared across the three passes)
# -----------------------------------------------------------------------------
def _compute_z2(x, w1, b1, w2, b2):
    """Linear(5->64, padded to 8) + LeakyReLU + Linear(64->128); f32."""
    h = _leaky_relu(jnp.dot(x, w1, preferred_element_type=jnp.float32) + b1)
    return jnp.dot(h, w2, preferred_element_type=jnp.float32) + b2


def _compute_z3(z2, sc2, sh2, w3, b3):
    """BN2 (folded scale/shift) + LeakyReLU + Linear(128->1024) on MXU (bf16)."""
    a2 = _leaky_relu(z2 * sc2 + sh2)
    return jnp.dot(a2.astype(w3.dtype), w3,
                   preferred_element_type=jnp.float32) + b3


def _write_stats(val, s_ref, q_ref):
    """Per-tile sum / sum-of-squares, broadcast to 8 sublanes for (8,128)-aligned
    output blocks; the wrapper only reads sublane 0."""
    s = jnp.sum(val, axis=0, keepdims=True)
    q = jnp.sum(val * val, axis=0, keepdims=True)
    s_ref[...] = jnp.broadcast_to(s, s_ref.shape)
    q_ref[...] = jnp.broadcast_to(q, q_ref.shape)


# -----------------------------------------------------------------------------
# Kernels
# -----------------------------------------------------------------------------
def _stage1_kernel(x_ref, w1_ref, b1_ref, w2_ref, b2_ref, s2_ref, q2_ref):
    # Statistics pass for BN2: compute z2, emit partial sums only (no z2 spill).
    z2 = _compute_z2(x_ref[...], w1_ref[...], b1_ref[...], w2_ref[...], b2_ref[...])
    _write_stats(z2, s2_ref, q2_ref)


def _stage2_kernel(x_ref, w1_ref, b1_ref, w2_ref, b2_ref, sc2_ref, sh2_ref,
                   w3_ref, b3_ref, s3_ref, q3_ref):
    # Statistics pass for BN3: recompute z2, apply BN2, compute z3, emit sums.
    z2 = _compute_z2(x_ref[...], w1_ref[...], b1_ref[...], w2_ref[...], b2_ref[...])
    z3 = _compute_z3(z2, sc2_ref[...], sh2_ref[...], w3_ref[...], b3_ref[...])
    _write_stats(z3, s3_ref, q3_ref)


def _stage3_kernel(x_ref, w1_ref, b1_ref, w2_ref, b2_ref, sc2_ref, sh2_ref,
                   w3_ref, b3_ref, sc3_ref, sh3_ref, w4_ref, b4_ref, out_ref):
    # Apply pass: full forward, BN3 + LeakyReLU + Linear(1024->1) + Sigmoid.
    z2 = _compute_z2(x_ref[...], w1_ref[...], b1_ref[...], w2_ref[...], b2_ref[...])
    z3 = _compute_z3(z2, sc2_ref[...], sh2_ref[...], w3_ref[...], b3_ref[...])
    a3 = _leaky_relu(z3 * sc3_ref[...] + sh3_ref[...])            # (TB, 1024)
    # Linear(1024 -> 1) as VPU broadcast-multiply + XLU lane reduction.
    d = jnp.sum(a3 * w4_ref[...], axis=-1, keepdims=True) + b4_ref[...]
    out_ref[...] = jax.nn.sigmoid(d)                              # (TB, 1)


# -----------------------------------------------------------------------------
# Wrapper
# -----------------------------------------------------------------------------
def _bn_fold(s_part, q_part, gamma, beta, batch):
    """Combine per-tile partial sums into BN (scale, shift); biased variance."""
    s = jnp.sum(s_part[:, 0, :], axis=0)            # (F,)
    q = jnp.sum(q_part[:, 0, :], axis=0)            # (F,)
    mean = s / batch
    var = jnp.maximum(q / batch - mean * mean, 0.0)
    inv_std = jax.lax.rsqrt(var + BN_EPS)
    scale = gamma.reshape(-1) * inv_std
    shift = beta.reshape(-1) - mean * scale
    return scale.reshape(1, -1), shift.reshape(1, -1)


@functools.partial(jax.jit, static_argnames=("block_batch",))
def discriminator_forward(x, params, *, block_batch=None):
    (w1, b1, w2, b2, g2, be2, w3, b3, g3, be3, w4, b4) = params
    batch = x.shape[0]
    tb = _pick_block_batch(batch) if block_batch is None else block_batch
    assert batch % tb == 0, (batch, tb)
    nb = batch // tb

    cparams = pltpu.CompilerParams(
        dimension_semantics=("parallel",),
        vmem_limit_bytes=_VMEM_LIMIT,
    )

    # Pad the first contraction dim 5 -> 8 (exact: zero columns hit zero rows).
    x_pad = jnp.pad(x, ((0, 0), (0, IN_PAD - IN_DIM)))
    w1_pad = jnp.pad(w1, ((0, IN_PAD - IN_DIM), (0, 0)))
    # Cast the dominant 128x1024 weight to bf16 once (halves its HBM traffic).
    w3_bf16 = w3.astype(jnp.bfloat16)
    w4_row = w4.reshape(1, H3)

    const = lambda i: (0, 0)
    x_spec = pl.BlockSpec((tb, IN_PAD), lambda i: (i, 0))
    w1_spec = pl.BlockSpec((IN_PAD, H1), const)
    b1_spec = pl.BlockSpec((1, H1), const)
    w2_spec = pl.BlockSpec((H1, H2), const)
    b2_spec = pl.BlockSpec((1, H2), const)
    vec2_spec = pl.BlockSpec((1, H2), const)
    w3_spec = pl.BlockSpec((H2, H3), const)
    b3_spec = pl.BlockSpec((1, H3), const)
    vec3_spec = pl.BlockSpec((1, H3), const)
    stat2_spec = pl.BlockSpec((None, 8, H2), lambda i: (i, 0, 0))
    stat3_spec = pl.BlockSpec((None, 8, H3), lambda i: (i, 0, 0))

    # ---- stage 1: BN2 partial statistics (no activation writeback) ----------
    s2p, q2p = pl.pallas_call(
        _stage1_kernel,
        grid=(nb,),
        in_specs=[x_spec, w1_spec, b1_spec, w2_spec, b2_spec],
        out_specs=(stat2_spec, stat2_spec),
        out_shape=(
            jax.ShapeDtypeStruct((nb, 8, H2), jnp.float32),
            jax.ShapeDtypeStruct((nb, 8, H2), jnp.float32),
        ),
        compiler_params=cparams,
    )(x_pad, w1_pad, b1, w2, b2)

    sc2, sh2 = _bn_fold(s2p, q2p, g2, be2, batch)

    # ---- stage 2: BN3 partial statistics (recompute from x) -----------------
    s3p, q3p = pl.pallas_call(
        _stage2_kernel,
        grid=(nb,),
        in_specs=[x_spec, w1_spec, b1_spec, w2_spec, b2_spec,
                  vec2_spec, vec2_spec, w3_spec, b3_spec],
        out_specs=(stat3_spec, stat3_spec),
        out_shape=(
            jax.ShapeDtypeStruct((nb, 8, H3), jnp.float32),
            jax.ShapeDtypeStruct((nb, 8, H3), jnp.float32),
        ),
        compiler_params=cparams,
    )(x_pad, w1_pad, b1, w2, b2, sc2, sh2, w3_bf16, b3)

    sc3, sh3 = _bn_fold(s3p, q3p, g3, be3, batch)

    # ---- stage 3: full forward apply pass ------------------------------------
    out = pl.pallas_call(
        _stage3_kernel,
        grid=(nb,),
        in_specs=[x_spec, w1_spec, b1_spec, w2_spec, b2_spec,
                  vec2_spec, vec2_spec, w3_spec, b3_spec,
                  vec3_spec, vec3_spec, vec3_spec,
                  pl.BlockSpec((1, OUT_DIM), const)],
        out_specs=pl.BlockSpec((tb, OUT_DIM), lambda i: (i, 0)),
        out_shape=jax.ShapeDtypeStruct((batch, OUT_DIM), jnp.float32),
        compiler_params=cparams,
    )(x_pad, w1_pad, b1, w2, b2, sc2, sh2, w3_bf16, b3, sc3, sh3, w4_row, b4)

    return out


# -----------------------------------------------------------------------------
# Parameters and pure-JAX reference (PyTorch semantics, f32 end-to-end)
# -----------------------------------------------------------------------------
def init_params(key):
    ks = jax.random.split(key, 8)

    def lin(kw, kb, fan_in, fan_out):
        bound = 1.0 / jnp.sqrt(fan_in)
        w = jax.random.uniform(kw, (fan_in, fan_out), jnp.float32, -bound, bound)
        b = jax.random.uniform(kb, (1, fan_out), jnp.float32, -bound, bound)
        return w, b

    w1, b1 = lin(ks[0], ks[1], IN_DIM, H1)
    w2, b2 = lin(ks[2], ks[3], H1, H2)
    w3, b3 = lin(ks[4], ks[5], H2, H3)
    w4, b4 = lin(ks[6], ks[7], H3, OUT_DIM)
    g2 = jnp.ones((1, H2), jnp.float32)
    be2 = jnp.zeros((1, H2), jnp.float32)
    g3 = jnp.ones((1, H3), jnp.float32)
    be3 = jnp.zeros((1, H3), jnp.float32)
    return (w1, b1, w2, b2, g2, be2, w3, b3, g3, be3, w4, b4)


def _batchnorm_ref(x, gamma, beta):
    mean = jnp.mean(x, axis=0, keepdims=True)
    var = jnp.mean((x - mean) ** 2, axis=0, keepdims=True)   # biased, training mode
    return (x - mean) * jax.lax.rsqrt(var + BN_EPS) * gamma + beta


def reference_forward(x, params):
    (w1, b1, w2, b2, g2, be2, w3, b3, g3, be3, w4, b4) = params
    h = _leaky_relu(x @ w1 + b1)
    h = _leaky_relu(_batchnorm_ref(h @ w2 + b2, g2, be2))
    h = _leaky_relu(_batchnorm_ref(h @ w3 + b3, g3, be3))
    return jax.nn.sigmoid(h @ w4 + b4)


if __name__ == "__main__":
    key = jax.random.PRNGKey(0)
    k_x, k_p = jax.random.split(key)

    B = 64  # BatchNorm1d training mode requires batch > 1
    x = jax.random.normal(k_x, (B, IN_DIM), jnp.float32)
    params = init_params(k_p)

    ref = reference_forward(x, params)

    out = jax.block_until_ready(discriminator_forward(x, params))               # single tile
    out_tiled = jax.block_until_ready(discriminator_forward(x, params, block_batch=16))  # 4 tiles

    assert out.shape == (B, OUT_DIM)
    max_err = float(jnp.max(jnp.abs(out - ref)))
    # bf16 on the 128->1024 matmul loosens tolerance vs the f32 reference.
    assert jnp.allclose(out, ref, atol=5e-3), max_err
    assert jnp.allclose(out_tiled, ref, atol=5e-3)
    # Batch tiling must not change the result (only fp reassociation of BN sums).
    assert jnp.allclose(out, out_tiled, atol=1e-4)

    print("KERNEL_OK")
</pallas_src>

<mosaic_0001>
module attributes {stable_mosaic.version = 11 : i64} {
  func.func @_stage1_kernel(%arg0: i32, %arg1: memref<64x8xf32, #tpu.memory_space<vmem>>, %arg2: memref<8x64xf32, #tpu.memory_space<vmem>>, %arg3: memref<1x64xf32, #tpu.memory_space<vmem>>, %arg4: memref<64x128xf32, #tpu.memory_space<vmem>>, %arg5: memref<1x128xf32, #tpu.memory_space<vmem>>, %arg6: memref<1x8x128xf32, #tpu.memory_space<vmem>>, %arg7: memref<1x8x128xf32, #tpu.memory_space<vmem>>) attributes {dimension_semantics = [#tpu.dimension_semantics<parallel>], iteration_bounds = array<i64: 1>, scalar_prefetch = 0 : i64, scratch_operands = 0 : i64, tpu.core_type = #tpu.core_type<tc>, window_params = [{transform_indices = @transform_0, window_bounds = array<i64: 64, 8>}, {pipeline_mode = #tpu.pipeline_mode<synchronous>, transform_indices = @transform_1, window_bounds = array<i64: 8, 64>}, {pipeline_mode = #tpu.pipeline_mode<synchronous>, transform_indices = @transform_2, window_bounds = array<i64: 1, 64>}, {pipeline_mode = #tpu.pipeline_mode<synchronous>, transform_indices = @transform_3, window_bounds = array<i64: 64, 128>}, {pipeline_mode = #tpu.pipeline_mode<synchronous>, transform_indices = @transform_4, window_bounds = array<i64: 1, 128>}, {transform_indices = @transform_5, window_bounds = array<i64: 1, 8, 128>}, {transform_indices = @transform_6, window_bounds = array<i64: 1, 8, 128>}]} {
    %c0 = arith.constant 0 : index
    %c0_0 = arith.constant 0 : index
    %0 = vector.load %arg1[%c0, %c0_0] : memref<64x8xf32, #tpu.memory_space<vmem>>, vector<64x8xf32>
    %c0_1 = arith.constant 0 : index
    %c0_2 = arith.constant 0 : index
    %1 = vector.load %arg2[%c0_1, %c0_2] : memref<8x64xf32, #tpu.memory_space<vmem>>, vector<8x64xf32>
    %c0_3 = arith.constant 0 : index
    %c0_4 = arith.constant 0 : index
    %2 = vector.load %arg3[%c0_3, %c0_4] : memref<1x64xf32, #tpu.memory_space<vmem>>, vector<1x64xf32>
    %c0_5 = arith.constant 0 : index
    %c0_6 = arith.constant 0 : index
    %3 = vector.load %arg4[%c0_5, %c0_6] : memref<64x128xf32, #tpu.memory_space<vmem>>, vector<64x128xf32>
    %c0_7 = arith.constant 0 : index
    %c0_8 = arith.constant 0 : index
    %4 = vector.load %arg5[%c0_7, %c0_8] : memref<1x128xf32, #tpu.memory_space<vmem>>, vector<1x128xf32>
    %cst = arith.constant dense<0.000000e+00> : vector<64x64xf32>
    %5 = tpu.matmul %0, %1, %cst {dimension_numbers = #tpu.dot_dimension_numbers<[1], [0], [0], [1], [0, 0, 1, 1], [], []>} : vector<64x8xf32>, vector<8x64xf32>, vector<64x64xf32> -> vector<64x64xf32>
    %6 = vector.broadcast %2 : vector<1x64xf32> to vector<64x64xf32>
    %7 = arith.addf %5, %6 : vector<64x64xf32>
    %cst_9 = arith.constant 0.000000e+00 : f32
    %8 = vector.broadcast %cst_9 : f32 to vector<64x64xf32>
    %9 = arith.cmpf ogt, %7, %8 : vector<64x64xf32>
    %cst_10 = arith.constant 2.000000e-01 : f32
    %10 = vector.broadcast %cst_10 : f32 to vector<64x64xf32>
    %11 = arith.mulf %10, %7 : vector<64x64xf32>
    %12 = arith.select %9, %7, %11 : vector<64x64xi1>, vector<64x64xf32>
    %cst_11 = arith.constant dense<0.000000e+00> : vector<64x128xf32>
    %13 = tpu.matmul %12, %3, %cst_11 {dimension_numbers = #tpu.dot_dimension_numbers<[1], [0], [0], [1], [0, 0, 1, 1], [], []>} : vector<64x64xf32>, vector<64x128xf32>, vector<64x128xf32> -> vector<64x128xf32>
    %14 = vector.broadcast %4 : vector<1x128xf32> to vector<64x128xf32>
    %15 = arith.addf %13, %14 : vector<64x128xf32>
    %cst_12 = arith.constant dense<0.000000e+00> : vector<128xf32>
    %16 = vector.multi_reduction <add>, %15, %cst_12 [0] : vector<64x128xf32> to vector<128xf32>
    %17 = vector.shape_cast %16 : vector<128xf32> to vector<1x128xf32>
    %18 = arith.mulf %15, %15 : vector<64x128xf32>
    %cst_13 = arith.constant dense<0.000000e+00> : vector<128xf32>
    %19 = vector.multi_reduction <add>, %18, %cst_13 [0] : vector<64x128xf32> to vector<128xf32>
    %20 = vector.shape_cast %19 : vector<128xf32> to vector<1x128xf32>
    %21 = vector.shape_cast %17 : vector<1x128xf32> to vector<1x128xf32>
    %22 = vector.broadcast %21 : vector<1x128xf32> to vector<8x128xf32>
    %c0_14 = arith.constant 0 : index
    %c0_15 = arith.constant 0 : index
    %c0_16 = arith.constant 0 : index
    %23 = vector.load %arg6[%c0_14, %c0_15, %c0_16] : memref<1x8x128xf32, #tpu.memory_space<vmem>>, vector<1x8x128xf32>
    %24 = vector.shape_cast %23 : vector<1x8x128xf32> to vector<8x128xf32>
    %25 = vector.shape_cast %22 : vector<8x128xf32> to vector<1x8x128xf32>
    tpu.vector_store %arg6[%c0_14, %c0_15, %c0_16], %25 {strides = array<i32>} : memref<1x8x128xf32, #tpu.memory_space<vmem>>, vector<1x8x128xf32>,
    %26 = vector.shape_cast %20 : vector<1x128xf32> to vector<1x128xf32>
    %27 = vector.broadcast %26 : vector<1x128xf32> to vector<8x128xf32>
    %c0_17 = arith.constant 0 : index
    %c0_18 = arith.constant 0 : index
    %c0_19 = arith.constant 0 : index
    %28 = vector.load %arg7[%c0_17, %c0_18, %c0_19] : memref<1x8x128xf32, #tpu.memory_space<vmem>>, vector<1x8x128xf32>
    %29 = vector.shape_cast %28 : vector<1x8x128xf32> to vector<8x128xf32>
    %30 = vector.shape_cast %27 : vector<8x128xf32> to vector<1x8x128xf32>
    tpu.vector_store %arg7[%c0_17, %c0_18, %c0_19], %30 {strides = array<i32>} : memref<1x8x128xf32, #tpu.memory_space<vmem>>, vector<1x8x128xf32>,
    return
  }
  func.func @transform_0(%arg0: i32) -> (i32, i32) {
    %c0_i32 = arith.constant 0 : i32
    %c0_i32_0 = arith.constant 0 : i32
    return %arg0, %c0_i32 : i32, i32
  }
  func.func @transform_1(%arg0: i32) -> (i32, i32) {
    %c0_i32 = arith.constant 0 : i32
    %c0_i32_0 = arith.constant 0 : i32
    %c0_i32_1 = arith.constant 0 : i32
    return %c0_i32, %c0_i32_0 : i32, i32
  }
  func.func @transform_2(%arg0: i32) -> (i32, i32) {
    %c0_i32 = arith.constant 0 : i32
    %c0_i32_0 = arith.constant 0 : i32
    %c0_i32_1 = arith.constant 0 : i32
    return %c0_i32, %c0_i32_0 : i32, i32
  }
  func.func @transform_3(%arg0: i32) -> (i32, i32) {
    %c0_i32 = arith.constant 0 : i32
    %c0_i32_0 = arith.constant 0 : i32
    %c0_i32_1 = arith.constant 0 : i32
    return %c0_i32, %c0_i32_0 : i32, i32
  }
  func.func @transform_4(%arg0: i32) -> (i32, i32) {
    %c0_i32 = arith.constant 0 : i32
    %c0_i32_0 = arith.constant 0 : i32
    %c0_i32_1 = arith.constant 0 : i32
    return %c0_i32, %c0_i32_0 : i32, i32
  }
  func.func @transform_5(%arg0: i32) -> (i32, i32, i32) {
    %c0_i32 = arith.constant 0 : i32
    %c0_i32_0 = arith.constant 0 : i32
    %c0_i32_1 = arith.constant 0 : i32
    return %arg0, %c0_i32, %c0_i32_0 : i32, i32, i32
  }
  func.func @transform_6(%arg0: i32) -> (i32, i32, i32) {
    %c0_i32 = arith.constant 0 : i32
    %c0_i32_0 = arith.constant 0 : i32
    %c0_i32_1 = arith.constant 0 : i32
    return %arg0, %c0_i32, %c0_i32_0 : i32, i32, i32
  }
}

module attributes {stable_mosaic.version = 11 : i64} {
  func.func @_stage2_kernel(%arg0: i32, %arg1: memref<64x8xf32, #tpu.memory_space<vmem>>, %arg2: memref<8x64xf32, #tpu.memory_space<vmem>>, %arg3: memref<1x64xf32, #tpu.memory_space<vmem>>, %arg4: memref<64x128xf32, #tpu.memory_space<vmem>>, %arg5: memref<1x128xf32, #tpu.memory_space<vmem>>, %arg6: memref<1x128xf32, #tpu.memory_space<vmem>>, %arg7: memref<1x128xf32, #tpu.memory_space<vmem>>, %arg8: memref<128x1024xbf16, #tpu.memory_space<vmem>>, %arg9: memref<1x1024xf32, #tpu.memory_space<vmem>>, %arg10: memref<1x8x1024xf32, #tpu.memory_space<vmem>>, %arg11: memref<1x8x1024xf32, #tpu.memory_space<vmem>>) attributes {dimension_semantics = [#tpu.dimension_semantics<parallel>], iteration_bounds = array<i64: 1>, scalar_prefetch = 0 : i64, scratch_operands = 0 : i64, tpu.core_type = #tpu.core_type<tc>, window_params = [{transform_indices = @transform_0, window_bounds = array<i64: 64, 8>}, {pipeline_mode = #tpu.pipeline_mode<synchronous>, transform_indices = @transform_1, window_bounds = array<i64: 8, 64>}, {pipeline_mode = #tpu.pipeline_mode<synchronous>, transform_indices = @transform_2, window_bounds = array<i64: 1, 64>}, {pipeline_mode = #tpu.pipeline_mode<synchronous>, transform_indices = @transform_3, window_bounds = array<i64: 64, 128>}, {pipeline_mode = #tpu.pipeline_mode<synchronous>, transform_indices = @transform_4, window_bounds = array<i64: 1, 128>}, {pipeline_mode = #tpu.pipeline_mode<synchronous>, transform_indices = @transform_5, window_bounds = array<i64: 1, 128>}, {pipeline_mode = #tpu.pipeline_mode<synchronous>, transform_indices = @transform_6, window_bounds = array<i64: 1, 128>}, {pipeline_mode = #tpu.pipeline_mode<synchronous>, transform_indices = @transform_7, window_bounds = array<i64: 128, 1024>}, {pipeline_mode = #tpu.pipeline_mode<synchronous>, transform_indices = @transform_8, window_bounds = array<i64: 1, 1024>}, {transform_indices = @transform_9, window_bounds = array<i64: 1, 8, 1024>}, {transform_indices = @transform_10, window_bounds = array<i64: 1, 8, 1024>}]} {
    %c0 = arith.constant 0 : index
    %c0_0 = arith.constant 0 : index
    %0 = vector.load %arg1[%c0, %c0_0] : memref<64x8xf32, #tpu.memory_space<vmem>>, vector<64x8xf32>
    %c0_1 = arith.constant 0 : index
    %c0_2 = arith.constant 0 : index
    %1 = vector.load %arg2[%c0_1, %c0_2] : memref<8x64xf32, #tpu.memory_space<vmem>>, vector<8x64xf32>
    %c0_3 = arith.constant 0 : index
    %c0_4 = arith.constant 0 : index
    %2 = vector.load %arg3[%c0_3, %c0_4] : memref<1x64xf32, #tpu.memory_space<vmem>>, vector<1x64xf32>
    %c0_5 = arith.constant 0 : index
    %c0_6 = arith.constant 0 : index
    %3 = vector.load %arg4[%c0_5, %c0_6] : memref<64x128xf32, #tpu.memory_space<vmem>>, vector<64x128xf32>
    %c0_7 = arith.constant 0 : index
    %c0_8 = arith.constant 0 : index
    %4 = vector.load %arg5[%c0_7, %c0_8] : memref<1x128xf32, #tpu.memory_space<vmem>>, vector<1x128xf32>
    %cst = arith.constant dense<0.000000e+00> : vector<64x64xf32>
    %5 = tpu.matmul %0, %1, %cst {dimension_numbers = #tpu.dot_dimension_numbers<[1], [0], [0], [1], [0, 0, 1, 1], [], []>} : vector<64x8xf32>, vector<8x64xf32>, vector<64x64xf32> -> vector<64x64xf32>
    %6 = vector.broadcast %2 : vector<1x64xf32> to vector<64x64xf32>
    %7 = arith.addf %5, %6 : vector<64x64xf32>
    %cst_9 = arith.constant 0.000000e+00 : f32
    %8 = vector.broadcast %cst_9 : f32 to vector<64x64xf32>
    %9 = arith.cmpf ogt, %7, %8 : vector<64x64xf32>
    %cst_10 = arith.constant 2.000000e-01 : f32
    %10 = vector.broadcast %cst_10 : f32 to vector<64x64xf32>
    %11 = arith.mulf %10, %7 : vector<64x64xf32>
    %12 = arith.select %9, %7, %11 : vector<64x64xi1>, vector<64x64xf32>
    %cst_11 = arith.constant dense<0.000000e+00> : vector<64x128xf32>
    %13 = tpu.matmul %12, %3, %cst_11 {dimension_numbers = #tpu.dot_dimension_numbers<[1], [0], [0], [1], [0, 0, 1, 1], [], []>} : vector<64x64xf32>, vector<64x128xf32>, vector<64x128xf32> -> vector<64x128xf32>
    %14 = vector.broadcast %4 : vector<1x128xf32> to vector<64x128xf32>
    %15 = arith.addf %13, %14 : vector<64x128xf32>
    %c0_12 = arith.constant 0 : index
    %c0_13 = arith.constant 0 : index
    %16 = vector.load %arg6[%c0_12, %c0_13] : memref<1x128xf32, #tpu.memory_space<vmem>>, vector<1x128xf32>
    %c0_14 = arith.constant 0 : index
    %c0_15 = arith.constant 0 : index
    %17 = vector.load %arg7[%c0_14, %c0_15] : memref<1x128xf32, #tpu.memory_space<vmem>>, vector<1x128xf32>
    %c0_16 = arith.constant 0 : index
    %c0_17 = arith.constant 0 : index
    %18 = vector.load %arg8[%c0_16, %c0_17] : memref<128x1024xbf16, #tpu.memory_space<vmem>>, vector<128x1024xbf16>
    %c0_18 = arith.constant 0 : index
    %c0_19 = arith.constant 0 : index
    %19 = vector.load %arg9[%c0_18, %c0_19] : memref<1x1024xf32, #tpu.memory_space<vmem>>, vector<1x1024xf32>
    %20 = vector.broadcast %16 : vector<1x128xf32> to vector<64x128xf32>
    %21 = arith.mulf %15, %20 : vector<64x128xf32>
    %22 = vector.broadcast %17 : vector<1x128xf32> to vector<64x128xf32>
    %23 = arith.addf %21, %22 : vector<64x128xf32>
    %cst_20 = arith.constant 0.000000e+00 : f32
    %24 = vector.broadcast %cst_20 : f32 to vector<64x128xf32>
    %25 = arith.cmpf ogt, %23, %24 : vector<64x128xf32>
    %cst_21 = arith.constant 2.000000e-01 : f32
    %26 = vector.broadcast %cst_21 : f32 to vector<64x128xf32>
    %27 = arith.mulf %26, %23 : vector<64x128xf32>
    %28 = arith.select %25, %23, %27 : vector<64x128xi1>, vector<64x128xf32>
    %29 = arith.truncf %28 : vector<64x128xf32> to vector<64x128xbf16>
    %cst_22 = arith.constant dense<0.000000e+00> : vector<64x1024xf32>
    %30 = tpu.matmul %29, %18, %cst_22 {dimension_numbers = #tpu.dot_dimension_numbers<[1], [0], [0], [1], [0, 0, 1, 1], [], []>} : vector<64x128xbf16>, vector<128x1024xbf16>, vector<64x1024xf32> -> vector<64x1024xf32>
    %31 = vector.broadcast %19 : vector<1x1024xf32> to vector<64x1024xf32>
    %32 = arith.addf %30, %31 : vector<64x1024xf32>
    %cst_23 = arith.constant dense<0.000000e+00> : vector<1024xf32>
    %33 = vector.multi_reduction <add>, %32, %cst_23 [0] : vector<64x1024xf32> to vector<1024xf32>
    %34 = vector.shape_cast %33 : vector<1024xf32> to vector<1x1024xf32>
    %35 = arith.mulf %32, %32 : vector<64x1024xf32>
    %cst_24 = arith.constant dense<0.000000e+00> : vector<1024xf32>
    %36 = vector.multi_reduction <add>, %35, %cst_24 [0] : vector<64x1024xf32> to vector<1024xf32>
    %37 = vector.shape_cast %36 : vector<1024xf32> to vector<1x1024xf32>
    %38 = vector.shape_cast %34 : vector<1x1024xf32> to vector<1x1024xf32>
    %39 = vector.broadcast %38 : vector<1x1024xf32> to vector<8x1024xf32>
    %c0_25 = arith.constant 0 : index
    %c0_26 = arith.constant 0 : index
    %c0_27 = arith.constant 0 : index
    %40 = vector.load %arg10[%c0_25, %c0_26, %c0_27] : memref<1x8x1024xf32, #tpu.memory_space<vmem>>, vector<1x8x1024xf32>
    %41 = vector.shape_cast %40 : vector<1x8x1024xf32> to vector<8x1024xf32>
    %42 = vector.shape_cast %39 : vector<8x1024xf32> to vector<1x8x1024xf32>
    tpu.vector_store %arg10[%c0_25, %c0_26, %c0_27], %42 {strides = array<i32>} : memref<1x8x1024xf32, #tpu.memory_space<vmem>>, vector<1x8x1024xf32>,
    %43 = vector.shape_cast %37 : vector<1x1024xf32> to vector<1x1024xf32>
    %44 = vector.broadcast %43 : vector<1x1024xf32> to vector<8x1024xf32>
    %c0_28 = arith.constant 0 : index
    %c0_29 = arith.constant 0 : index
    %c0_30 = arith.constant 0 : index
    %45 = vector.load %arg11[%c0_28, %c0_29, %c0_30] : memref<1x8x1024xf32, #tpu.memory_space<vmem>>, vector<1x8x1024xf32>
    %46 = vector.shape_cast %45 : vector<1x8x1024xf32> to vector<8x1024xf32>
    %47 = vector.shape_cast %44 : vector<8x1024xf32> to vector<1x8x1024xf32>
    tpu.vector_store %arg11[%c0_28, %c0_29, %c0_30], %47 {strides = array<i32>} : memref<1x8x1024xf32, #tpu.memory_space<vmem>>, vector<1x8x1024xf32>,
    return
  }
  func.func @transform_0(%arg0: i32) -> (i32, i32) {
    %c0_i32 = arith.constant 0 : i32
    %c0_i32_0 = arith.constant 0 : i32
    return %arg0, %c0_i32 : i32, i32
  }
  func.func @transform_1(%arg0: i32) -> (i32, i32) {
    %c0_i32 = arith.constant 0 : i32
    %c0_i32_0 = arith.constant 0 : i32
    %c0_i32_1 = arith.constant 0 : i32
    return %c0_i32, %c0_i32_0 : i32, i32
  }
  func.func @transform_2(%arg0: i32) -> (i32, i32) {
    %c0_i32 = arith.constant 0 : i32
    %c0_i32_0 = arith.constant 0 : i32
    %c0_i32_1 = arith.constant 0 : i32
    return %c0_i32, %c0_i32_0 : i32, i32
  }
  func.func @transform_3(%arg0: i32) -> (i32, i32) {
    %c0_i32 = arith.constant 0 : i32
    %c0_i32_0 = arith.constant 0 : i32
    %c0_i32_1 = arith.constant 0 : i32
    return %c0_i32, %c0_i32_0 : i32, i32
  }
  func.func @transform_4(%arg0: i32) -> (i32, i32) {
    %c0_i32 = arith.constant 0 : i32
    %c0_i32_0 = arith.constant 0 : i32
    %c0_i32_1 = arith.constant 0 : i32
    return %c0_i32, %c0_i32_0 : i32, i32
  }
  func.func @transform_5(%arg0: i32) -> (i32, i32) {
    %c0_i32 = arith.constant 0 : i32
    %c0_i32_0 = arith.constant 0 : i32
    %c0_i32_1 = arith.constant 0 : i32
    return %c0_i32, %c0_i32_0 : i32, i32
  }
  func.func @transform_6(%arg0: i32) -> (i32, i32) {
    %c0_i32 = arith.constant 0 : i32
    %c0_i32_0 = arith.constant 0 : i32
    %c0_i32_1 = arith.constant 0 : i32
    return %c0_i32, %c0_i32_0 : i32, i32
  }
  func.func @transform_7(%arg0: i32) -> (i32, i32) {
    %c0_i32 = arith.constant 0 : i32
    %c0_i32_0 = arith.constant 0 : i32
    %c0_i32_1 = arith.constant 0 : i32
    return %c0_i32, %c0_i32_0 : i32, i32
  }
  func.func @transform_8(%arg0: i32) -> (i32, i32) {
    %c0_i32 = arith.constant 0 : i32
    %c0_i32_0 = arith.constant 0 : i32
    %c0_i32_1 = arith.constant 0 : i32
    return %c0_i32, %c0_i32_0 : i32, i32
  }
  func.func @transform_9(%arg0: i32) -> (i32, i32, i32) {
    %c0_i32 = arith.constant 0 : i32
    %c0_i32_0 = arith.constant 0 : i32
    %c0_i32_1 = arith.constant 0 : i32
    return %arg0, %c0_i32, %c0_i32_0 : i32, i32, i32
  }
  func.func @transform_10(%arg0: i32) -> (i32, i32, i32) {
    %c0_i32 = arith.constant 0 : i32
    %c0_i32_0 = arith.constant 0 : i32
    %c0_i32_1 = arith.constant 0 : i32
    return %arg0, %c0_i32, %c0_i32_0 : i32, i32, i32
  }
}

module attributes {stable_mosaic.version = 11 : i64} {
  func.func @_stage3_kernel(%arg0: i32, %arg1: memref<64x8xf32, #tpu.memory_space<vmem>>, %arg2: memref<8x64xf32, #tpu.memory_space<vmem>>, %arg3: memref<1x64xf32, #tpu.memory_space<vmem>>, %arg4: memref<64x128xf32, #tpu.memory_space<vmem>>, %arg5: memref<1x128xf32, #tpu.memory_space<vmem>>, %arg6: memref<1x128xf32, #tpu.memory_space<vmem>>, %arg7: memref<1x128xf32, #tpu.memory_space<vmem>>, %arg8: memref<128x1024xbf16, #tpu.memory_space<vmem>>, %arg9: memref<1x1024xf32, #tpu.memory_space<vmem>>, %arg10: memref<1x1024xf32, #tpu.memory_space<vmem>>, %arg11: memref<1x1024xf32, #tpu.memory_space<vmem>>, %arg12: memref<1x1024xf32, #tpu.memory_space<vmem>>, %arg13: memref<1x1xf32, #tpu.memory_space<vmem>>, %arg14: memref<64x1xf32, #tpu.memory_space<vmem>>) attributes {dimension_semantics = [#tpu.dimension_semantics<parallel>], iteration_bounds = array<i64: 1>, scalar_prefetch = 0 : i64, scratch_operands = 0 : i64, tpu.core_type = #tpu.core_type<tc>, window_params = [{transform_indices = @transform_0, window_bounds = array<i64: 64, 8>}, {pipeline_mode = #tpu.pipeline_mode<synchronous>, transform_indices = @transform_1, window_bounds = array<i64: 8, 64>}, {pipeline_mode = #tpu.pipeline_mode<synchronous>, transform_indices = @transform_2, window_bounds = array<i64: 1, 64>}, {pipeline_mode = #tpu.pipeline_mode<synchronous>, transform_indices = @transform_3, window_bounds = array<i64: 64, 128>}, {pipeline_mode = #tpu.pipeline_mode<synchronous>, transform_indices = @transform_4, window_bounds = array<i64: 1, 128>}, {pipeline_mode = #tpu.pipeline_mode<synchronous>, transform_indices = @transform_5, window_bounds = array<i64: 1, 128>}, {pipeline_mode = #tpu.pipeline_mode<synchronous>, transform_indices = @transform_6, window_bounds = array<i64: 1, 128>}, {pipeline_mode = #tpu.pipeline_mode<synchronous>, transform_indices = @transform_7, window_bounds = array<i64: 128, 1024>}, {pipeline_mode = #tpu.pipeline_mode<synchronous>, transform_indices = @transform_8, window_bounds = array<i64: 1, 1024>}, {pipeline_mode = #tpu.pipeline_mode<synchronous>, transform_indices = @transform_9, window_bounds = array<i64: 1, 1024>}, {pipeline_mode = #tpu.pipeline_mode<synchronous>, transform_indices = @transform_10, window_bounds = array<i64: 1, 1024>}, {pipeline_mode = #tpu.pipeline_mode<synchronous>, transform_indices = @transform_11, window_bounds = array<i64: 1, 1024>}, {pipeline_mode = #tpu.pipeline_mode<synchronous>, transform_indices = @transform_12, window_bounds = array<i64: 1, 1>}, {transform_indices = @transform_13, window_bounds = array<i64: 64, 1>}]} {
    %c0 = arith.constant 0 : index
    %c0_0 = arith.constant 0 : index
    %0 = vector.load %arg1[%c0, %c0_0] : memref<64x8xf32, #tpu.memory_space<vmem>>, vector<64x8xf32>
    %c0_1 = arith.constant 0 : index
    %c0_2 = arith.constant 0 : index
    %1 = vector.load %arg2[%c0_1, %c0_2] : memref<8x64xf32, #tpu.memory_space<vmem>>, vector<8x64xf32>
    %c0_3 = arith.constant 0 : index
    %c0_4 = arith.constant 0 : index
    %2 = vector.load %arg3[%c0_3, %c0_4] : memref<1x64xf32, #tpu.memory_space<vmem>>, vector<1x64xf32>
    %c0_5 = arith.constant 0 : index
    %c0_6 = arith.constant 0 : index
    %3 = vector.load %arg4[%c0_5, %c0_6] : memref<64x128xf32, #tpu.memory_space<vmem>>, vector<64x128xf32>
    %c0_7 = arith.constant 0 : index
    %c0_8 = arith.constant 0 : index
    %4 = vector.load %arg5[%c0_7, %c0_8] : memref<1x128xf32, #tpu.memory_space<vmem>>, vector<1x128xf32>
    %cst = arith.constant dense<0.000000e+00> : vector<64x64xf32>
    %5 = tpu.matmul %0, %1, %cst {dimension_numbers = #tpu.dot_dimension_numbers<[1], [0], [0], [1], [0, 0, 1, 1], [], []>} : vector<64x8xf32>, vector<8x64xf32>, vector<64x64xf32> -> vector<64x64xf32>
    %6 = vector.broadcast %2 : vector<1x64xf32> to vector<64x64xf32>
    %7 = arith.addf %5, %6 : vector<64x64xf32>
    %cst_9 = arith.constant 0.000000e+00 : f32
    %8 = vector.broadcast %cst_9 : f32 to vector<64x64xf32>
    %9 = arith.cmpf ogt, %7, %8 : vector<64x64xf32>
    %cst_10 = arith.constant 2.000000e-01 : f32
    %10 = vector.broadcast %cst_10 : f32 to vector<64x64xf32>
    %11 = arith.mulf %10, %7 : vector<64x64xf32>
    %12 = arith.select %9, %7, %11 : vector<64x64xi1>, vector<64x64xf32>
    %cst_11 = arith.constant dense<0.000000e+00> : vector<64x128xf32>
    %13 = tpu.matmul %12, %3, %cst_11 {dimension_numbers = #tpu.dot_dimension_numbers<[1], [0], [0], [1], [0, 0, 1, 1], [], []>} : vector<64x64xf32>, vector<64x128xf32>, vector<64x128xf32> -> vector<64x128xf32>
    %14 = vector.broadcast %4 : vector<1x128xf32> to vector<64x128xf32>
    %15 = arith.addf %13, %14 : vector<64x128xf32>
    %c0_12 = arith.constant 0 : index
    %c0_13 = arith.constant 0 : index
    %16 = vector.load %arg6[%c0_12, %c0_13] : memref<1x128xf32, #tpu.memory_space<vmem>>, vector<1x128xf32>
    %c0_14 = arith.constant 0 : index
    %c0_15 = arith.constant 0 : index
    %17 = vector.load %arg7[%c0_14, %c0_15] : memref<1x128xf32, #tpu.memory_space<vmem>>, vector<1x128xf32>
    %c0_16 = arith.constant 0 : index
    %c0_17 = arith.constant 0 : index
    %18 = vector.load %arg8[%c0_16, %c0_17] : memref<128x1024xbf16, #tpu.memory_space<vmem>>, vector<128x1024xbf16>
    %c0_18 = arith.constant 0 : index
    %c0_19 = arith.constant 0 : index
    %19 = vector.load %arg9[%c0_18, %c0_19] : memref<1x1024xf32, #tpu.memory_space<vmem>>, vector<1x1024xf32>
    %20 = vector.broadcast %16 : vector<1x128xf32> to vector<64x128xf32>
    %21 = arith.mulf %15, %20 : vector<64x128xf32>
    %22 = vector.broadcast %17 : vector<1x128xf32> to vector<64x128xf32>
    %23 = arith.addf %21, %22 : vector<64x128xf32>
    %cst_20 = arith.constant 0.000000e+00 : f32
    %24 = vector.broadcast %cst_20 : f32 to vector<64x128xf32>
    %25 = arith.cmpf ogt, %23, %24 : vector<64x128xf32>
    %cst_21 = arith.constant 2.000000e-01 : f32
    %26 = vector.broadcast %cst_21 : f32 to vector<64x128xf32>
    %27 = arith.mulf %26, %23 : vector<64x128xf32>
    %28 = arith.select %25, %23, %27 : vector<64x128xi1>, vector<64x128xf32>
    %29 = arith.truncf %28 : vector<64x128xf32> to vector<64x128xbf16>
    %cst_22 = arith.constant dense<0.000000e+00> : vector<64x1024xf32>
    %30 = tpu.matmul %29, %18, %cst_22 {dimension_numbers = #tpu.dot_dimension_numbers<[1], [0], [0], [1], [0, 0, 1, 1], [], []>} : vector<64x128xbf16>, vector<128x1024xbf16>, vector<64x1024xf32> -> vector<64x1024xf32>
    %31 = vector.broadcast %19 : vector<1x1024xf32> to vector<64x1024xf32>
    %32 = arith.addf %30, %31 : vector<64x1024xf32>
    %c0_23 = arith.constant 0 : index
    %c0_24 = arith.constant 0 : index
    %33 = vector.load %arg10[%c0_23, %c0_24] : memref<1x1024xf32, #tpu.memory_space<vmem>>, vector<1x1024xf32>
    %34 = vector.broadcast %33 : vector<1x1024xf32> to vector<64x1024xf32>
    %35 = arith.mulf %32, %34 : vector<64x1024xf32>
    %c0_25 = arith.constant 0 : index
    %c0_26 = arith.constant 0 : index
    %36 = vector.load %arg11[%c0_25, %c0_26] : memref<1x1024xf32, #tpu.memory_space<vmem>>, vector<1x1024xf32>
    %37 = vector.broadcast %36 : vector<1x1024xf32> to vector<64x1024xf32>
    %38 = arith.addf %35, %37 : vector<64x1024xf32>
    %cst_27 = arith.constant 0.000000e+00 : f32
    %39 = vector.broadcast %cst_27 : f32 to vector<64x1024xf32>
    %40 = arith.cmpf ogt, %38, %39 : vector<64x1024xf32>
    %cst_28 = arith.constant 2.000000e-01 : f32
    %41 = vector.broadcast %cst_28 : f32 to vector<64x1024xf32>
    %42 = arith.mulf %41, %38 : vector<64x1024xf32>
    %43 = arith.select %40, %38, %42 : vector<64x1024xi1>, vector<64x1024xf32>
    %c0_29 = arith.constant 0 : index
    %c0_30 = arith.constant 0 : index
    %44 = vector.load %arg12[%c0_29, %c0_30] : memref<1x1024xf32, #tpu.memory_space<vmem>>, vector<1x1024xf32>
    %45 = vector.broadcast %44 : vector<1x1024xf32> to vector<64x1024xf32>
    %46 = arith.mulf %43, %45 : vector<64x1024xf32>
    %cst_31 = arith.constant dense<0.000000e+00> : vector<64xf32>
    %47 = vector.multi_reduction <add>, %46, %cst_31 [1] : vector<64x1024xf32> to vector<64xf32>
    %48 = vector.shape_cast %47 : vector<64xf32> to vector<64x1xf32>
    %c0_32 = arith.constant 0 : index
    %c0_33 = arith.constant 0 : index
    %49 = vector.load %arg13[%c0_32, %c0_33] : memref<1x1xf32, #tpu.memory_space<vmem>>, vector<1x1xf32>
    %50 = vector.broadcast %49 : vector<1x1xf32> to vector<64x1xf32>
    %51 = arith.addf %48, %50 : vector<64x1xf32>
    %52 = arith.negf %51 : vector<64x1xf32>
    %53 = math.exp %52 : vector<64x1xf32>
    %cst_34 = arith.constant 1.000000e+00 : f32
    %54 = vector.broadcast %cst_34 : f32 to vector<64x1xf32>
    %55 = arith.addf %54, %53 : vector<64x1xf32>
    %56 = arith.divf %54, %55 : vector<64x1xf32>
    %c0_35 = arith.constant 0 : index
    %c0_36 = arith.constant 0 : index
    %57 = vector.load %arg14[%c0_35, %c0_36] : memref<64x1xf32, #tpu.memory_space<vmem>>, vector<64x1xf32>
    tpu.vector_store %arg14[%c0_35, %c0_36], %56 {strides = array<i32>} : memref<64x1xf32, #tpu.memory_space<vmem>>, vector<64x1xf32>,
    return
  }
  func.func @transform_0(%arg0: i32) -> (i32, i32) {
    %c0_i32 = arith.constant 0 : i32
    %c0_i32_0 = arith.constant 0 : i32
    return %arg0, %c0_i32 : i32, i32
  }
  func.func @transform_1(%arg0: i32) -> (i32, i32) {
    %c0_i32 = arith.constant 0 : i32
    %c0_i32_0 = arith.constant 0 : i32
    %c0_i32_1 = arith.constant 0 : i32
    return %c0_i32, %c0_i32_0 : i32, i32
  }
  func.func @transform_2(%arg0: i32) -> (i32, i32) {
    %c0_i32 = arith.constant 0 : i32
    %c0_i32_0 = arith.constant 0 : i32
    %c0_i32_1 = arith.constant 0 : i32
    return %c0_i32, %c0_i32_0 : i32, i32
  }
  func.func @transform_3(%arg0: i32) -> (i32, i32) {
    %c0_i32 = arith.constant 0 : i32
    %c0_i32_0 = arith.constant 0 : i32
    %c0_i32_1 = arith.constant 0 : i32
    return %c0_i32, %c0_i32_0 : i32, i32
  }
  func.func @transform_4(%arg0: i32) -> (i32, i32) {
    %c0_i32 = arith.constant 0 : i32
    %c0_i32_0 = arith.constant 0 : i32
    %c0_i32_1 = arith.constant 0 : i32
    return %c0_i32, %c0_i32_0 : i32, i32
  }
  func.func @transform_5(%arg0: i32) -> (i32, i32) {
    %c0_i32 = arith.constant 0 : i32
    %c0_i32_0 = arith.constant 0 : i32
    %c0_i32_1 = arith.constant 0 : i32
    return %c0_i32, %c0_i32_0 : i32, i32
  }
  func.func @transform_6(%arg0: i32) -> (i32, i32) {
    %c0_i32 = arith.constant 0 : i32
    %c0_i32_0 = arith.constant 0 : i32
    %c0_i32_1 = arith.constant 0 : i32
    return %c0_i32, %c0_i32_0 : i32, i32
  }
  func.func @transform_7(%arg0: i32) -> (i32, i32) {
    %c0_i32 = arith.constant 0 : i32
    %c0_i32_0 = arith.constant 0 : i32
    %c0_i32_1 = arith.constant 0 : i32
    return %c0_i32, %c0_i32_0 : i32, i32
  }
  func.func @transform_8(%arg0: i32) -> (i32, i32) {
    %c0_i32 = arith.constant 0 : i32
    %c0_i32_0 = arith.constant 0 : i32
    %c0_i32_1 = arith.constant 0 : i32
    return %c0_i32, %c0_i32_0 : i32, i32
  }
  func.func @transform_9(%arg0: i32) -> (i32, i32) {
    %c0_i32 = arith.constant 0 : i32
    %c0_i32_0 = arith.constant 0 : i32
    %c0_i32_1 = arith.constant 0 : i32
    return %c0_i32, %c0_i32_0 : i32, i32
  }
  func.func @transform_10(%arg0: i32) -> (i32, i32) {
    %c0_i32 = arith.constant 0 : i32
    %c0_i32_0 = arith.constant 0 : i32
    %c0_i32_1 = arith.constant 0 : i32
    return %c0_i32, %c0_i32_0 : i32, i32
  }
  func.func @transform_11(%arg0: i32) -> (i32, i32) {
    %c0_i32 = arith.constant 0 : i32
    %c0_i32_0 = arith.constant 0 : i32
    %c0_i32_1 = arith.constant 0 : i32
    return %c0_i32, %c0_i32_0 : i32, i32
  }
  func.func @transform_12(%arg0: i32) -> (i32, i32) {
    %c0_i32 = arith.constant 0 : i32
    %c0_i32_0 = arith.constant 0 : i32
    %c0_i32_1 = arith.constant 0 : i32
    return %c0_i32, %c0_i32_0 : i32, i32
  }
  func.func @transform_13(%arg0: i32) -> (i32, i32) {
    %c0_i32 = arith.constant 0 : i32
    %c0_i32_0 = arith.constant 0 : i32
    return %arg0, %c0_i32 : i32, i32
  }
}

</mosaic_0001>

<bundles_post_ra>
// kernel: discriminator_forward.3
= control target key start
LH: loop header
LB: loop body
LE: loop exit
PB: predicated region body
PF: predicated region fallthrough
CT: control target
= control target key end

     0   :  { %vm47_vm0 = vcmask 64512   ;;  %vm207_vm1 = vcmask 523264   ;;  %s596_s1 = inlined_call_operand.vmem [shape: f32[8,64], index: 1, kind: input, shape index: {}]   ;;  %s597_s0 = inlined_call_operand.vmem [shape: f32[64,8], index: 0, kind: input, shape index: {}]   ;;  %s598_s3 = inlined_call_operand.vmem [shape: f32[64,128], index: 3, kind: input, shape index: {}]   ;;  %s599_s2 = inlined_call_operand.vmem [shape: f32[1,64], index: 2, kind: input, shape index: {}]   ;;  %s600_s4 = inlined_call_operand.vmem [shape: f32[1,128], index: 4, kind: input, shape index: {}]   ;;  %s601_s5 = inlined_call_operand.vmem [shape: f32[1,8,128], index: 5, kind: output, shape index: {0}]   ;;  %s602_s6 = inlined_call_operand.vmem [shape: f32[1,8,128], index: 6, kind: output, shape index: {1}]  }
   0x1   :  { %v30_v0 = vld [vmem:[%s596_s1] sm:$0xff]  ;;  %v23_v2 = vld [vmem:[%s597_s0 + $0x8] sm:$0xff]  ;;  %v24_v3 = vld [vmem:[%s597_s0 + $0x10] sm:$0xff] }
   0x2   :  { %v22_v1 = vld [vmem:[%s597_s0] sm:$0xff]  ;;  %424 = vmatprep.subr.mxu0 %v30_v0  ;;  %v39_v4 = vld [vmem:[%s598_s3 + $0x38] sm:$0xff]  ;;  %v38_v5 = vld [vmem:[%s598_s3 + $0x30] sm:$0xff] }
   0x3   :  { %426 = vmatprep.mubr.msk.f32.mxu0 %vm47_vm0, %v22_v1  ;;  %425 = vmatpush3.msra.mxu0 %v30_v0  ;;  %v25_v6 = vld [vmem:[%s597_s0 + $0x18] sm:$0xff]  ;;  %v26_v7 = vld [vmem:[%s597_s0 + $0x20] sm:$0xff]  ;;  %v37_v8 = vld [vmem:[%s598_s3 + $0x28] sm:$0xff] }
   0x4   :  { %427 = vmatmul.mubr.msk.f32.vlgmr.msra.gmra.mxu0 %vm47_vm0, %v23_v2  ;;  %438 = vmatprep.subr.mxu0 %v39_v4  ;;  %v27_v9 = vld [vmem:[%s597_s0 + $0x28] sm:$0xff]  ;;  %v36_v10 = vld [vmem:[%s598_s3 + $0x20] sm:$0xff]  ;;  %v28_v11 = vld [vmem:[%s597_s0 + $0x30] sm:$0xff] }
   0x5   :  { %429 = vmatprep.mubr.msk.f32.mxu0 %vm47_vm0, %v24_v3  ;;  %439 = vmatpush3.msra.mxu0 %v39_v4  ;;  %v29_v12 = vld [vmem:[%s597_s0 + $0x38] sm:$0xff]  ;;  %v34_v14 = vld [vmem:[%s598_s3 + $0x10] sm:$0xff]  ;;  %v33_v15 = vld [vmem:[%s598_s3 + $0x8] sm:$0xff] }
   0x6   :  { %466 = vmatprep.subr.mxu1 %v39_v4  ;;  %440 = vmatprep.subr.mxu0 %v38_v5  ;;  %v35_v13 = vld [vmem:[%s598_s3 + $0x18] sm:$0xff]  ;;  %v32_v16 = vld [vmem:[%s598_s3] sm:$0xff] }
   0x7   :  { %474 = vmatpush3.msra.mxu1 %v39_v4  ;;  %441 = vmatpush3.msra.mxu0 %v38_v5  ;;  %v381_v17 = vld [vmem:[%s599_s2] ss:$0 sm:$0xff] }
   0x8   :  { %430 = vmatmul.mubr.msk.f32.gmra.mxu0 %vm47_vm0, %v25_v6  ;;  %467 = vmatprep.subr.mxu1 %v38_v5  ;;  %v390_v51 = vld [vmem:[%s600_s4] ss:$0 sm:$0xff] }
   0x9   :  { %432 = vmatprep.mubr.msk.f32.mxu0 %vm47_vm0, %v26_v7  ;;  %442 = vmatprep.subr.mxu0 %v37_v8 }
   0xa   :  { %475 = vmatpush3.msra.mxu1 %v38_v5  ;;  %443 = vmatpush3.msra.mxu0 %v37_v8 }
   0xb   :  { %468 = vmatprep.subr.mxu1 %v37_v8  ;;  %444 = vmatprep.subr.mxu0 %v36_v10 }
   0xc   :  { %433 = vmatmul.mubr.msk.f32.gmra.mxu0 %vm47_vm0, %v27_v9  ;;  %476 = vmatpush3.msra.mxu1 %v37_v8 }
   0xd   :  { %435 = vmatprep.mubr.msk.f32.mxu0 %vm47_vm0, %v28_v11  ;;  %445 = vmatpush3.msra.mxu0 %v36_v10 }
   0xe   :  { %469 = vmatprep.subr.mxu1 %v36_v10  ;;  %446 = vmatprep.subr.mxu0 %v35_v13 }
   0xf   :  { %477 = vmatpush3.msra.mxu1 %v36_v10  ;;  %447 = vmatpush3.msra.mxu0 %v35_v13 }
  0x10   :  { %436 = vmatmul.mubr.msk.f32.gmra.mxu0 %vm47_vm0, %v29_v12  ;;  %470 = vmatprep.subr.mxu1 %v35_v13 }
  0x11   :  { %478 = vmatpush3.msra.mxu1 %v35_v13  ;;  %448 = vmatprep.subr.mxu0 %v34_v14 }
  0x12   :  { %471 = vmatprep.subr.mxu1 %v34_v14  ;;  %449 = vmatpush3.msra.mxu0 %v34_v14 }
  0x13   :  { %479 = vmatpush3.msra.mxu1 %v34_v14  ;;  %450 = vmatprep.subr.mxu0 %v33_v15 }
  0x14   :  { %472 = vmatprep.subr.mxu1 %v33_v15  ;;  %451 = vmatpush3.msra.mxu0 %v33_v15 }
  0x15   :  { %480 = vmatpush3.msra.mxu1 %v33_v15  ;;  %452 = vmatprep.subr.mxu0 %v32_v16 }
  0x16   :  { %473 = vmatprep.subr.mxu1 %v32_v16  ;;  %453 = vmatpush3.msra.mxu0 %v32_v16 }
  0x17   :  { %481 = vmatpush3.msra.mxu1 %v32_v16 }
  0xc4   :  { %v428_v18 = vpop.f32.mrf.mxu0 }
  0xc5   :  { %v144_v19 = vadd.f32 %v428_v18, %v381_v17 }
  0xc6   :  { %v138_v20 = vpop.f32.mrf.mxu0 }
  0xc7   :  { %v139_v21 = vadd.f32 %v381_v17, %v138_v20  ;;  %v186_v22 = vmul.f32 0.2, %v144_v19  ;;  %vm178_vm2 = vcmp.gt.f32.partialorder %v144_v19, 0.0 }
  0xc8   :  { %v431_v23 = vpop.f32.mrf.mxu0 }
  0xc9   :  { %vm177_vm3 = vcmp.gt.f32.partialorder %v139_v21, 0.0  ;;  %v185_v24 = vmul.f32 0.2, %v139_v21  ;;  %v154_v25 = vadd.f32 %v431_v23, %v381_v17  ;;  %v194_v29 = vsel %vm178_vm2, %v144_v19, %v186_v22 }
  0xca   :  { %v148_v26 = vpop.f32.mrf.mxu0 }
  0xcb   :  { %v149_v27 = vadd.f32 %v381_v17, %v148_v26  ;;  %v193_v28 = vsel %vm177_vm3, %v139_v21, %v185_v24  ;;  %v188_v30 = vmul.f32 0.2, %v154_v25  ;;  %vm180_vm4 = vcmp.gt.f32.partialorder %v154_v25, 0.0 }
  0xcc   :  { %v434_v31 = vpop.f32.mrf.mxu0  ;;  %454 = vmatprep.mubr.msk.f32.mxu0 %vm207_vm1, %v193_v28 }
  0xcd   :  { %v164_v32 = vadd.f32 %v434_v31, %v381_v17  ;;  %455 = vmatmul.mubr.msk.f32.vlgmr.msra.gmra.mxu0 %vm207_vm1, %v194_v29  ;;  %vm179_vm5 = vcmp.gt.f32.partialorder %v149_v27, 0.0  ;;  %v187_v33 = vmul.f32 0.2, %v149_v27  ;;  %v196_v39 = vsel %vm180_vm4, %v154_v25, %v188_v30 }
  0xce   :  { %v158_v34 = vpop.f32.mrf.mxu0 }
  0xcf   :  { %v159_v35 = vadd.f32 %v381_v17, %v158_v34  ;;  %v195_v36 = vsel %vm179_vm5, %v149_v27, %v187_v33  ;;  %v190_v37 = vmul.f32 0.2, %v164_v32  ;;  %vm182_vm6 = vcmp.gt.f32.partialorder %v164_v32, 0.0 }
  0xd0   :  { %v437_v38 = vpop.f32.mrf.mxu0  ;;  %457 = vmatprep.mubr.msk.f32.mxu1 %vm207_vm1, %v195_v36 }
  0xd1   :  { %vm181_vm7 = vcmp.gt.f32.partialorder %v159_v35, 0.0  ;;  %v189_v40 = vmul.f32 0.2, %v159_v35  ;;  %v174_v41 = vadd.f32 %v437_v38, %v381_v17  ;;  %458 = vmatmul.mubr.msk.f32.vlgmr.msra.gmra.mxu1 %vm207_vm1, %v196_v39  ;;  %v198_v46 = vsel %vm182_vm6, %v164_v32, %v190_v37 }
  0xd2   :  { %v168_v42 = vpop.f32.mrf.mxu0 }
  0xd3   :  { %v169_v43 = vadd.f32 %v381_v17, %v168_v42  ;;  %v197_v44 = vsel %vm181_vm7, %v159_v35, %v189_v40  ;;  %v192_v45 = vmul.f32 0.2, %v174_v41  ;;  %vm184_vm8 = vcmp.gt.f32.partialorder %v174_v41, 0.0 }
  0xd4   :  { %460 = vmatprep.mubr.msk.f32.mxu1 %vm207_vm1, %v197_v44 }
  0xd5   :  { %vm183_vm9 = vcmp.gt.f32.partialorder %v169_v43, 0.0  ;;  %v191_v47 = vmul.f32 0.2, %v169_v43  ;;  %461 = vmatmul.mubr.msk.f32.gmra.mxu1 %vm207_vm1, %v198_v46  ;;  %v200_v49 = vsel %vm184_vm8, %v174_v41, %v192_v45 }
  0xd7   :  { %v199_v48 = vsel %vm183_vm9, %v169_v43, %v191_v47 }
  0xd8   :  { %463 = vmatprep.mubr.msk.f32.mxu1 %vm207_vm1, %v199_v48 }
  0xd9   :  { %464 = vmatmul.mubr.msk.f32.gmra.mxu1 %vm207_vm1, %v200_v49 }
 0x18d   :  { %v456_v50 = vpop.f32.mrf.mxu0 }
 0x18e   :  { %v304_v53 = vadd.f32 %v456_v50, %v390_v51 }
 0x18f   :  { %v298_v52 = vpop.f32.mrf.mxu0 }
 0x190   :  { %v299_v54 = vadd.f32 %v390_v51, %v298_v52  ;;  %v351_v58 = vmul.f32 %v304_v53, %v304_v53 }
 0x191   :  { %v459_v55 = vpop.f32.mrf.mxu1 }
 0x192   :  { %v350_v56 = vmul.f32 %v299_v54, %v299_v54  ;;  %v337_v59 = vadd.f32 %v304_v53, %v299_v54  ;;  %v314_v60 = vadd.f32 %v459_v55, %v390_v51 }
 0x193   :  { %v308_v57 = vpop.f32.mrf.mxu1 }
 0x194   :  { %v309_v61 = vadd.f32 %v390_v51, %v308_v57  ;;  %v358_v63 = vadd.f32 %v351_v58, %v350_v56  ;;  %v353_v4 = vmul.f32 %v314_v60, %v314_v60 }
 0x195   :  { %v462_v62 = vpop.f32.mrf.mxu1 }
 0x196   :  { %v338_v0 = vadd.f32 %v337_v59, %v309_v61  ;;  %v352_v1 = vmul.f32 %v309_v61, %v309_v61  ;;  %v324_v2 = vadd.f32 %v462_v62, %v390_v51 }
 0x197   :  { %v318_v3 = vpop.f32.mrf.mxu1 }
 0x198   :  { %v359_v5 = vadd.f32 %v358_v63, %v352_v1  ;;  %v319_v6 = vadd.f32 %v390_v51, %v318_v3  ;;  %v339_v7 = vadd.f32 %v338_v0, %v314_v60  ;;  %v355_v12 = vmul.f32 %v324_v2, %v324_v2 }
 0x199   :  { %v465_v8 = vpop.f32.mrf.mxu1 }
 0x19a   :  { %v340_v9 = vadd.f32 %v339_v7, %v319_v6  ;;  %v354_v10 = vmul.f32 %v319_v6, %v319_v6  ;;  %v360_v11 = vadd.f32 %v359_v5, %v353_v4  ;;  %v334_v15 = vadd.f32 %v465_v8, %v390_v51 }
 0x19b   :  { %v328_v13 = vpop.f32.mrf.mxu1 }
 0x19c   :  { %v361_v14 = vadd.f32 %v360_v11, %v354_v10  ;;  %v329_v16 = vadd.f32 %v390_v51, %v328_v13  ;;  %v341_v17 = vadd.f32 %v340_v9, %v324_v2  ;;  %v357_v21 = vmul.f32 %v334_v15, %v334_v15 }
 0x19e   :  { %v342_v18 = vadd.f32 %v341_v17, %v329_v16  ;;  %v356_v19 = vmul.f32 %v329_v16, %v329_v16  ;;  %v362_v20 = vadd.f32 %v361_v14, %v355_v12 }
 0x1a0   :  { %v343_v22 = vadd.f32 %v342_v18, %v334_v15  ;;  %v363_v23 = vadd.f32 %v362_v20, %v356_v19 }
 0x1a2   :  { %v344_v24 = vrot.slane %v343_v22, 4  ;;  %v364_v25 = vadd.f32 %v363_v23, %v357_v21 }
 0x1a4   :  { %v345_v26 = vadd.f32 %v344_v24, %v343_v22  ;;  %v365_v27 = vrot.slane %v364_v25, 4 }
 0x1a6   :  { %v346_v28 = vrot.slane %v345_v26, 2  ;;  %v366_v29 = vadd.f32 %v365_v27, %v364_v25 }
 0x1a8   :  { %v347_v30 = vadd.f32 %v346_v28, %v345_v26  ;;  %v367_v31 = vrot.slane %v366_v29, 2 }
 0x1aa   :  { %v348_v32 = vrot.slane %v347_v30, 1  ;;  %v368_v33 = vadd.f32 %v367_v31, %v366_v29 }
 0x1ac   :  { %v349_v34 = vadd.f32 %v348_v32, %v347_v30  ;;  %v369_v35 = vrot.slane %v368_v33, 1 }
 0x1ae   :  { %v370_v36 = vadd.f32 %v369_v35, %v368_v33  ;;  %371 = vst [vmem:[%s601_s5] sm:$0xff] %v349_v34 }
 0x1b0   :  { %372 = vst [vmem:[%s602_s6] sm:$0xff] %v370_v36 }

// kernel: discriminator_forward.4
= control target key start
LH: loop header
LB: loop body
LE: loop exit
PB: predicated region body
PF: predicated region fallthrough
CT: control target
= control target key end

     0   :  { %vm60_vm0 = vcmask 64512   ;;  %vm220_vm1 = vcmask 523264   ;;  %s2151_s1 = inlined_call_operand.vmem [shape: f32[8,64], index: 1, kind: input, shape index: {}]   ;;  %s2152_s0 = inlined_call_operand.vmem [shape: f32[64,8], index: 0, kind: input, shape index: {}]   ;;  %s2153_s3 = inlined_call_operand.vmem [shape: f32[64,128], index: 3, kind: input, shape index: {}]   ;;  %s2154_s7 = inlined_call_operand.vmem [shape: bf16[128,1024], index: 7, kind: input, shape index: {}]   ;;  %s2155_s2 = inlined_call_operand.vmem [shape: f32[1,64], index: 2, kind: input, shape index: {}]   ;;  %s2156_s4 = inlined_call_operand.vmem [shape: f32[1,128], index: 4, kind: input, shape index: {}]   ;;  %s2157_s5 = inlined_call_operand.vmem [shape: f32[1,128], index: 5, kind: input, shape index: {}]   ;;  %s2158_s6 = inlined_call_operand.vmem [shape: f32[1,128], index: 6, kind: input, shape index: {}]   ;;  %s2159_s8 = inlined_call_operand.vmem [shape: f32[1,1024], index: 8, kind: input, shape index: {}]   ;;  %s2160_s9 = inlined_call_operand.vmem [shape: f32[1,8,1024], index: 9, kind: output, shape index: {0}]   ;;  %s2161_s10 = inlined_call_operand.vmem [shape: f32[1,8,1024], index: 10, kind: output, shape index: {1}]  }
   0x1   :  { %v43_v0 = vld [vmem:[%s2151_s1] sm:$0xff]  ;;  %v36_v2 = vld [vmem:[%s2152_s0 + $0x8] sm:$0xff]  ;;  %v37_v3 = vld [vmem:[%s2152_s0 + $0x10] sm:$0xff] }
   0x2   :  { %v35_v1 = vld [vmem:[%s2152_s0] sm:$0xff]  ;;  %1531 = vmatprep.subr.mxu0 %v43_v0  ;;  %v52_v4 = vld [vmem:[%s2153_s3 + $0x38] sm:$0xff]  ;;  %v51_v5 = vld [vmem:[%s2153_s3 + $0x30] sm:$0xff] }
   0x3   :  { %1533 = vmatprep.mubr.msk.f32.mxu0 %vm60_vm0, %v35_v1  ;;  %1532 = vmatpush3.msra.mxu0 %v43_v0  ;;  %v38_v6 = vld [vmem:[%s2152_s0 + $0x18] sm:$0xff]  ;;  %v39_v7 = vld [vmem:[%s2152_s0 + $0x20] sm:$0xff]  ;;  %v50_v8 = vld [vmem:[%s2153_s3 + $0x28] sm:$0xff] }
   0x4   :  { %1534 = vmatmul.mubr.msk.f32.vlgmr.msra.gmra.mxu0 %vm60_vm0, %v36_v2  ;;  %1545 = vmatprep.subr.mxu1 %v52_v4  ;;  %v49_v9 = vld [vmem:[%s2153_s3 + $0x20] sm:$0xff]  ;;  %v40_v10 = vld [vmem:[%s2152_s0 + $0x28] sm:$0xff]  ;;  %v41_v11 = vld [vmem:[%s2152_s0 + $0x30] sm:$0xff] }
   0x5   :  { %1536 = vmatprep.mubr.msk.f32.mxu0 %vm60_vm0, %v37_v3  ;;  %1546 = vmatpush3.msra.mxu1 %v52_v4  ;;  %v42_v12 = vld [vmem:[%s2152_s0 + $0x38] sm:$0xff]  ;;  %v47_v14 = vld [vmem:[%s2153_s3 + $0x10] sm:$0xff]  ;;  %v46_v15 = vld [vmem:[%s2153_s3 + $0x8] sm:$0xff] }
   0x6   :  { %1547 = vmatprep.subr.mxu1 %v51_v5  ;;  %v48_v13 = vld [vmem:[%s2153_s3 + $0x18] sm:$0xff]  ;;  %v45_v16 = vld [vmem:[%s2153_s3] sm:$0xff]  ;;  %v1698_v19 = vld [vmem:[%s2154_s7 + $0x1c8] sm:$0xff] }
   0x7   :  { %1548 = vmatpush3.msra.mxu1 %v51_v5  ;;  %v408_v17 = vld [vmem:[%s2154_s7 + $0x1c0] sm:$0xff]  ;;  %v1703_v22 = vld [vmem:[%s2154_s7 + $0x1e8] sm:$0xff] }
   0x8   :  { %1537 = vmatmul.mubr.msk.f32.gmra.mxu0 %vm60_vm0, %v38_v6  ;;  %1549 = vmatprep.subr.mxu1 %v50_v8  ;;  %v412_v18 = vld [vmem:[%s2154_s7 + $0x1e0] sm:$0xff]  ;;  %v1500_v25 = vcombine.low %v1698_v19, %v1703_v22  ;;  %v1501_v26 = vcombine.high %v1698_v19, %v1703_v22  ;;  %v401_v46 = vld [vmem:[%s2154_s7 + $0x188] sm:$0xff] }
   0x9   :  { %1539 = vmatprep.mubr.msk.f32.mxu0 %vm60_vm0, %v39_v7  ;;  %1550 = vmatpush3.msra.mxu1 %v50_v8  ;;  %v1498_v20 = vcombine.low %v408_v17, %v412_v18  ;;  %v1499_v21 = vcombine.high %v408_v17, %v412_v18  ;;  %v400_v23 = vld [vmem:[%s2154_s7 + $0x180] sm:$0xff]  ;;  %v405_v47 = vld [vmem:[%s2154_s7 + $0x1a8] sm:$0xff] }
   0xa   :  { %1551 = vmatprep.subr.mxu1 %v49_v9  ;;  %v404_v24 = vld [vmem:[%s2154_s7 + $0x1a0] sm:$0xff]  ;;  %v1493_v53 = vcombine.high %v401_v46, %v405_v47  ;;  %v393_v57 = vld [vmem:[%s2154_s7 + $0x148] sm:$0xff]  ;;  %v1492_v1 = vcombine.low %v401_v46, %v405_v47 }
   0xb   :  { %1552 = vmatpush3.msra.mxu1 %v49_v9  ;;  %v1491_v27 = vcombine.high %v400_v23, %v404_v24  ;;  %v392_v28 = vld [vmem:[%s2154_s7 + $0x140] sm:$0xff]  ;;  %834 = vmatprep.subr.bf16.mxu0 %v1499_v21  ;;  %v1490_v30 = vcombine.low %v400_v23, %v404_v24  ;;  %v397_v58 = vld [vmem:[%s2154_s7 + $0x168] sm:$0xff] }
   0xc   :  { %1540 = vmatmul.mubr.msk.f32.gmra.mxu0 %vm60_vm0, %v40_v10  ;;  %1553 = vmatprep.subr.mxu1 %v48_v13  ;;  %v396_v29 = vld [vmem:[%s2154_s7 + $0x160] sm:$0xff]  ;;  %v1485_v2 = vcombine.high %v393_v57, %v397_v58  ;;  %v385_v6 = vld [vmem:[%s2154_s7 + $0x108] sm:$0xff] }
   0xd   :  { %1542 = vmatprep.mubr.msk.f32.mxu0 %vm60_vm0, %v41_v11  ;;  %1554 = vmatpush3.msra.mxu1 %v48_v13  ;;  %v1483_v31 = vcombine.high %v392_v28, %v396_v29  ;;  %v384_v32 = vld [vmem:[%s2154_s7 + $0x100] sm:$0xff]  ;;  %v1482_v34 = vcombine.low %v392_v28, %v396_v29  ;;  %v389_v7 = vld [vmem:[%s2154_s7 + $0x128] sm:$0xff]  ;;  %v1484_v13 = vcombine.low %v393_v57, %v397_v58 }
   0xe   :  { %1555 = vmatprep.subr.mxu1 %v47_v14  ;;  %835 = vmatpush1.bf16.msra.mxu0 %v1498_v20  ;;  %v388_v33 = vld [vmem:[%s2154_s7 + $0x120] sm:$0xff]  ;;  %v377_v18 = vld [vmem:[%s2154_s7 + $0xc8] sm:$0xff]  ;;  %v1476_v22 = vcombine.low %v385_v6, %v389_v7 }
   0xf   :  { %1556 = vmatpush3.msra.mxu1 %v47_v14  ;;  %836 = vmatprep.subr.bf16.mxu0 %v1491_v27  ;;  %v1475_v35 = vcombine.high %v384_v32, %v388_v33  ;;  %v376_v36 = vld [vmem:[%s2154_s7 + $0xc0] sm:$0xff]  ;;  %v1474_v38 = vcombine.low %v384_v32, %v388_v33  ;;  %v1477_v14 = vcombine.high %v385_v6, %v389_v7  ;;  %v381_v19 = vld [vmem:[%s2154_s7 + $0xe8] sm:$0xff] }
  0x10   :  { %1543 = vmatmul.mubr.msk.f32.gmra.mxu0 %vm60_vm0, %v42_v12  ;;  %1557 = vmatprep.subr.mxu1 %v46_v15  ;;  %v380_v37 = vld [vmem:[%s2154_s7 + $0xe0] sm:$0xff]  ;;  %v1469_v24 = vcombine.high %v377_v18, %v381_v19  ;;  %v369_v28 = vld [vmem:[%s2154_s7 + $0x88] sm:$0xff] }
  0x11   :  { %1558 = vmatpush3.msra.mxu1 %v46_v15  ;;  %v1467_v39 = vcombine.high %v376_v36, %v380_v37  ;;  %v1466_v40 = vcombine.low %v376_v36, %v380_v37  ;;  %v1422_v41 = vld [vmem:[%s2155_s2] ss:$0 sm:$0xff]  ;;  %v361_v36 = vld [vmem:[%s2154_s7 + $0x48] sm:$0xff] }
  0x12   :  { %1559 = vmatprep.subr.mxu1 %v45_v16  ;;  %837 = vmatpush1.bf16.msra.mxu0 %v1490_v30  ;;  %v372_v27 = vld [vmem:[%s2154_s7 + $0xa0] sm:$0xff]  ;;  %v373_v30 = vld [vmem:[%s2154_s7 + $0xa8] sm:$0xff] }
  0x13   :  { %1560 = vmatpush3.msra.mxu1 %v45_v16  ;;  %838 = vmatprep.subr.bf16.mxu0 %v1483_v31  ;;  %v1460_v32 = vcombine.low %v369_v28, %v373_v30  ;;  %v1461_v33 = vcombine.high %v369_v28, %v373_v30  ;;  %v357_v46 = vld [vmem:[%s2154_s7 + $0x28] sm:$0xff] }
  0x14   :  { %907 = vmatprep.subr.bf16.mxu1 %v1501_v26  ;;  %v368_v26 = vld [vmem:[%s2154_s7 + $0x80] sm:$0xff] }
  0x15   :  { %v1459_v29 = vcombine.high %v368_v26, %v372_v27  ;;  %v1458_v31 = vcombine.low %v368_v26, %v372_v27 }
  0x16   :  { %839 = vmatpush1.bf16.msra.mxu0 %v1482_v34  ;;  %v360_v34 = vld [vmem:[%s2154_s7 + $0x40] sm:$0xff] }
  0x17   :  { %840 = vmatprep.subr.bf16.mxu0 %v1475_v35  ;;  %v364_v35 = vld [vmem:[%s2154_s7 + $0x60] sm:$0xff] }
  0x18   :  { %v1451_v37 = vcombine.high %v360_v34, %v364_v35 }
  0x1a   :  { %841 = vmatpush1.bf16.msra.mxu0 %v1474_v38  ;;  %v365_v38 = vld [vmem:[%s2154_s7 + $0x68] sm:$0xff] }
  0x1b   :  { %842 = vmatprep.subr.bf16.mxu0 %v1467_v39  ;;  %v1450_v39 = vcombine.low %v360_v34, %v364_v35  ;;  %v395_v34 = vld [vmem:[%s2154_s7 + $0x158] sm:$0xff] }
  0x1c   :  { %v399_v35 = vld [vmem:[%s2154_s7 + $0x178] sm:$0xff] }
  0x1e   :  { %843 = vmatpush1.bf16.msra.mxu0 %v1466_v40  ;;  %v1452_v40 = vcombine.low %v361_v36, %v365_v38 }
  0x1f   :  { %844 = vmatprep.subr.bf16.mxu0 %v1459_v29 }
  0x22   :  { %845 = vmatpush1.bf16.msra.mxu0 %v1458_v31  ;;  %v394_v31 = vld [vmem:[%s2154_s7 + $0x150] sm:$0xff] }
  0x23   :  { %846 = vmatprep.subr.bf16.mxu0 %v1451_v37 }
  0x26   :  { %847 = vmatpush1.bf16.msra.mxu0 %v1450_v39 }
  0xc4   :  { %v1535_v42 = vpop.f32.mrf.mxu0 }
  0xc5   :  { %v157_v43 = vadd.f32 %v1535_v42, %v1422_v41  ;;  %v352_v42 = vld [vmem:[%s2154_s7] sm:$0xff] }
  0xc6   :  { %v151_v44 = vpop.f32.mrf.mxu0 }
  0xc7   :  { %v152_v45 = vadd.f32 %v1422_v41, %v151_v44  ;;  %v199_v48 = vmul.f32 0.2, %v157_v43  ;;  %vm191_vm2 = vcmp.gt.f32.partialorder %v157_v43, 0.0  ;;  %v353_v44 = vld [vmem:[%s2154_s7 + $0x8] sm:$0xff] }
  0xc8   :  { %v1538_v49 = vpop.f32.mrf.mxu0 }
  0xc9   :  { %v167_v50 = vadd.f32 %v1538_v49, %v1422_v41  ;;  %vm190_vm3 = vcmp.gt.f32.partialorder %v152_v45, 0.0  ;;  %v198_v51 = vmul.f32 0.2, %v152_v45  ;;  %v207_v60 = vsel %vm191_vm2, %v157_v43, %v199_v48  ;;  %v356_v43 = vld [vmem:[%s2154_s7 + $0x20] sm:$0xff] }
  0xca   :  { %v161_v52 = vpop.f32.mrf.mxu0  ;;  %v1442_v47 = vcombine.low %v352_v42, %v356_v43  ;;  %v1444_v48 = vcombine.low %v353_v44, %v357_v46  ;;  %v1445_v49 = vcombine.high %v353_v44, %v357_v46  ;;  %v1489_v44 = vcombine.high %v395_v34, %v399_v35  ;;  %v390_v46 = vld [vmem:[%s2154_s7 + $0x130] sm:$0xff] }
  0xcb   :  { %vm193_vm4 = vcmp.gt.f32.partialorder %v167_v50, 0.0  ;;  %v201_v54 = vmul.f32 0.2, %v167_v50  ;;  %v162_v55 = vadd.f32 %v1422_v41, %v161_v52  ;;  %v206_v56 = vsel %vm190_vm3, %v152_v45, %v198_v51  ;;  %v1812_v51 = vld [vmem:[%s2154_s7 + $0x1f0] sm:$0xff]  ;;  %v1817_v52 = vld [vmem:[%s2154_s7 + $0x1d8] sm:$0xff] }
  0xcc   :  { %v1541_v59 = vpop.f32.mrf.mxu0  ;;  %1561 = vmatprep.mubr.msk.f32.mxu1 %vm220_vm1, %v206_v56  ;;  %v1443_v45 = vcombine.high %v352_v42, %v356_v43 }
  0xcd   :  { %vm192_vm5 = vcmp.gt.f32.partialorder %v162_v55, 0.0  ;;  %v200_v61 = vmul.f32 0.2, %v162_v55  ;;  %v177_v62 = vadd.f32 %v1541_v59, %v1422_v41  ;;  %1562 = vmatmul.mubr.msk.f32.vlgmr.msra.gmra.mxu1 %vm220_vm1, %v207_v60  ;;  %v209_v0 = vsel %vm193_vm4, %v167_v50, %v201_v54  ;;  %v1807_v50 = vld [vmem:[%s2154_s7 + $0x1d0] sm:$0xff]  ;;  %v415_v54 = vld [vmem:[%s2154_s7 + $0x1f8] sm:$0xff] }
  0xce   :  { %v171_v63 = vpop.f32.mrf.mxu0  ;;  %908 = vmatpush1.bf16.msra.mxu1 %v1500_v25  ;;  %v1468_v25 = vcombine.low %v377_v18, %v381_v19  ;;  %848 = vmatprep.subr.bf16.mxu0 %v1443_v45  ;;  %v1502_v56 = vcombine.low %v1807_v50, %v1812_v51  ;;  %v1504_v57 = vcombine.low %v1817_v52, %v415_v54  ;;  %v1833_v59 = vld [vmem:[%s2156_s4] ss:$0 sm:$0xff]  ;;  %v386_v45 = vld [vmem:[%s2154_s7 + $0x110] sm:$0xff] }
  0xcf   :  { %vm195_vm6 = vcmp.gt.f32.partialorder %v177_v62, 0.0  ;;  %v203_v3 = vmul.f32 0.2, %v177_v62  ;;  %v172_v4 = vadd.f32 %v1422_v41, %v171_v63  ;;  %v208_v5 = vsel %vm192_vm5, %v162_v55, %v200_v61  ;;  %909 = vmatprep.subr.bf16.mxu1 %v1493_v53  ;;  %849 = vmatpush1.bf16.msra.mxu0 %v1442_v47  ;;  %v1838_v61 = vld [vmem:[%s2157_s5] ss:$0 sm:$0xff] }
  0xd0   :  { %1564 = vmatprep.mubr.msk.f32.mxu1 %vm220_vm1, %v208_v5  ;;  %v1544_v8 = vpop.f32.mrf.mxu0  ;;  %v1503_v53 = vcombine.high %v1807_v50, %v1812_v51  ;;  %v1574_v55 = vmov 0   ;;  %v1505_v58 = vcombine.high %v1817_v52, %v415_v54  ;;  %v1844_v63 = vld [vmem:[%s2158_s6] ss:$0 sm:$0xff]  ;;  %v387_v50 = vld [vmem:[%s2154_s7 + $0x118] sm:$0xff] }
  0xd1   :  { %vm194_vm7 = vcmp.gt.f32.partialorder %v172_v4, 0.0  ;;  %v202_v9 = vmul.f32 0.2, %v172_v4  ;;  %1565 = vmatmul.mubr.msk.f32.gmra.mxu1 %vm220_vm1, %v209_v0  ;;  %v187_v10 = vadd.f32 %v1544_v8, %v1422_v41  ;;  %v211_v12 = vsel %vm195_vm6, %v177_v62, %v203_v3  ;;  %866 = vmatprep.mubr.bf16.mxu0 %v1574_v55  ;;  %v391_v51 = vld [vmem:[%s2154_s7 + $0x138] sm:$0xff] }
  0xd2   :  { %v181_v11 = vpop.f32.mrf.mxu0  ;;  %910 = vmatpush1.bf16.msra.mxu1 %v1492_v1  ;;  %980 = vmatprep.subr.bf16.mxu0 %v1503_v53  ;;  %v1488_v53 = vcombine.low %v395_v34, %v399_v35  ;;  %v358_v34 = vld [vmem:[%s2154_s7 + $0x30] sm:$0xff]  ;;  %v355_v35 = vld [vmem:[%s2154_s7 + $0x18] sm:$0xff] }
  0xd3   :  { %vm197_vm8 = vcmp.gt.f32.partialorder %v187_v10, 0.0  ;;  %v205_v15 = vmul.f32 0.2, %v187_v10  ;;  %v210_v16 = vsel %vm194_vm7, %v172_v4, %v202_v9  ;;  %v182_v17 = vadd.f32 %v1422_v41, %v181_v11  ;;  %911 = vmatprep.subr.bf16.mxu1 %v1485_v2  ;;  %v402_v11 = vld [vmem:[%s2154_s7 + $0x190] sm:$0xff] }
  0xd4   :  { %1567 = vmatprep.mubr.msk.f32.mxu1 %vm220_vm1, %v210_v16  ;;  %v1453_v41 = vcombine.high %v361_v36, %v365_v38  ;;  %v403_v16 = vld [vmem:[%s2154_s7 + $0x198] sm:$0xff] }
  0xd5   :  { %vm196_vm9 = vcmp.gt.f32.partialorder %v182_v17, 0.0  ;;  %v204_v20 = vmul.f32 0.2, %v182_v17  ;;  %1568 = vmatmul.mubr.msk.f32.gmra.mxu1 %vm220_vm1, %v211_v12  ;;  %v213_v21 = vsel %vm197_vm8, %v187_v10, %v205_v15  ;;  %v406_v12 = vld [vmem:[%s2154_s7 + $0x1b0] sm:$0xff] }
  0xd6   :  { %912 = vmatpush1.bf16.msra.mxu1 %v1484_v13  ;;  %v1494_v39 = vcombine.low %v402_v11, %v406_v12 }
  0xd7   :  { %v212_v23 = vsel %vm196_vm9, %v182_v17, %v204_v20  ;;  %913 = vmatprep.subr.bf16.mxu1 %v1477_v14  ;;  %v407_v17 = vld [vmem:[%s2154_s7 + $0x1b8] sm:$0xff] }
  0xd8   :  { %1570 = vmatprep.mubr.msk.f32.mxu1 %vm220_vm1, %v212_v23  ;;  %v1497_v30 = vcombine.high %v403_v16, %v407_v17 }
  0xd9   :  { %1571 = vmatmul.mubr.msk.f32.gmra.mxu1 %vm220_vm1, %v213_v21  ;;  %v1495_v21 = vcombine.high %v402_v11, %v406_v12 }
  0xda   :  { %914 = vmatpush1.bf16.msra.mxu1 %v1476_v22  ;;  %939 = vmatprep.mubr.bf16.mxu1 %v1574_v55 }
  0xdb   :  { %915 = vmatprep.subr.bf16.mxu1 %v1469_v24 }
  0xde   :  { %916 = vmatpush1.bf16.msra.mxu1 %v1468_v25 }
  0xdf   :  { %917 = vmatprep.subr.bf16.mxu1 %v1461_v33 }
  0xe2   :  { %918 = vmatpush1.bf16.msra.mxu1 %v1460_v32  ;;  %v398_v32 = vld [vmem:[%s2154_s7 + $0x170] sm:$0xff] }
  0xe3   :  { %919 = vmatprep.subr.bf16.mxu1 %v1453_v41  ;;  %v1487_v41 = vcombine.high %v394_v31, %v398_v32  ;;  %v1486_v52 = vcombine.low %v394_v31, %v398_v32  ;;  %v354_v31 = vld [vmem:[%s2154_s7 + $0x10] sm:$0xff] }
  0xe6   :  { %920 = vmatpush1.bf16.msra.mxu1 %v1452_v40  ;;  %v1496_v40 = vcombine.low %v403_v16, %v407_v17 }
  0xe7   :  { %921 = vmatprep.subr.bf16.mxu1 %v1445_v49 }
  0xea   :  { %922 = vmatpush1.bf16.msra.mxu1 %v1444_v48 }
  0xeb   :  { %1053 = vmatprep.subr.bf16.mxu1 %v1505_v58 }
 0x18d   :  { %v1563_v60 = vpop.f32.mrf.mxu1 }
 0x18e   :  { %v317_v62 = vadd.f32 %v1563_v60, %v1833_v59  ;;  %v378_v60 = vld [vmem:[%s2154_s7 + $0xd0] sm:$0xff] }
 0x18f   :  { %v311_v0 = vpop.f32.mrf.mxu1 }
 0x190   :  { %v424_v1 = vmul.f32 %v1838_v61, %v317_v62  ;;  %v312_v2 = vadd.f32 %v1833_v59, %v311_v0  ;;  %v382_v62 = vld [vmem:[%s2154_s7 + $0xf0] sm:$0xff] }
 0x191   :  { %v1566_v3 = vpop.f32.mrf.mxu1 }
 0x192   :  { %v438_v4 = vadd.f32 %v1844_v63, %v424_v1  ;;  %v423_v5 = vmul.f32 %v1838_v61, %v312_v2  ;;  %v327_v6 = vadd.f32 %v1566_v3, %v1833_v59  ;;  %v379_v3 = vld [vmem:[%s2154_s7 + $0xd8] sm:$0xff] }
 0x193   :  { %v321_v7 = vpop.f32.mrf.mxu1 }
 0x194   :  { %v454_v8 = vmul.f32 0.2, %v438_v4  ;;  %v437_v9 = vadd.f32 %v1844_v63, %v423_v5  ;;  %v426_v10 = vmul.f32 %v1838_v61, %v327_v6  ;;  %vm446_vm10 = vcmp.gt.f32.partialorder %v438_v4, 0.0 }
 0x195   :  { %v322_v13 = vadd.f32 %v1833_v59, %v321_v7  ;;  %v1569_v14 = vpop.f32.mrf.mxu1  ;;  %v1478_v5 = vcombine.low %v386_v45, %v390_v46  ;;  %v1480_v6 = vcombine.low %v387_v50, %v391_v51  ;;  %v1471_v7 = vcombine.high %v378_v60, %v382_v62 }
 0x196   :  { %vm445_vm11 = vcmp.gt.f32.partialorder %v437_v9, 0.0  ;;  %v453_v15 = vmul.f32 0.2, %v437_v9  ;;  %v337_v19 = vadd.f32 %v1569_v14, %v1833_v59  ;;  %v462_v22 = vsel %vm446_vm10, %v438_v4, %v454_v8  ;;  %v383_v4 = vld [vmem:[%s2154_s7 + $0xf8] sm:$0xff] }
 0x197   :  { %v425_v18 = vmul.f32 %v1838_v61, %v322_v13  ;;  %v331_v20 = vpop.f32.mrf.mxu1  ;;  %v440_v24 = vadd.f32 %v1844_v63, %v426_v10  ;;  %v1473_v8 = vcombine.high %v379_v3, %v383_v4  ;;  %v374_v13 = vld [vmem:[%s2154_s7 + $0xb0] sm:$0xff]  ;;  %v371_v14 = vld [vmem:[%s2154_s7 + $0x98] sm:$0xff]  ;;  %v1472_v16 = vcombine.low %v379_v3, %v383_v4 }
 0x198   :  { %v461_v23 = vsel %vm445_vm11, %v437_v9, %v453_v15  ;;  %v332_v25 = vadd.f32 %v1833_v59, %v331_v20  ;;  %v428_v28 = vmul.f32 %v1838_v61, %v337_v19  ;;  %v370_v9 = vld [vmem:[%s2154_s7 + $0x90] sm:$0xff]  ;;  %v1470_v15 = vcombine.low %v378_v60, %v382_v62 }
 0x199   :  { %v1870_v26 = vpack.c.bf16 %v462_v22, %v461_v23  ;;  %v439_v27 = vadd.f32 %v1844_v63, %v425_v18  ;;  %v1572_v29 = vpop.f32.mrf.mxu1  ;;  %v456_v38 = vmul.f32 0.2, %v440_v24  ;;  %vm448_vm13 = vcmp.gt.f32.partialorder %v440_v24, 0.0  ;;  %v362_v20 = vld [vmem:[%s2154_s7 + $0x50] sm:$0xff] }
 0x19a   :  { %v427_v33 = vmul.f32 %v1838_v61, %v332_v25  ;;  %v442_v42 = vadd.f32 %v1844_v63, %v428_v28  ;;  %v347_v43 = vadd.f32 %v1572_v29, %v1833_v59  ;;  %v1463_v18 = vcombine.high %v370_v9, %v374_v13  ;;  %v367_v25 = vld [vmem:[%s2154_s7 + $0x78] sm:$0xff] }
 0x19b   :  { %vm447_vm12 = vcmp.gt.f32.partialorder %v439_v27, 0.0  ;;  %v455_v36 = vmul.f32 0.2, %v439_v27  ;;  %867 = vmatmul.mubr.bf16.vlgmr.msra.gmra.mxu0 %v1870_v26  ;;  %940 = vmatmul.mubr.bf16.vlgmr.msra.gmra.mxu1 %v1870_v26  ;;  %v341_v37 = vpop.f32.mrf.mxu1  ;;  %v464_v54 = vsel %vm448_vm13, %v440_v24, %v456_v38  ;;  %v363_v24 = vld [vmem:[%s2154_s7 + $0x58] sm:$0xff] }
 0x19c   :  { %981 = vmatpush1.bf16.msra.mxu0 %v1502_v56  ;;  %1054 = vmatpush1.bf16.msra.mxu1 %v1504_v57  ;;  %v441_v47 = vadd.f32 %v1844_v63, %v427_v33  ;;  %v342_v48 = vadd.f32 %v1833_v59, %v341_v37  ;;  %v1479_v56 = vcombine.high %v386_v45, %v390_v46  ;;  %v458_v0 = vmul.f32 0.2, %v442_v42 }
 0x19d   :  { %982 = vmatprep.subr.bf16.mxu0 %v1495_v21  ;;  %1055 = vmatprep.subr.bf16.mxu1 %v1497_v30  ;;  %v463_v49 = vsel %vm447_vm12, %v439_v27, %v455_v36  ;;  %v430_v57 = vmul.f32 %v1838_v61, %v347_v43  ;;  %v1481_v59 = vcombine.high %v387_v50, %v391_v51  ;;  %vm450_vm14 = vcmp.gt.f32.partialorder %v442_v42, 0.0  ;;  %v366_v21 = vld [vmem:[%s2154_s7 + $0x70] sm:$0xff]  ;;  %v359_v36 = vld [vmem:[%s2154_s7 + $0x38] sm:$0xff] }
 0x19e   :  { %876 = vmatprep.mubr.bf16.mxu0 %v1574_v55  ;;  %949 = vmatprep.mubr.bf16.mxu1 %v1574_v55  ;;  %v1910_v58 = vpack.c.bf16 %v464_v54, %v463_v49  ;;  %v457_v1 = vmul.f32 0.2, %v441_v47  ;;  %v429_v2 = vmul.f32 %v1838_v61, %v342_v48  ;;  %vm449_vm15 = vcmp.gt.f32.partialorder %v441_v47, 0.0 }
 0x19f   :  { %v444_v61 = vadd.f32 %v1844_v63, %v430_v57  ;;  %v466_v12 = vsel %vm450_vm14, %v442_v42, %v458_v0  ;;  %v1462_v27 = vcombine.low %v370_v9, %v374_v13  ;;  %v1455_v29 = vcombine.high %v362_v20, %v366_v21 }
 0x1a0   :  { %983 = vmatpush1.bf16.msra.mxu0 %v1494_v39  ;;  %1056 = vmatpush1.bf16.msra.mxu1 %v1496_v40  ;;  %v443_v10 = vadd.f32 %v1844_v63, %v429_v2  ;;  %v465_v11 = vsel %vm449_vm15, %v441_v47, %v457_v1  ;;  %v375_v63 = vld [vmem:[%s2154_s7 + $0xb8] sm:$0xff]  ;;  %v1457_v30 = vcombine.high %v363_v24, %v367_v25  ;;  %v416_v47 = vld [vmem:[%s2159_s8] sm:$0xff] }
 0x1a1   :  { %984 = vmatprep.subr.bf16.mxu0 %v1487_v41  ;;  %1057 = vmatprep.subr.bf16.mxu1 %v1489_v44  ;;  %v471_v17 = vpack.c.bf16 %v466_v12, %v465_v11  ;;  %v1465_v19 = vcombine.high %v371_v14, %v375_v63  ;;  %v460_v22 = vmul.f32 0.2, %v444_v61  ;;  %vm452_vm0 = vcmp.gt.f32.partialorder %v444_v61, 0.0 }
 0x1a2   :  { %v459_v23 = vmul.f32 0.2, %v443_v10  ;;  %vm451_vm1 = vcmp.gt.f32.partialorder %v443_v10, 0.0  ;;  %v1464_v28 = vcombine.low %v371_v14, %v375_v63  ;;  %v1454_v37 = vcombine.low %v362_v20, %v366_v21 }
 0x1a3   :  { %877 = vmatmul.mubr.bf16.gmra.mxu0 %v1910_v58  ;;  %950 = vmatmul.mubr.bf16.gmra.mxu1 %v1910_v58  ;;  %v468_v33 = vsel %vm452_vm0, %v444_v61, %v460_v22  ;;  %v1456_v38 = vcombine.low %v363_v24, %v367_v25  ;;  %v1447_v40 = vcombine.high %v354_v31, %v358_v34 }
 0x1a4   :  { %985 = vmatpush1.bf16.msra.mxu0 %v1486_v52  ;;  %1058 = vmatpush1.bf16.msra.mxu1 %v1488_v53  ;;  %v467_v32 = vsel %vm451_vm1, %v443_v10, %v459_v23  ;;  %v1449_v41 = vcombine.high %v355_v35, %v359_v36  ;;  %v1446_v42 = vcombine.low %v354_v31, %v358_v34 }
 0x1a5   :  { %986 = vmatprep.subr.bf16.mxu0 %v1479_v56  ;;  %1059 = vmatprep.subr.bf16.mxu1 %v1481_v59  ;;  %v472_v39 = vpack.c.bf16 %v468_v33, %v467_v32  ;;  %v1448_v43 = vcombine.low %v355_v35, %v359_v36 }
 0x1a6   :  { %886 = vmatprep.mubr.bf16.mxu0 %v1574_v55  ;;  %959 = vmatprep.mubr.bf16.mxu1 %v1574_v55 }
 0x1a8   :  { %987 = vmatpush1.bf16.msra.mxu0 %v1478_v5  ;;  %1060 = vmatpush1.bf16.msra.mxu1 %v1480_v6 }
 0x1a9   :  { %988 = vmatprep.subr.bf16.mxu0 %v1471_v7  ;;  %1061 = vmatprep.subr.bf16.mxu1 %v1473_v8 }
 0x1ab   :  { %887 = vmatmul.mubr.bf16.gmra.mxu0 %v471_v17  ;;  %960 = vmatmul.mubr.bf16.gmra.mxu1 %v471_v17 }
 0x1ac   :  { %989 = vmatpush1.bf16.msra.mxu0 %v1470_v15  ;;  %1062 = vmatpush1.bf16.msra.mxu1 %v1472_v16 }
 0x1ad   :  { %990 = vmatprep.subr.bf16.mxu0 %v1463_v18  ;;  %1063 = vmatprep.subr.bf16.mxu1 %v1465_v19 }
 0x1ae   :  { %896 = vmatprep.mubr.bf16.mxu0 %v1574_v55  ;;  %969 = vmatprep.mubr.bf16.mxu1 %v1574_v55 }
 0x1b0   :  { %991 = vmatpush1.bf16.msra.mxu0 %v1462_v27  ;;  %1064 = vmatpush1.bf16.msra.mxu1 %v1464_v28 }
 0x1b1   :  { %992 = vmatprep.subr.bf16.mxu0 %v1455_v29  ;;  %1065 = vmatprep.subr.bf16.mxu1 %v1457_v30 }
 0x1b3   :  { %897 = vmatmul.mubr.bf16.gmra.mxu0 %v472_v39  ;;  %970 = vmatmul.mubr.bf16.gmra.mxu1 %v472_v39 }
 0x1b4   :  { %993 = vmatpush1.bf16.msra.mxu0 %v1454_v37  ;;  %1066 = vmatpush1.bf16.msra.mxu1 %v1456_v38 }
 0x1b5   :  { %994 = vmatprep.subr.bf16.mxu0 %v1447_v40  ;;  %1067 = vmatprep.subr.bf16.mxu1 %v1449_v41 }
 0x1b6   :  { %1012 = vmatprep.mubr.bf16.mxu0 %v1574_v55  ;;  %1085 = vmatprep.mubr.bf16.mxu1 %v1574_v55 }
 0x1b8   :  { %995 = vmatpush1.bf16.msra.mxu0 %v1446_v42  ;;  %1068 = vmatpush1.bf16.msra.mxu1 %v1448_v43 }
 0x1bb   :  { %1013 = vmatmul.mubr.bf16.vlgmr.msra.gmra.mxu0 %v1870_v26  ;;  %1086 = vmatmul.mubr.bf16.vlgmr.msra.gmra.mxu1 %v1870_v26  ;;  %v474_v26 = vlaneseq }
 0x1bc   :  { %1022 = vmatprep.mubr.bf16.mxu0 %v1574_v55  ;;  %1095 = vmatprep.mubr.bf16.mxu1 %v1574_v55 }
 0x1bd   :  { %v475_v44 = vshrl.u32 %v474_v26, 7 }
 0x1bf   :  { %v476_v45 = vsub.s32 0, %v475_v44  ;;  %v484_v46 = vsub.s32 2, %v475_v44  ;;  %v480_v48 = vsub.s32 1, %v475_v44  ;;  %v488_v49 = vsub.s32 3, %v475_v44 }
 0x1c0   :  { %v492_v56 = vsub.s32 4, %v475_v44  ;;  %v500_v57 = vsub.s32 6, %v475_v44  ;;  %v496_v0 = vsub.s32 5, %v475_v44  ;;  %v504_v1 = vsub.s32 7, %v475_v44 }
 0x1c1   :  { %v1987_v50 = vrot.slane %v416_v47, %v476_v45  ;;  %v1989_v51 = vrot.slane %v416_v47, %v484_v46  ;;  %v1991_v52 = vrot.slane %v416_v47, %v480_v48  ;;  %v1993_v53 = vrot.slane %v416_v47, %v488_v49 }
 0x1c2   :  { %v2001_v7 = vrot.slane %v416_v47, %v492_v56  ;;  %v2003_v8 = vrot.slane %v416_v47, %v500_v57  ;;  %v2005_v13 = vrot.slane %v416_v47, %v496_v0  ;;  %v2007_v14 = vrot.slane %v416_v47, %v504_v1 }
 0x1c3   :  { %1023 = vmatmul.mubr.bf16.gmra.mxu0 %v1910_v58  ;;  %1096 = vmatmul.mubr.bf16.gmra.mxu1 %v1910_v58 }
 0x1c4   :  { %1032 = vmatprep.mubr.bf16.mxu0 %v1574_v55  ;;  %1105 = vmatprep.mubr.bf16.mxu1 %v1574_v55 }
 0x1cb   :  { %1033 = vmatmul.mubr.bf16.gmra.mxu0 %v471_v17  ;;  %1106 = vmatmul.mubr.bf16.gmra.mxu1 %v471_v17 }
 0x1cc   :  { %1042 = vmatprep.mubr.bf16.mxu0 %v1574_v55  ;;  %1115 = vmatprep.mubr.bf16.mxu1 %v1574_v55 }
 0x1d3   :  { %1043 = vmatmul.mubr.bf16.gmra.mxu0 %v472_v39  ;;  %1116 = vmatmul.mubr.bf16.gmra.mxu1 %v472_v39 }
 0x25b   :  { %v868_v55 = vpop.f32.mrf.mxu0  ;;  %v941_v54 = vpop.f32.mrf.mxu1 }
 0x25c   :  { %v869_v58 = vadd.f32 %v868_v55, %v1987_v50  ;;  %v942_v59 = vadd.f32 %v941_v54, %v1989_v51 }
 0x25d   :  { %v870_v60 = vpop.f32.mrf.mxu0  ;;  %v943_v62 = vpop.f32.mrf.mxu1 }
 0x25e   :  { %v871_v2 = vadd.f32 %v870_v60, %v1991_v52  ;;  %v944_v3 = vadd.f32 %v943_v62, %v1993_v53  ;;  %v1230_v9 = vmul.f32 %v869_v58, %v869_v58  ;;  %v1232_v10 = vmul.f32 %v942_v59, %v942_v59 }
 0x25f   :  { %v872_v4 = vpop.f32.mrf.mxu0  ;;  %v945_v5 = vpop.f32.mrf.mxu1 }
 0x260   :  { %v873_v6 = vadd.f32 %v872_v4, %v1987_v50  ;;  %v946_v61 = vadd.f32 %v945_v5, %v1989_v51  ;;  %v1231_v63 = vmul.f32 %v871_v2, %v871_v2  ;;  %v1233_v15 = vmul.f32 %v944_v3, %v944_v3 }
 0x261   :  { %v874_v11 = vpop.f32.mrf.mxu0  ;;  %v947_v12 = vpop.f32.mrf.mxu1 }
 0x262   :  { %v1238_v16 = vmul.f32 %v873_v6, %v873_v6  ;;  %v1240_v17 = vmul.f32 %v946_v61, %v946_v61  ;;  %v1126_v18 = vadd.f32 %v873_v6, %v869_v58  ;;  %v1152_v19 = vadd.f32 %v946_v61, %v942_v59 }
 0x263   :  { %v875_v20 = vadd.f32 %v874_v11, %v1991_v52  ;;  %v948_v21 = vadd.f32 %v947_v12, %v1993_v53  ;;  %v878_v22 = vpop.f32.mrf.mxu0  ;;  %v951_v23 = vpop.f32.mrf.mxu1 }
 0x264   :  { %v1294_v24 = vadd.f32 %v1238_v16, %v1230_v9  ;;  %v1320_v25 = vadd.f32 %v1240_v17, %v1232_v10  ;;  %v879_v27 = vadd.f32 %v878_v22, %v1987_v50  ;;  %v952_v28 = vadd.f32 %v951_v23, %v1989_v51 }
 0x265   :  { %v1139_v29 = vadd.f32 %v875_v20, %v871_v2  ;;  %v1239_v30 = vmul.f32 %v875_v20, %v875_v20  ;;  %v1165_v31 = vadd.f32 %v948_v21, %v944_v3  ;;  %v1241_v32 = vmul.f32 %v948_v21, %v948_v21  ;;  %v880_v33 = vpop.f32.mrf.mxu0  ;;  %v953_v34 = vpop.f32.mrf.mxu1 }
 0x266   :  { %v1127_v35 = vadd.f32 %v1126_v18, %v879_v27  ;;  %v1246_v36 = vmul.f32 %v879_v27, %v879_v27  ;;  %v1153_v37 = vadd.f32 %v1152_v19, %v952_v28  ;;  %v1248_v38 = vmul.f32 %v952_v28, %v952_v28 }
 0x267   :  { %v1307_v39 = vadd.f32 %v1239_v30, %v1231_v63  ;;  %v1333_v40 = vadd.f32 %v1241_v32, %v1233_v15  ;;  %v881_v41 = vadd.f32 %v880_v33, %v1991_v52  ;;  %v954_v42 = vadd.f32 %v953_v34, %v1993_v53  ;;  %v882_v43 = vpop.f32.mrf.mxu0  ;;  %v955_v26 = vpop.f32.mrf.mxu1 }
 0x268   :  { %v1295_v44 = vadd.f32 %v1294_v24, %v1246_v36  ;;  %v1321_v45 = vadd.f32 %v1320_v25, %v1248_v38  ;;  %v883_v46 = vadd.f32 %v882_v43, %v1987_v50  ;;  %v956_v47 = vadd.f32 %v955_v26, %v1989_v51 }
 0x269   :  { %v1140_v48 = vadd.f32 %v1139_v29, %v881_v41  ;;  %v1247_v49 = vmul.f32 %v881_v41, %v881_v41  ;;  %v1166_v55 = vadd.f32 %v1165_v31, %v954_v42  ;;  %v1249_v54 = vmul.f32 %v954_v42, %v954_v42  ;;  %v884_v56 = vpop.f32.mrf.mxu0  ;;  %v957_v57 = vpop.f32.mrf.mxu1 }
 0x26a   :  { %v1128_v58 = vadd.f32 %v1127_v35, %v883_v46  ;;  %v1254_v59 = vmul.f32 %v883_v46, %v883_v46  ;;  %v1154_v60 = vadd.f32 %v1153_v37, %v956_v47  ;;  %v1256_v62 = vmul.f32 %v956_v47, %v956_v47 }
 0x26b   :  { %v1308_v0 = vadd.f32 %v1307_v39, %v1247_v49  ;;  %v1334_v1 = vadd.f32 %v1333_v40, %v1249_v54  ;;  %v885_v2 = vadd.f32 %v884_v56, %v1991_v52  ;;  %v958_v3 = vadd.f32 %v957_v57, %v1993_v53  ;;  %v888_v4 = vpop.f32.mrf.mxu0  ;;  %v961_v5 = vpop.f32.mrf.mxu1 }
 0x26c   :  { %v1296_v6 = vadd.f32 %v1295_v44, %v1254_v59  ;;  %v1322_v61 = vadd.f32 %v1321_v45, %v1256_v62  ;;  %v889_v9 = vadd.f32 %v888_v4, %v1987_v50  ;;  %v962_v10 = vadd.f32 %v961_v5, %v1989_v51 }
 0x26d   :  { %v1141_v11 = vadd.f32 %v1140_v48, %v885_v2  ;;  %v1255_v12 = vmul.f32 %v885_v2, %v885_v2  ;;  %v1167_v63 = vadd.f32 %v1166_v55, %v958_v3  ;;  %v1257_v15 = vmul.f32 %v958_v3, %v958_v3  ;;  %v890_v16 = vpop.f32.mrf.mxu0  ;;  %v963_v17 = vpop.f32.mrf.mxu1 }
 0x26e   :  { %v1129_v18 = vadd.f32 %v1128_v58, %v889_v9  ;;  %v1262_v19 = vmul.f32 %v889_v9, %v889_v9  ;;  %v1155_v20 = vadd.f32 %v1154_v60, %v962_v10  ;;  %v1264_v21 = vmul.f32 %v962_v10, %v962_v10 }
 0x26f   :  { %v1309_v22 = vadd.f32 %v1308_v0, %v1255_v12  ;;  %v1335_v23 = vadd.f32 %v1334_v1, %v1257_v15  ;;  %v891_v24 = vadd.f32 %v890_v16, %v1991_v52  ;;  %v964_v25 = vadd.f32 %v963_v17, %v1993_v53  ;;  %v892_v27 = vpop.f32.mrf.mxu0  ;;  %v965_v28 = vpop.f32.mrf.mxu1 }
 0x270   :  { %v1297_v29 = vadd.f32 %v1296_v6, %v1262_v19  ;;  %v1323_v30 = vadd.f32 %v1322_v61, %v1264_v21  ;;  %v893_v31 = vadd.f32 %v892_v27, %v1987_v50  ;;  %v966_v32 = vadd.f32 %v965_v28, %v1989_v51 }
 0x271   :  { %v1142_v33 = vadd.f32 %v1141_v11, %v891_v24  ;;  %v1263_v34 = vmul.f32 %v891_v24, %v891_v24  ;;  %v1168_v35 = vadd.f32 %v1167_v63, %v964_v25  ;;  %v1265_v36 = vmul.f32 %v964_v25, %v964_v25  ;;  %v894_v37 = vpop.f32.mrf.mxu0  ;;  %v967_v38 = vpop.f32.mrf.mxu1 }
 0x272   :  { %v1130_v39 = vadd.f32 %v1129_v18, %v893_v31  ;;  %v1270_v40 = vmul.f32 %v893_v31, %v893_v31  ;;  %v1156_v41 = vadd.f32 %v1155_v20, %v966_v32  ;;  %v1272_v42 = vmul.f32 %v966_v32, %v966_v32 }
 0x273   :  { %v1310_v43 = vadd.f32 %v1309_v22, %v1263_v34  ;;  %v1336_v26 = vadd.f32 %v1335_v23, %v1265_v36  ;;  %v895_v44 = vadd.f32 %v894_v37, %v1991_v52  ;;  %v968_v45 = vadd.f32 %v967_v38, %v1993_v53  ;;  %v898_v46 = vpop.f32.mrf.mxu0  ;;  %v971_v47 = vpop.f32.mrf.mxu1 }
 0x274   :  { %v1298_v48 = vadd.f32 %v1297_v29, %v1270_v40  ;;  %v1324_v49 = vadd.f32 %v1323_v30, %v1272_v42  ;;  %v899_v55 = vadd.f32 %v898_v46, %v1987_v50  ;;  %v972_v54 = vadd.f32 %v971_v47, %v1989_v51 }
 0x275   :  { %v1143_v56 = vadd.f32 %v1142_v33, %v895_v44  ;;  %v1271_v57 = vmul.f32 %v895_v44, %v895_v44  ;;  %v1169_v58 = vadd.f32 %v1168_v35, %v968_v45  ;;  %v1273_v59 = vmul.f32 %v968_v45, %v968_v45  ;;  %v900_v60 = vpop.f32.mrf.mxu0  ;;  %v973_v62 = vpop.f32.mrf.mxu1 }
 0x276   :  { %v1131_v0 = vadd.f32 %v1130_v39, %v899_v55  ;;  %v1278_v1 = vmul.f32 %v899_v55, %v899_v55  ;;  %v1157_v2 = vadd.f32 %v1156_v41, %v972_v54  ;;  %v1280_v3 = vmul.f32 %v972_v54, %v972_v54 }
 0x277   :  { %v1311_v4 = vadd.f32 %v1310_v43, %v1271_v57  ;;  %v1337_v5 = vadd.f32 %v1336_v26, %v1273_v59  ;;  %v901_v6 = vadd.f32 %v900_v60, %v1991_v52  ;;  %v974_v61 = vadd.f32 %v973_v62, %v1993_v53  ;;  %v902_v9 = vpop.f32.mrf.mxu0  ;;  %v975_v10 = vpop.f32.mrf.mxu1 }
 0x278   :  { %v1299_v11 = vadd.f32 %v1298_v48, %v1278_v1  ;;  %v1325_v12 = vadd.f32 %v1324_v49, %v1280_v3  ;;  %v903_v63 = vadd.f32 %v902_v9, %v1987_v50  ;;  %v976_v15 = vadd.f32 %v975_v10, %v1989_v51 }
 0x279   :  { %v1144_v16 = vadd.f32 %v1143_v56, %v901_v6  ;;  %v1279_v17 = vmul.f32 %v901_v6, %v901_v6  ;;  %v1170_v18 = vadd.f32 %v1169_v58, %v974_v61  ;;  %v1281_v19 = vmul.f32 %v974_v61, %v974_v61  ;;  %v904_v20 = vpop.f32.mrf.mxu0  ;;  %v977_v21 = vpop.f32.mrf.mxu1 }
 0x27a   :  { %v1132_v22 = vadd.f32 %v1131_v0, %v903_v63  ;;  %v1286_v23 = vmul.f32 %v903_v63, %v903_v63  ;;  %v1158_v24 = vadd.f32 %v1157_v2, %v976_v15  ;;  %v1288_v25 = vmul.f32 %v976_v15, %v976_v15 }
 0x27b   :  { %v1312_v27 = vadd.f32 %v1311_v4, %v1279_v17  ;;  %v1338_v28 = vadd.f32 %v1337_v5, %v1281_v19  ;;  %v905_v29 = vadd.f32 %v904_v20, %v1991_v52  ;;  %v978_v30 = vadd.f32 %v977_v21, %v1993_v53  ;;  %v2035_v31 = vpop.f32.mrf.mxu0  ;;  %v2037_v50 = vpop.f32.mrf.mxu1 }
 0x27c   :  { %v1133_v51 = vrot.slane %v1132_v22, 4  ;;  %v1300_v32 = vadd.f32 %v1299_v11, %v1286_v23  ;;  %v1159_v33 = vrot.slane %v1158_v24, 4  ;;  %v1326_v34 = vadd.f32 %v1325_v12, %v1288_v25 }
 0x27d   :  { %v1145_v35 = vadd.f32 %v1144_v16, %v905_v29  ;;  %v1287_v36 = vmul.f32 %v905_v29, %v905_v29  ;;  %v1171_v37 = vadd.f32 %v1170_v18, %v978_v30  ;;  %v1289_v38 = vmul.f32 %v978_v30, %v978_v30  ;;  %v2039_v39 = vpop.f32.mrf.mxu0  ;;  %v2041_v40 = vpop.f32.mrf.mxu1 }
 0x27e   :  { %v1134_v41 = vadd.f32 %v1133_v51, %v1132_v22  ;;  %v1301_v52 = vrot.slane %v1300_v32, 4  ;;  %v1160_v42 = vadd.f32 %v1159_v33, %v1158_v24  ;;  %v1327_v53 = vrot.slane %v1326_v34, 4 }
 0x27f   :  { %v1146_v43 = vrot.slane %v1145_v35, 4  ;;  %v1313_v26 = vadd.f32 %v1312_v27, %v1287_v36  ;;  %v1172_v44 = vrot.slane %v1171_v37, 4  ;;  %v1339_v45 = vadd.f32 %v1338_v28, %v1289_v38  ;;  %v2043_v46 = vpop.f32.mrf.mxu0  ;;  %v2045_v47 = vpop.f32.mrf.mxu1 }
 0x280   :  { %v1135_v48 = vrot.slane %v1134_v41, 2  ;;  %v1302_v49 = vadd.f32 %v1301_v52, %v1300_v32  ;;  %v1161_v55 = vrot.slane %v1160_v42, 2  ;;  %v1328_v54 = vadd.f32 %v1327_v53, %v1326_v34 }
 0x281   :  { %v1147_v56 = vadd.f32 %v1146_v43, %v1145_v35  ;;  %v1314_v57 = vrot.slane %v1313_v26, 4  ;;  %v1173_v58 = vadd.f32 %v1172_v44, %v1171_v37  ;;  %v1340_v59 = vrot.slane %v1339_v45, 4  ;;  %v1020_v60 = vpop.f32.mrf.mxu0  ;;  %v1093_v62 = vpop.f32.mrf.mxu1 }
 0x282   :  { %v1136_v0 = vadd.f32 %v1135_v48, %v1134_v41  ;;  %v1303_v1 = vrot.slane %v1302_v49, 2  ;;  %v1162_v2 = vadd.f32 %v1161_v55, %v1160_v42  ;;  %v1329_v3 = vrot.slane %v1328_v54, 2 }
 0x283   :  { %v1148_v4 = vrot.slane %v1147_v56, 2  ;;  %v1315_v5 = vadd.f32 %v1314_v57, %v1313_v26  ;;  %v1174_v6 = vrot.slane %v1173_v58, 2  ;;  %v1341_v61 = vadd.f32 %v1340_v59, %v1339_v45  ;;  %v2047_v9 = vpop.f32.mrf.mxu0  ;;  %v2049_v10 = vpop.f32.mrf.mxu1 }
 0x284   :  { %v1137_v11 = vrot.slane %v1136_v0, 1  ;;  %v1304_v12 = vadd.f32 %v1303_v1, %v1302_v49  ;;  %v1163_v63 = vrot.slane %v1162_v2, 1  ;;  %v1330_v15 = vadd.f32 %v1329_v3, %v1328_v54 }
 0x285   :  { %v1149_v16 = vadd.f32 %v1148_v4, %v1147_v56  ;;  %v1316_v17 = vrot.slane %v1315_v5, 2  ;;  %v1175_v18 = vadd.f32 %v1174_v6, %v1173_v58  ;;  %v1342_v19 = vrot.slane %v1341_v61, 2  ;;  %v2051_v20 = vpop.f32.mrf.mxu0  ;;  %v2053_v21 = vpop.f32.mrf.mxu1 }
 0x286   :  { %v1138_v22 = vadd.f32 %v1137_v11, %v1136_v0  ;;  %v1305_v23 = vrot.slane %v1304_v12, 1  ;;  %v1164_v24 = vadd.f32 %v1163_v63, %v1162_v2  ;;  %v1331_v25 = vrot.slane %v1330_v15, 1 }
 0x287   :  { %v1150_v27 = vrot.slane %v1149_v16, 1  ;;  %v1317_v28 = vadd.f32 %v1316_v17, %v1315_v5  ;;  %v1176_v29 = vrot.slane %v1175_v18, 1  ;;  %v1343_v30 = vadd.f32 %v1342_v19, %v1341_v61  ;;  %v2055_v51 = vpop.f32.mrf.mxu0  ;;  %v2057_v32 = vpop.f32.mrf.mxu1 }
 0x288   :  { %v1306_v33 = vadd.f32 %v1305_v23, %v1304_v12  ;;  %1398 = vst [vmem:[%s2160_s9] sm:$0xff] %v1138_v22  ;;  %v1332_v34 = vadd.f32 %v1331_v25, %v1330_v15  ;;  %1400 = vst [vmem:[%s2160_s9 + $0x10] sm:$0xff] %v1164_v24  ;;  %v1015_v35 = vadd.f32 %v2035_v31, %v2001_v7 }
 0x289   :  { %v1088_v36 = vadd.f32 %v2037_v50, %v2003_v8  ;;  %v1151_v37 = vadd.f32 %v1150_v27, %v1149_v16  ;;  %v1318_v38 = vrot.slane %v1317_v28, 1  ;;  %v1177_v41 = vadd.f32 %v1176_v29, %v1175_v18  ;;  %v1030_v42 = vpop.f32.mrf.mxu0  ;;  %v1103_v53 = vpop.f32.mrf.mxu1 }
 0x28a   :  { %v1344_v52 = vrot.slane %v1343_v30, 1  ;;  %1406 = vst [vmem:[%s2161_s10] sm:$0xff] %v1306_v33  ;;  %1408 = vst [vmem:[%s2161_s10 + $0x10] sm:$0xff] %v1332_v34  ;;  %v1234_v43 = vmul.f32 %v1015_v35, %v1015_v35  ;;  %v1017_v31 = vadd.f32 %v2039_v39, %v2005_v13  ;;  %v1090_v50 = vadd.f32 %v2041_v40, %v2007_v14 }
 0x28b   :  { %v1236_v26 = vmul.f32 %v1088_v36, %v1088_v36  ;;  %v1319_v44 = vadd.f32 %v1318_v38, %v1317_v28  ;;  %1399 = vst [vmem:[%s2160_s9 + $0x8] sm:$0xff] %v1151_v37  ;;  %1401 = vst [vmem:[%s2160_s9 + $0x18] sm:$0xff] %v1177_v41  ;;  %v1019_v48 = vadd.f32 %v2043_v46, %v2001_v7  ;;  %v1034_v39 = vpop.f32.mrf.mxu0  ;;  %v1107_v55 = vpop.f32.mrf.mxu1 }
 0x28c   :  { %v1345_v45 = vadd.f32 %v1344_v52, %v1343_v30  ;;  %v1092_v49 = vadd.f32 %v2045_v47, %v2003_v8  ;;  %v1235_v54 = vmul.f32 %v1017_v31, %v1017_v31  ;;  %v1237_v40 = vmul.f32 %v1090_v50, %v1090_v50 }
 0x28d   :  { %v1021_v56 = vadd.f32 %v1020_v60, %v2005_v13  ;;  %v1094_v57 = vadd.f32 %v1093_v62, %v2007_v14  ;;  %1407 = vst [vmem:[%s2161_s10 + $0x8] sm:$0xff] %v1319_v44  ;;  %v1178_v46 = vadd.f32 %v1019_v48, %v1015_v35  ;;  %v1242_v58 = vmul.f32 %v1019_v48, %v1019_v48  ;;  %v1036_v0 = vpop.f32.mrf.mxu0  ;;  %v1109_v1 = vpop.f32.mrf.mxu1 }
 0x28e   :  { %1409 = vst [vmem:[%s2161_s10 + $0x18] sm:$0xff] %v1345_v45  ;;  %v1204_v59 = vadd.f32 %v1092_v49, %v1088_v36  ;;  %v1244_v47 = vmul.f32 %v1092_v49, %v1092_v49  ;;  %v1025_v6 = vadd.f32 %v2047_v9, %v2001_v7  ;;  %v1098_v61 = vadd.f32 %v2049_v10, %v2003_v8 }
 0x28f   :  { %v1191_v2 = vadd.f32 %v1021_v56, %v1017_v31  ;;  %v1243_v3 = vmul.f32 %v1021_v56, %v1021_v56  ;;  %v1217_v4 = vadd.f32 %v1094_v57, %v1090_v50  ;;  %v1245_v60 = vmul.f32 %v1094_v57, %v1094_v57  ;;  %v1038_v11 = vpop.f32.mrf.mxu0  ;;  %v1111_v12 = vpop.f32.mrf.mxu1 }
 0x290   :  { %v1346_v5 = vadd.f32 %v1242_v58, %v1234_v43  ;;  %v1372_v62 = vadd.f32 %v1244_v47, %v1236_v26  ;;  %v1027_v16 = vadd.f32 %v2051_v20, %v2005_v13  ;;  %v1100_v17 = vadd.f32 %v2053_v21, %v2007_v14 }
 0x291   :  { %v1359_v63 = vadd.f32 %v1243_v3, %v1235_v54  ;;  %v1385_v15 = vadd.f32 %v1245_v60, %v1237_v40  ;;  %v1179_v18 = vadd.f32 %v1178_v46, %v1025_v6  ;;  %v1250_v19 = vmul.f32 %v1025_v6, %v1025_v6  ;;  %v1040_v24 = vpop.f32.mrf.mxu0  ;;  %v1113_v25 = vpop.f32.mrf.mxu1 }
 0x292   :  { %v1205_v22 = vadd.f32 %v1204_v59, %v1098_v61  ;;  %v1252_v23 = vmul.f32 %v1098_v61, %v1098_v61  ;;  %v1192_v9 = vadd.f32 %v1191_v2, %v1027_v16  ;;  %v1251_v27 = vmul.f32 %v1027_v16, %v1027_v16 }
 0x293   :  { %v1218_v28 = vadd.f32 %v1217_v4, %v1100_v17  ;;  %v1253_v10 = vmul.f32 %v1100_v17, %v1100_v17  ;;  %v1347_v29 = vadd.f32 %v1346_v5, %v1250_v19  ;;  %v1029_v33 = vadd.f32 %v2055_v51, %v2001_v7  ;;  %v1044_v43 = vpop.f32.mrf.mxu0  ;;  %v1117_v26 = vpop.f32.mrf.mxu1 }
 0x294   :  { %v1373_v30 = vadd.f32 %v1372_v62, %v1252_v23  ;;  %v1102_v20 = vadd.f32 %v2057_v32, %v2003_v8  ;;  %v1360_v34 = vadd.f32 %v1359_v63, %v1251_v27  ;;  %v1031_v35 = vadd.f32 %v1030_v42, %v2005_v13 }
 0x295   :  { %v1386_v21 = vadd.f32 %v1385_v15, %v1253_v10  ;;  %v1104_v36 = vadd.f32 %v1103_v53, %v2007_v14  ;;  %v1180_v37 = vadd.f32 %v1179_v18, %v1029_v33  ;;  %v1258_v38 = vmul.f32 %v1029_v33, %v1029_v33  ;;  %v1046_v59 = vpop.f32.mrf.mxu0  ;;  %v1119_v47 = vpop.f32.mrf.mxu1 }
 0x296   :  { %v1206_v41 = vadd.f32 %v1205_v22, %v1102_v20  ;;  %v1260_v52 = vmul.f32 %v1102_v20, %v1102_v20  ;;  %v1193_v31 = vadd.f32 %v1192_v9, %v1031_v35  ;;  %v1259_v50 = vmul.f32 %v1031_v35, %v1031_v35 }
 0x297   :  { %v1219_v44 = vadd.f32 %v1218_v28, %v1104_v36  ;;  %v1261_v45 = vmul.f32 %v1104_v36, %v1104_v36  ;;  %v1348_v51 = vadd.f32 %v1347_v29, %v1258_v38  ;;  %v1035_v32 = vadd.f32 %v1034_v39, %v2001_v7  ;;  %v1048_v18 = vpop.f32.mrf.mxu0  ;;  %v1121_v19 = vpop.f32.mrf.mxu1 }
 0x298   :  { %v1374_v48 = vadd.f32 %v1373_v30, %v1260_v52  ;;  %v1108_v49 = vadd.f32 %v1107_v55, %v2003_v8  ;;  %v1361_v54 = vadd.f32 %v1360_v34, %v1259_v50  ;;  %v1037_v53 = vadd.f32 %v1036_v0, %v2005_v13 }
 0x299   :  { %v1387_v42 = vadd.f32 %v1386_v21, %v1261_v45  ;;  %v1110_v40 = vadd.f32 %v1109_v1, %v2007_v14  ;;  %v1181_v56 = vadd.f32 %v1180_v37, %v1035_v32  ;;  %v1266_v57 = vmul.f32 %v1035_v32, %v1035_v32  ;;  %v1050_v35 = vpop.f32.mrf.mxu0  ;;  %v1123_v36 = vpop.f32.mrf.mxu1 }
 0x29a   :  { %v1207_v46 = vadd.f32 %v1206_v41, %v1108_v49  ;;  %v1268_v58 = vmul.f32 %v1108_v49, %v1108_v49  ;;  %v1194_v2 = vadd.f32 %v1193_v31, %v1037_v53  ;;  %v1267_v3 = vmul.f32 %v1037_v53, %v1037_v53 }
 0x29b   :  { %v1220_v4 = vadd.f32 %v1219_v44, %v1110_v40  ;;  %v1269_v60 = vmul.f32 %v1110_v40, %v1110_v40  ;;  %v1349_v5 = vadd.f32 %v1348_v51, %v1266_v57  ;;  %v1039_v55 = vadd.f32 %v1038_v11, %v2001_v7 }
 0x29c   :  { %v1375_v39 = vadd.f32 %v1374_v48, %v1268_v58  ;;  %v1112_v62 = vadd.f32 %v1111_v12, %v2003_v8  ;;  %v1362_v6 = vadd.f32 %v1361_v54, %v1267_v3  ;;  %v1041_v1 = vadd.f32 %v1040_v24, %v2005_v13 }
 0x29d   :  { %v1388_v0 = vadd.f32 %v1387_v42, %v1269_v60  ;;  %v1114_v61 = vadd.f32 %v1113_v25, %v2007_v14  ;;  %v1182_v63 = vadd.f32 %v1181_v56, %v1039_v55  ;;  %v1274_v15 = vmul.f32 %v1039_v55, %v1039_v55 }
 0x29e   :  { %v1208_v16 = vadd.f32 %v1207_v46, %v1112_v62  ;;  %v1276_v17 = vmul.f32 %v1112_v62, %v1112_v62  ;;  %v1195_v22 = vadd.f32 %v1194_v2, %v1041_v1  ;;  %v1275_v23 = vmul.f32 %v1041_v1, %v1041_v1 }
 0x29f   :  { %v1221_v9 = vadd.f32 %v1220_v4, %v1114_v61  ;;  %v1277_v27 = vmul.f32 %v1114_v61, %v1114_v61  ;;  %v1350_v28 = vadd.f32 %v1349_v5, %v1274_v15  ;;  %v1045_v12 = vadd.f32 %v1044_v43, %v2001_v7 }
 0x2a0   :  { %v1376_v11 = vadd.f32 %v1375_v39, %v1276_v17  ;;  %v1118_v10 = vadd.f32 %v1117_v26, %v2003_v8  ;;  %v1363_v29 = vadd.f32 %v1362_v6, %v1275_v23  ;;  %v1047_v25 = vadd.f32 %v1046_v59, %v2005_v13 }
 0x2a1   :  { %v1389_v24 = vadd.f32 %v1388_v0, %v1277_v27  ;;  %v1120_v30 = vadd.f32 %v1119_v47, %v2007_v14  ;;  %v1183_v33 = vadd.f32 %v1182_v63, %v1045_v12  ;;  %v1282_v20 = vmul.f32 %v1045_v12, %v1045_v12 }
 0x2a2   :  { %v1209_v34 = vadd.f32 %v1208_v16, %v1118_v10  ;;  %v1284_v21 = vmul.f32 %v1118_v10, %v1118_v10  ;;  %v1196_v37 = vadd.f32 %v1195_v22, %v1047_v25  ;;  %v1283_v38 = vmul.f32 %v1047_v25, %v1047_v25 }
 0x2a3   :  { %v1222_v41 = vadd.f32 %v1221_v9, %v1120_v30  ;;  %v1285_v52 = vmul.f32 %v1120_v30, %v1120_v30  ;;  %v1351_v31 = vadd.f32 %v1350_v28, %v1282_v20  ;;  %v1049_v26 = vadd.f32 %v1048_v18, %v2001_v7 }
 0x2a4   :  { %v1377_v43 = vadd.f32 %v1376_v11, %v1284_v21  ;;  %v1122_v50 = vadd.f32 %v1121_v19, %v2003_v8  ;;  %v1364_v44 = vadd.f32 %v1363_v29, %v1283_v38  ;;  %v1051_v51 = vadd.f32 %v1050_v35, %v2005_v13 }
 0x2a5   :  { %v1390_v45 = vadd.f32 %v1389_v24, %v1285_v52  ;;  %v1124_v48 = vadd.f32 %v1123_v36, %v2007_v14  ;;  %v1184_v32 = vadd.f32 %v1183_v33, %v1049_v26  ;;  %v1290_v49 = vmul.f32 %v1049_v26, %v1049_v26 }
 0x2a6   :  { %v1210_v54 = vadd.f32 %v1209_v34, %v1122_v50  ;;  %v1292_v42 = vmul.f32 %v1122_v50, %v1122_v50  ;;  %v1197_v53 = vadd.f32 %v1196_v37, %v1051_v51  ;;  %v1291_v40 = vmul.f32 %v1051_v51, %v1051_v51 }
 0x2a7   :  { %v1223_v56 = vadd.f32 %v1222_v41, %v1124_v48  ;;  %v1293_v57 = vmul.f32 %v1124_v48, %v1124_v48  ;;  %v1185_v46 = vrot.slane %v1184_v32, 4  ;;  %v1352_v58 = vadd.f32 %v1351_v31, %v1290_v49 }
 0x2a8   :  { %v1211_v59 = vrot.slane %v1210_v54, 4  ;;  %v1378_v7 = vadd.f32 %v1377_v43, %v1292_v42  ;;  %v1198_v47 = vrot.slane %v1197_v53, 4  ;;  %v1365_v8 = vadd.f32 %v1364_v44, %v1291_v40 }
 0x2a9   :  { %v1224_v2 = vrot.slane %v1223_v56, 4  ;;  %v1391_v3 = vadd.f32 %v1390_v45, %v1293_v57  ;;  %v1186_v4 = vadd.f32 %v1185_v46, %v1184_v32  ;;  %v1353_v13 = vrot.slane %v1352_v58, 4 }
 0x2aa   :  { %v1212_v60 = vadd.f32 %v1211_v59, %v1210_v54  ;;  %v1379_v14 = vrot.slane %v1378_v7, 4  ;;  %v1199_v5 = vadd.f32 %v1198_v47, %v1197_v53  ;;  %v1366_v39 = vrot.slane %v1365_v8, 4 }
 0x2ab   :  { %v1225_v55 = vadd.f32 %v1224_v2, %v1223_v56  ;;  %v1392_v62 = vrot.slane %v1391_v3, 4  ;;  %v1187_v6 = vrot.slane %v1186_v4, 2  ;;  %v1354_v0 = vadd.f32 %v1353_v13, %v1352_v58 }
 0x2ac   :  { %v1213_v1 = vrot.slane %v1212_v60, 2  ;;  %v1380_v61 = vadd.f32 %v1379_v14, %v1378_v7  ;;  %v1200_v63 = vrot.slane %v1199_v5, 2  ;;  %v1367_v15 = vadd.f32 %v1366_v39, %v1365_v8 }
 0x2ad   :  { %v1226_v16 = vrot.slane %v1225_v55, 2  ;;  %v1393_v17 = vadd.f32 %v1392_v62, %v1391_v3  ;;  %v1188_v18 = vadd.f32 %v1187_v6, %v1186_v4  ;;  %v1355_v19 = vrot.slane %v1354_v0, 2 }
 0x2ae   :  { %v1214_v22 = vadd.f32 %v1213_v1, %v1212_v60  ;;  %v1381_v23 = vrot.slane %v1380_v61, 2  ;;  %v1201_v9 = vadd.f32 %v1200_v63, %v1199_v5  ;;  %v1368_v27 = vrot.slane %v1367_v15, 2 }
 0x2af   :  { %v1227_v28 = vadd.f32 %v1226_v16, %v1225_v55  ;;  %v1394_v11 = vrot.slane %v1393_v17, 2  ;;  %v1189_v12 = vrot.slane %v1188_v18, 1  ;;  %v1356_v10 = vadd.f32 %v1355_v19, %v1354_v0 }
 0x2b0   :  { %v1215_v29 = vrot.slane %v1214_v22, 1  ;;  %v1382_v24 = vadd.f32 %v1381_v23, %v1380_v61  ;;  %v1202_v25 = vrot.slane %v1201_v9, 1  ;;  %v1369_v30 = vadd.f32 %v1368_v27, %v1367_v15 }
 0x2b1   :  { %v1228_v33 = vrot.slane %v1227_v28, 1  ;;  %v1395_v20 = vadd.f32 %v1394_v11, %v1393_v17  ;;  %v1190_v34 = vadd.f32 %v1189_v12, %v1188_v18  ;;  %v1357_v21 = vrot.slane %v1356_v10, 1 }
 0x2b2   :  { %v1216_v35 = vadd.f32 %v1215_v29, %v1214_v22  ;;  %v1383_v36 = vrot.slane %v1382_v24, 1  ;;  %v1203_v37 = vadd.f32 %v1202_v25, %v1201_v9  ;;  %v1370_v38 = vrot.slane %v1369_v30, 1 }
 0x2b3   :  { %v1229_v41 = vadd.f32 %v1228_v33, %v1227_v28  ;;  %v1396_v52 = vrot.slane %v1395_v20, 1  ;;  %v1358_v31 = vadd.f32 %v1357_v21, %v1356_v10  ;;  %1402 = vst [vmem:[%s2160_s9 + $0x20] sm:$0xff] %v1190_v34 }
 0x2b4   :  { %v1384_v43 = vadd.f32 %v1383_v36, %v1382_v24  ;;  %1404 = vst [vmem:[%s2160_s9 + $0x30] sm:$0xff] %v1216_v35  ;;  %v1371_v26 = vadd.f32 %v1370_v38, %v1369_v30  ;;  %1403 = vst [vmem:[%s2160_s9 + $0x28] sm:$0xff] %v1203_v37 }
 0x2b5   :  { %v1397_v50 = vadd.f32 %v1396_v52, %v1395_v20  ;;  %1405 = vst [vmem:[%s2160_s9 + $0x38] sm:$0xff] %v1229_v41  ;;  %1410 = vst [vmem:[%s2161_s10 + $0x20] sm:$0xff] %v1358_v31 }
 0x2b6   :  { %1412 = vst [vmem:[%s2161_s10 + $0x30] sm:$0xff] %v1384_v43  ;;  %1411 = vst [vmem:[%s2161_s10 + $0x28] sm:$0xff] %v1371_v26 }
 0x2b7   :  { %1413 = vst [vmem:[%s2161_s10 + $0x38] sm:$0xff] %v1397_v50 }

// kernel: discriminator_forward.5
= control target key start
LH: loop header
LB: loop body
LE: loop exit
PB: predicated region body
PF: predicated region fallthrough
CT: control target
= control target key end

     0   :  { %vm72_vm0 = vcmask 64512   ;;  %vm232_vm1 = vcmask 523264   ;;  %s3196_s1 = inlined_call_operand.vmem [shape: f32[8,64], index: 1, kind: input, shape index: {}]   ;;  %s3197_s0 = inlined_call_operand.vmem [shape: f32[64,8], index: 0, kind: input, shape index: {}]   ;;  %s3198_s3 = inlined_call_operand.vmem [shape: f32[64,128], index: 3, kind: input, shape index: {}]   ;;  %s3199_s7 = inlined_call_operand.vmem [shape: bf16[128,1024], index: 7, kind: input, shape index: {}]   ;;  %s3200_s2 = inlined_call_operand.vmem [shape: f32[1,64], index: 2, kind: input, shape index: {}]   ;;  %s3201_s4 = inlined_call_operand.vmem [shape: f32[1,128], index: 4, kind: input, shape index: {}]   ;;  %s3202_s5 = inlined_call_operand.vmem [shape: f32[1,128], index: 5, kind: input, shape index: {}]   ;;  %s3203_s6 = inlined_call_operand.vmem [shape: f32[1,128], index: 6, kind: input, shape index: {}]   ;;  %s3204_s8 = inlined_call_operand.vmem [shape: f32[1,1024], index: 8, kind: input, shape index: {}]   ;;  %s3205_s9 = inlined_call_operand.vmem [shape: f32[1,1024], index: 9, kind: input, shape index: {}]   ;;  %s3206_s10 = inlined_call_operand.vmem [shape: f32[1,1024], index: 10, kind: input, shape index: {}]   ;;  %s3207_s11 = inlined_call_operand.vmem [shape: f32[1,1024], index: 11, kind: input, shape index: {}]   ;;  %s3208_s12 = inlined_call_operand.<no memory space> [shape: f32[1,1], index: 12, kind: input, shape index: {}]   ;;  %s3209_s13 = inlined_call_operand.vmem [shape: f32[64,1], index: 13, kind: output, shape index: {}]  }
   0x1   :  { %v55_v0 = vld [vmem:[%s3196_s1] sm:$0xff]  ;;  %v48_v2 = vld [vmem:[%s3197_s0 + $0x8] sm:$0xff]  ;;  %v49_v3 = vld [vmem:[%s3197_s0 + $0x10] sm:$0xff] }
   0x2   :  { %v47_v1 = vld [vmem:[%s3197_s0] sm:$0xff]  ;;  %1914 = vmatprep.subr.mxu0 %v55_v0  ;;  %v64_v4 = vld [vmem:[%s3198_s3 + $0x38] sm:$0xff]  ;;  %v63_v5 = vld [vmem:[%s3198_s3 + $0x30] sm:$0xff] }
   0x3   :  { %1916 = vmatprep.mubr.msk.f32.mxu0 %vm72_vm0, %v47_v1  ;;  %1915 = vmatpush3.msra.mxu0 %v55_v0  ;;  %v50_v6 = vld [vmem:[%s3197_s0 + $0x18] sm:$0xff]  ;;  %v51_v7 = vld [vmem:[%s3197_s0 + $0x20] sm:$0xff]  ;;  %v62_v8 = vld [vmem:[%s3198_s3 + $0x28] sm:$0xff] }
   0x4   :  { %1917 = vmatmul.mubr.msk.f32.vlgmr.msra.gmra.mxu0 %vm72_vm0, %v48_v2  ;;  %1928 = vmatprep.subr.mxu1 %v64_v4  ;;  %v61_v9 = vld [vmem:[%s3198_s3 + $0x20] sm:$0xff]  ;;  %v52_v10 = vld [vmem:[%s3197_s0 + $0x28] sm:$0xff]  ;;  %v53_v11 = vld [vmem:[%s3197_s0 + $0x30] sm:$0xff] }
   0x5   :  { %1919 = vmatprep.mubr.msk.f32.mxu0 %vm72_vm0, %v49_v3  ;;  %1929 = vmatpush3.msra.mxu1 %v64_v4  ;;  %v54_v12 = vld [vmem:[%s3197_s0 + $0x38] sm:$0xff]  ;;  %v59_v14 = vld [vmem:[%s3198_s3 + $0x10] sm:$0xff]  ;;  %v58_v15 = vld [vmem:[%s3198_s3 + $0x8] sm:$0xff] }
   0x6   :  { %1930 = vmatprep.subr.mxu1 %v63_v5  ;;  %v60_v13 = vld [vmem:[%s3198_s3 + $0x18] sm:$0xff]  ;;  %v57_v16 = vld [vmem:[%s3198_s3] sm:$0xff]  ;;  %v2128_v19 = vld [vmem:[%s3199_s7 + $0x1c8] sm:$0xff] }
   0x7   :  { %1931 = vmatpush3.msra.mxu1 %v63_v5  ;;  %v420_v17 = vld [vmem:[%s3199_s7 + $0x1c0] sm:$0xff]  ;;  %v2133_v22 = vld [vmem:[%s3199_s7 + $0x1e8] sm:$0xff] }
   0x8   :  { %1920 = vmatmul.mubr.msk.f32.gmra.mxu0 %vm72_vm0, %v50_v6  ;;  %1932 = vmatprep.subr.mxu1 %v62_v8  ;;  %v424_v18 = vld [vmem:[%s3199_s7 + $0x1e0] sm:$0xff]  ;;  %v1874_v25 = vcombine.low %v2128_v19, %v2133_v22  ;;  %v1875_v26 = vcombine.high %v2128_v19, %v2133_v22  ;;  %v413_v46 = vld [vmem:[%s3199_s7 + $0x188] sm:$0xff] }
   0x9   :  { %1922 = vmatprep.mubr.msk.f32.mxu0 %vm72_vm0, %v51_v7  ;;  %1933 = vmatpush3.msra.mxu1 %v62_v8  ;;  %v1872_v20 = vcombine.low %v420_v17, %v424_v18  ;;  %v1873_v21 = vcombine.high %v420_v17, %v424_v18  ;;  %v412_v23 = vld [vmem:[%s3199_s7 + $0x180] sm:$0xff]  ;;  %v417_v47 = vld [vmem:[%s3199_s7 + $0x1a8] sm:$0xff] }
   0xa   :  { %1934 = vmatprep.subr.mxu1 %v61_v9  ;;  %v416_v24 = vld [vmem:[%s3199_s7 + $0x1a0] sm:$0xff]  ;;  %v1867_v53 = vcombine.high %v413_v46, %v417_v47  ;;  %v405_v57 = vld [vmem:[%s3199_s7 + $0x148] sm:$0xff]  ;;  %v1866_v1 = vcombine.low %v413_v46, %v417_v47 }
   0xb   :  { %1935 = vmatpush3.msra.mxu1 %v61_v9  ;;  %v1865_v27 = vcombine.high %v412_v23, %v416_v24  ;;  %v404_v28 = vld [vmem:[%s3199_s7 + $0x140] sm:$0xff]  ;;  %846 = vmatprep.subr.bf16.mxu0 %v1873_v21  ;;  %v1864_v30 = vcombine.low %v412_v23, %v416_v24  ;;  %v409_v58 = vld [vmem:[%s3199_s7 + $0x168] sm:$0xff] }
   0xc   :  { %1923 = vmatmul.mubr.msk.f32.gmra.mxu0 %vm72_vm0, %v52_v10  ;;  %1936 = vmatprep.subr.mxu1 %v60_v13  ;;  %v408_v29 = vld [vmem:[%s3199_s7 + $0x160] sm:$0xff]  ;;  %v1859_v2 = vcombine.high %v405_v57, %v409_v58  ;;  %v397_v6 = vld [vmem:[%s3199_s7 + $0x108] sm:$0xff] }
   0xd   :  { %1925 = vmatprep.mubr.msk.f32.mxu0 %vm72_vm0, %v53_v11  ;;  %1937 = vmatpush3.msra.mxu1 %v60_v13  ;;  %v1857_v31 = vcombine.high %v404_v28, %v408_v29  ;;  %v396_v32 = vld [vmem:[%s3199_s7 + $0x100] sm:$0xff]  ;;  %v1856_v34 = vcombine.low %v404_v28, %v408_v29  ;;  %v401_v7 = vld [vmem:[%s3199_s7 + $0x128] sm:$0xff]  ;;  %v1858_v13 = vcombine.low %v405_v57, %v409_v58 }
   0xe   :  { %1938 = vmatprep.subr.mxu1 %v59_v14  ;;  %847 = vmatpush1.bf16.msra.mxu0 %v1872_v20  ;;  %v400_v33 = vld [vmem:[%s3199_s7 + $0x120] sm:$0xff]  ;;  %v389_v18 = vld [vmem:[%s3199_s7 + $0xc8] sm:$0xff]  ;;  %v1850_v22 = vcombine.low %v397_v6, %v401_v7 }
   0xf   :  { %1939 = vmatpush3.msra.mxu1 %v59_v14  ;;  %848 = vmatprep.subr.bf16.mxu0 %v1865_v27  ;;  %v1849_v35 = vcombine.high %v396_v32, %v400_v33  ;;  %v388_v36 = vld [vmem:[%s3199_s7 + $0xc0] sm:$0xff]  ;;  %v1848_v38 = vcombine.low %v396_v32, %v400_v33  ;;  %v1851_v14 = vcombine.high %v397_v6, %v401_v7  ;;  %v393_v19 = vld [vmem:[%s3199_s7 + $0xe8] sm:$0xff] }
  0x10   :  { %1926 = vmatmul.mubr.msk.f32.gmra.mxu0 %vm72_vm0, %v54_v12  ;;  %1940 = vmatprep.subr.mxu1 %v58_v15  ;;  %v392_v37 = vld [vmem:[%s3199_s7 + $0xe0] sm:$0xff]  ;;  %v1843_v24 = vcombine.high %v389_v18, %v393_v19  ;;  %v381_v28 = vld [vmem:[%s3199_s7 + $0x88] sm:$0xff] }
  0x11   :  { %1941 = vmatpush3.msra.mxu1 %v58_v15  ;;  %v1841_v39 = vcombine.high %v388_v36, %v392_v37  ;;  %v1840_v40 = vcombine.low %v388_v36, %v392_v37  ;;  %v1796_v41 = vld [vmem:[%s3200_s2] ss:$0 sm:$0xff]  ;;  %v373_v37 = vld [vmem:[%s3199_s7 + $0x48] sm:$0xff] }
  0x12   :  { %1942 = vmatprep.subr.mxu1 %v57_v16  ;;  %849 = vmatpush1.bf16.msra.mxu0 %v1864_v30  ;;  %v384_v27 = vld [vmem:[%s3199_s7 + $0xa0] sm:$0xff]  ;;  %v385_v30 = vld [vmem:[%s3199_s7 + $0xa8] sm:$0xff] }
  0x13   :  { %1943 = vmatpush3.msra.mxu1 %v57_v16  ;;  %850 = vmatprep.subr.bf16.mxu0 %v1857_v31  ;;  %v1834_v32 = vcombine.low %v381_v28, %v385_v30  ;;  %v1835_v33 = vcombine.high %v381_v28, %v385_v30  ;;  %v369_v46 = vld [vmem:[%s3199_s7 + $0x28] sm:$0xff] }
  0x14   :  { %919 = vmatprep.subr.bf16.mxu1 %v1875_v26  ;;  %v380_v26 = vld [vmem:[%s3199_s7 + $0x80] sm:$0xff] }
  0x15   :  { %v1833_v29 = vcombine.high %v380_v26, %v384_v27  ;;  %v1832_v31 = vcombine.low %v380_v26, %v384_v27 }
  0x16   :  { %851 = vmatpush1.bf16.msra.mxu0 %v1856_v34  ;;  %v372_v34 = vld [vmem:[%s3199_s7 + $0x40] sm:$0xff] }
  0x17   :  { %852 = vmatprep.subr.bf16.mxu0 %v1849_v35  ;;  %v376_v35 = vld [vmem:[%s3199_s7 + $0x60] sm:$0xff] }
  0x18   :  { %v1825_v36 = vcombine.high %v372_v34, %v376_v35 }
  0x1a   :  { %853 = vmatpush1.bf16.msra.mxu0 %v1848_v38  ;;  %v377_v38 = vld [vmem:[%s3199_s7 + $0x68] sm:$0xff] }
  0x1b   :  { %854 = vmatprep.subr.bf16.mxu0 %v1841_v39  ;;  %v1824_v39 = vcombine.low %v372_v34, %v376_v35  ;;  %v407_v34 = vld [vmem:[%s3199_s7 + $0x158] sm:$0xff] }
  0x1c   :  { %v411_v35 = vld [vmem:[%s3199_s7 + $0x178] sm:$0xff] }
  0x1e   :  { %855 = vmatpush1.bf16.msra.mxu0 %v1840_v40  ;;  %v1827_v40 = vcombine.high %v373_v37, %v377_v38 }
  0x1f   :  { %856 = vmatprep.subr.bf16.mxu0 %v1833_v29 }
  0x22   :  { %857 = vmatpush1.bf16.msra.mxu0 %v1832_v31  ;;  %v406_v31 = vld [vmem:[%s3199_s7 + $0x150] sm:$0xff] }
  0x23   :  { %858 = vmatprep.subr.bf16.mxu0 %v1825_v36 }
  0x26   :  { %859 = vmatpush1.bf16.msra.mxu0 %v1824_v39 }
  0xc4   :  { %v1918_v42 = vpop.f32.mrf.mxu0 }
  0xc5   :  { %v169_v43 = vadd.f32 %v1918_v42, %v1796_v41  ;;  %v364_v42 = vld [vmem:[%s3199_s7] sm:$0xff] }
  0xc6   :  { %v163_v44 = vpop.f32.mrf.mxu0 }
  0xc7   :  { %v164_v45 = vadd.f32 %v1796_v41, %v163_v44  ;;  %v211_v48 = vmul.f32 0.2, %v169_v43  ;;  %vm203_vm2 = vcmp.gt.f32.partialorder %v169_v43, 0.0  ;;  %v365_v44 = vld [vmem:[%s3199_s7 + $0x8] sm:$0xff] }
  0xc8   :  { %v1921_v49 = vpop.f32.mrf.mxu0 }
  0xc9   :  { %v179_v50 = vadd.f32 %v1921_v49, %v1796_v41  ;;  %vm202_vm3 = vcmp.gt.f32.partialorder %v164_v45, 0.0  ;;  %v210_v51 = vmul.f32 0.2, %v164_v45  ;;  %v219_v60 = vsel %vm203_vm2, %v169_v43, %v211_v48  ;;  %v368_v43 = vld [vmem:[%s3199_s7 + $0x20] sm:$0xff] }
  0xca   :  { %v173_v52 = vpop.f32.mrf.mxu0  ;;  %v1816_v47 = vcombine.low %v364_v42, %v368_v43  ;;  %v1818_v48 = vcombine.low %v365_v44, %v369_v46  ;;  %v1819_v49 = vcombine.high %v365_v44, %v369_v46  ;;  %v1863_v44 = vcombine.high %v407_v34, %v411_v35  ;;  %v402_v46 = vld [vmem:[%s3199_s7 + $0x130] sm:$0xff] }
  0xcb   :  { %vm205_vm4 = vcmp.gt.f32.partialorder %v179_v50, 0.0  ;;  %v213_v54 = vmul.f32 0.2, %v179_v50  ;;  %v174_v55 = vadd.f32 %v1796_v41, %v173_v52  ;;  %v218_v56 = vsel %vm202_vm3, %v164_v45, %v210_v51  ;;  %v2242_v51 = vld [vmem:[%s3199_s7 + $0x1f0] sm:$0xff]  ;;  %v2247_v52 = vld [vmem:[%s3199_s7 + $0x1d8] sm:$0xff] }
  0xcc   :  { %v1924_v59 = vpop.f32.mrf.mxu0  ;;  %1944 = vmatprep.mubr.msk.f32.mxu1 %vm232_vm1, %v218_v56  ;;  %v1817_v45 = vcombine.high %v364_v42, %v368_v43 }
  0xcd   :  { %vm204_vm5 = vcmp.gt.f32.partialorder %v174_v55, 0.0  ;;  %v212_v61 = vmul.f32 0.2, %v174_v55  ;;  %v189_v62 = vadd.f32 %v1924_v59, %v1796_v41  ;;  %1945 = vmatmul.mubr.msk.f32.vlgmr.msra.gmra.mxu1 %vm232_vm1, %v219_v60  ;;  %v221_v0 = vsel %vm205_vm4, %v179_v50, %v213_v54  ;;  %v2237_v50 = vld [vmem:[%s3199_s7 + $0x1d0] sm:$0xff]  ;;  %v427_v54 = vld [vmem:[%s3199_s7 + $0x1f8] sm:$0xff] }
  0xce   :  { %v183_v63 = vpop.f32.mrf.mxu0  ;;  %920 = vmatpush1.bf16.msra.mxu1 %v1874_v25  ;;  %v1842_v25 = vcombine.low %v389_v18, %v393_v19  ;;  %860 = vmatprep.subr.bf16.mxu0 %v1817_v45  ;;  %v1876_v56 = vcombine.low %v2237_v50, %v2242_v51  ;;  %v1878_v57 = vcombine.low %v2247_v52, %v427_v54  ;;  %v2263_v59 = vld [vmem:[%s3201_s4] ss:$0 sm:$0xff]  ;;  %v398_v45 = vld [vmem:[%s3199_s7 + $0x110] sm:$0xff] }
  0xcf   :  { %vm207_vm6 = vcmp.gt.f32.partialorder %v189_v62, 0.0  ;;  %v215_v3 = vmul.f32 0.2, %v189_v62  ;;  %v184_v4 = vadd.f32 %v1796_v41, %v183_v63  ;;  %v220_v5 = vsel %vm204_vm5, %v174_v55, %v212_v61  ;;  %921 = vmatprep.subr.bf16.mxu1 %v1867_v53  ;;  %861 = vmatpush1.bf16.msra.mxu0 %v1816_v47  ;;  %v2268_v61 = vld [vmem:[%s3202_s5] ss:$0 sm:$0xff] }
  0xd0   :  { %1947 = vmatprep.mubr.msk.f32.mxu1 %vm232_vm1, %v220_v5  ;;  %v1927_v8 = vpop.f32.mrf.mxu0  ;;  %v1877_v53 = vcombine.high %v2237_v50, %v2242_v51  ;;  %v1989_v55 = vmov 0   ;;  %v1879_v58 = vcombine.high %v2247_v52, %v427_v54  ;;  %v2274_v63 = vld [vmem:[%s3203_s6] ss:$0 sm:$0xff]  ;;  %v399_v50 = vld [vmem:[%s3199_s7 + $0x118] sm:$0xff]  ;;  %v1862_v54 = vcombine.low %v407_v34, %v411_v35  ;;  %v370_v34 = vld [vmem:[%s3199_s7 + $0x30] sm:$0xff] }
  0xd1   :  { %vm206_vm7 = vcmp.gt.f32.partialorder %v184_v4, 0.0  ;;  %v214_v9 = vmul.f32 0.2, %v184_v4  ;;  %1948 = vmatmul.mubr.msk.f32.gmra.mxu1 %vm232_vm1, %v221_v0  ;;  %v199_v10 = vadd.f32 %v1927_v8, %v1796_v41  ;;  %v223_v12 = vsel %vm207_vm6, %v189_v62, %v215_v3  ;;  %878 = vmatprep.mubr.bf16.mxu0 %v1989_v55  ;;  %v403_v51 = vld [vmem:[%s3199_s7 + $0x138] sm:$0xff] }
  0xd2   :  { %v193_v11 = vpop.f32.mrf.mxu0  ;;  %922 = vmatpush1.bf16.msra.mxu1 %v1866_v1  ;;  %992 = vmatprep.subr.bf16.mxu0 %v1877_v53  ;;  %v367_v35 = vld [vmem:[%s3199_s7 + $0x18] sm:$0xff] }
  0xd3   :  { %vm209_vm8 = vcmp.gt.f32.partialorder %v199_v10, 0.0  ;;  %v217_v15 = vmul.f32 0.2, %v199_v10  ;;  %v222_v16 = vsel %vm206_vm7, %v184_v4, %v214_v9  ;;  %v194_v17 = vadd.f32 %v1796_v41, %v193_v11  ;;  %923 = vmatprep.subr.bf16.mxu1 %v1859_v2  ;;  %v414_v11 = vld [vmem:[%s3199_s7 + $0x190] sm:$0xff] }
  0xd4   :  { %1950 = vmatprep.mubr.msk.f32.mxu1 %vm232_vm1, %v222_v16  ;;  %v1826_v41 = vcombine.low %v373_v37, %v377_v38  ;;  %v415_v16 = vld [vmem:[%s3199_s7 + $0x198] sm:$0xff] }
  0xd5   :  { %vm208_vm9 = vcmp.gt.f32.partialorder %v194_v17, 0.0  ;;  %v216_v20 = vmul.f32 0.2, %v194_v17  ;;  %1951 = vmatmul.mubr.msk.f32.gmra.mxu1 %vm232_vm1, %v223_v12  ;;  %v225_v21 = vsel %vm209_vm8, %v199_v10, %v217_v15  ;;  %v418_v12 = vld [vmem:[%s3199_s7 + $0x1b0] sm:$0xff] }
  0xd6   :  { %924 = vmatpush1.bf16.msra.mxu1 %v1858_v13  ;;  %v1868_v39 = vcombine.low %v414_v11, %v418_v12 }
  0xd7   :  { %v224_v23 = vsel %vm208_vm9, %v194_v17, %v216_v20  ;;  %925 = vmatprep.subr.bf16.mxu1 %v1851_v14  ;;  %v419_v17 = vld [vmem:[%s3199_s7 + $0x1b8] sm:$0xff] }
  0xd8   :  { %1953 = vmatprep.mubr.msk.f32.mxu1 %vm232_vm1, %v224_v23  ;;  %v1871_v30 = vcombine.high %v415_v16, %v419_v17 }
  0xd9   :  { %1954 = vmatmul.mubr.msk.f32.gmra.mxu1 %vm232_vm1, %v225_v21  ;;  %v1869_v21 = vcombine.high %v414_v11, %v418_v12 }
  0xda   :  { %926 = vmatpush1.bf16.msra.mxu1 %v1850_v22  ;;  %951 = vmatprep.mubr.bf16.mxu1 %v1989_v55 }
  0xdb   :  { %927 = vmatprep.subr.bf16.mxu1 %v1843_v24 }
  0xde   :  { %928 = vmatpush1.bf16.msra.mxu1 %v1842_v25 }
  0xdf   :  { %929 = vmatprep.subr.bf16.mxu1 %v1835_v33 }
  0xe2   :  { %930 = vmatpush1.bf16.msra.mxu1 %v1834_v32  ;;  %v410_v32 = vld [vmem:[%s3199_s7 + $0x170] sm:$0xff] }
  0xe3   :  { %931 = vmatprep.subr.bf16.mxu1 %v1827_v40  ;;  %v1870_v40 = vcombine.low %v415_v16, %v419_v17  ;;  %v1860_v52 = vcombine.low %v406_v31, %v410_v32 }
  0xe6   :  { %932 = vmatpush1.bf16.msra.mxu1 %v1826_v41  ;;  %v1861_v41 = vcombine.high %v406_v31, %v410_v32  ;;  %v366_v31 = vld [vmem:[%s3199_s7 + $0x10] sm:$0xff] }
  0xe7   :  { %933 = vmatprep.subr.bf16.mxu1 %v1819_v49 }
  0xea   :  { %934 = vmatpush1.bf16.msra.mxu1 %v1818_v48 }
  0xeb   :  { %1065 = vmatprep.subr.bf16.mxu1 %v1879_v58 }
 0x18d   :  { %v1946_v60 = vpop.f32.mrf.mxu1 }
 0x18e   :  { %v329_v62 = vadd.f32 %v1946_v60, %v2263_v59  ;;  %v390_v60 = vld [vmem:[%s3199_s7 + $0xd0] sm:$0xff] }
 0x18f   :  { %v323_v0 = vpop.f32.mrf.mxu1 }
 0x190   :  { %v436_v1 = vmul.f32 %v2268_v61, %v329_v62  ;;  %v324_v2 = vadd.f32 %v2263_v59, %v323_v0  ;;  %v394_v62 = vld [vmem:[%s3199_s7 + $0xf0] sm:$0xff] }
 0x191   :  { %v1949_v3 = vpop.f32.mrf.mxu1 }
 0x192   :  { %v450_v4 = vadd.f32 %v2274_v63, %v436_v1  ;;  %v435_v5 = vmul.f32 %v2268_v61, %v324_v2  ;;  %v339_v6 = vadd.f32 %v1949_v3, %v2263_v59  ;;  %v391_v3 = vld [vmem:[%s3199_s7 + $0xd8] sm:$0xff] }
 0x193   :  { %v333_v7 = vpop.f32.mrf.mxu1 }
 0x194   :  { %v466_v8 = vmul.f32 0.2, %v450_v4  ;;  %v449_v9 = vadd.f32 %v2274_v63, %v435_v5  ;;  %v438_v10 = vmul.f32 %v2268_v61, %v339_v6  ;;  %vm458_vm10 = vcmp.gt.f32.partialorder %v450_v4, 0.0 }
 0x195   :  { %v334_v13 = vadd.f32 %v2263_v59, %v333_v7  ;;  %v1952_v14 = vpop.f32.mrf.mxu1  ;;  %v1852_v5 = vcombine.low %v398_v45, %v402_v46  ;;  %v1854_v6 = vcombine.low %v399_v50, %v403_v51  ;;  %v1845_v7 = vcombine.high %v390_v60, %v394_v62 }
 0x196   :  { %vm457_vm11 = vcmp.gt.f32.partialorder %v449_v9, 0.0  ;;  %v465_v15 = vmul.f32 0.2, %v449_v9  ;;  %v349_v19 = vadd.f32 %v1952_v14, %v2263_v59  ;;  %v474_v22 = vsel %vm458_vm10, %v450_v4, %v466_v8  ;;  %v395_v4 = vld [vmem:[%s3199_s7 + $0xf8] sm:$0xff] }
 0x197   :  { %v437_v18 = vmul.f32 %v2268_v61, %v334_v13  ;;  %v343_v20 = vpop.f32.mrf.mxu1  ;;  %v452_v24 = vadd.f32 %v2274_v63, %v438_v10  ;;  %v1847_v8 = vcombine.high %v391_v3, %v395_v4  ;;  %v386_v13 = vld [vmem:[%s3199_s7 + $0xb0] sm:$0xff]  ;;  %v383_v14 = vld [vmem:[%s3199_s7 + $0x98] sm:$0xff]  ;;  %v1846_v16 = vcombine.low %v391_v3, %v395_v4 }
 0x198   :  { %v473_v23 = vsel %vm457_vm11, %v449_v9, %v465_v15  ;;  %v344_v25 = vadd.f32 %v2263_v59, %v343_v20  ;;  %v440_v28 = vmul.f32 %v2268_v61, %v349_v19  ;;  %v382_v9 = vld [vmem:[%s3199_s7 + $0x90] sm:$0xff]  ;;  %v1844_v15 = vcombine.low %v390_v60, %v394_v62  ;;  %v2443_v62 = vld [vmem:[%s3207_s11] sm:$0xff] }
 0x199   :  { %v2300_v26 = vpack.c.bf16 %v474_v22, %v473_v23  ;;  %v451_v27 = vadd.f32 %v2274_v63, %v437_v18  ;;  %v1955_v29 = vpop.f32.mrf.mxu1  ;;  %v468_v38 = vmul.f32 0.2, %v452_v24  ;;  %vm460_vm13 = vcmp.gt.f32.partialorder %v452_v24, 0.0  ;;  %v374_v20 = vld [vmem:[%s3199_s7 + $0x50] sm:$0xff] }
 0x19a   :  { %v439_v33 = vmul.f32 %v2268_v61, %v344_v25  ;;  %v454_v42 = vadd.f32 %v2274_v63, %v440_v28  ;;  %v359_v43 = vadd.f32 %v1955_v29, %v2263_v59  ;;  %v1837_v18 = vcombine.high %v382_v9, %v386_v13  ;;  %v379_v25 = vld [vmem:[%s3199_s7 + $0x78] sm:$0xff] }
 0x19b   :  { %vm459_vm12 = vcmp.gt.f32.partialorder %v451_v27, 0.0  ;;  %v467_v36 = vmul.f32 0.2, %v451_v27  ;;  %879 = vmatmul.mubr.bf16.vlgmr.msra.gmra.mxu0 %v2300_v26  ;;  %952 = vmatmul.mubr.bf16.vlgmr.msra.gmra.mxu1 %v2300_v26  ;;  %v353_v37 = vpop.f32.mrf.mxu1  ;;  %v476_v53 = vsel %vm460_vm13, %v452_v24, %v468_v38  ;;  %v375_v24 = vld [vmem:[%s3199_s7 + $0x58] sm:$0xff] }
 0x19c   :  { %993 = vmatpush1.bf16.msra.mxu0 %v1876_v56  ;;  %1066 = vmatpush1.bf16.msra.mxu1 %v1878_v57  ;;  %v453_v47 = vadd.f32 %v2274_v63, %v439_v33  ;;  %v354_v48 = vadd.f32 %v2263_v59, %v353_v37  ;;  %v1853_v56 = vcombine.high %v398_v45, %v402_v46  ;;  %v470_v0 = vmul.f32 0.2, %v454_v42 }
 0x19d   :  { %994 = vmatprep.subr.bf16.mxu0 %v1869_v21  ;;  %1067 = vmatprep.subr.bf16.mxu1 %v1871_v30  ;;  %v475_v49 = vsel %vm459_vm12, %v451_v27, %v467_v36  ;;  %v442_v57 = vmul.f32 %v2268_v61, %v359_v43  ;;  %v1855_v59 = vcombine.high %v399_v50, %v403_v51  ;;  %vm462_vm14 = vcmp.gt.f32.partialorder %v454_v42, 0.0  ;;  %v378_v21 = vld [vmem:[%s3199_s7 + $0x70] sm:$0xff]  ;;  %v371_v36 = vld [vmem:[%s3199_s7 + $0x38] sm:$0xff]  ;;  %v2422_v50 = vld [vmem:[%s3205_s9] sm:$0xff] }
 0x19e   :  { %888 = vmatprep.mubr.bf16.mxu0 %v1989_v55  ;;  %961 = vmatprep.mubr.bf16.mxu1 %v1989_v55  ;;  %v2340_v58 = vpack.c.bf16 %v476_v53, %v475_v49  ;;  %v469_v1 = vmul.f32 0.2, %v453_v47  ;;  %v441_v2 = vmul.f32 %v2268_v61, %v354_v48  ;;  %vm461_vm15 = vcmp.gt.f32.partialorder %v453_v47, 0.0 }
 0x19f   :  { %v456_v61 = vadd.f32 %v2274_v63, %v442_v57  ;;  %v478_v12 = vsel %vm462_vm14, %v454_v42, %v470_v0  ;;  %v1836_v27 = vcombine.low %v382_v9, %v386_v13  ;;  %v1829_v29 = vcombine.high %v374_v20, %v378_v21 }
 0x1a0   :  { %995 = vmatpush1.bf16.msra.mxu0 %v1868_v39  ;;  %1068 = vmatpush1.bf16.msra.mxu1 %v1870_v40  ;;  %v455_v10 = vadd.f32 %v2274_v63, %v441_v2  ;;  %v477_v11 = vsel %vm461_vm15, %v453_v47, %v469_v1  ;;  %v387_v63 = vld [vmem:[%s3199_s7 + $0xb8] sm:$0xff]  ;;  %v1831_v30 = vcombine.high %v375_v24, %v379_v25  ;;  %v428_v47 = vld [vmem:[%s3204_s8] sm:$0xff] }
 0x1a1   :  { %996 = vmatprep.subr.bf16.mxu0 %v1861_v41  ;;  %1069 = vmatprep.subr.bf16.mxu1 %v1863_v44  ;;  %v483_v17 = vpack.c.bf16 %v478_v12, %v477_v11  ;;  %v1839_v19 = vcombine.high %v383_v14, %v387_v63  ;;  %v472_v22 = vmul.f32 0.2, %v456_v61  ;;  %vm464_vm0 = vcmp.gt.f32.partialorder %v456_v61, 0.0 }
 0x1a2   :  { %v471_v23 = vmul.f32 0.2, %v455_v10  ;;  %vm463_vm1 = vcmp.gt.f32.partialorder %v455_v10, 0.0  ;;  %v1838_v28 = vcombine.low %v383_v14, %v387_v63  ;;  %v1828_v37 = vcombine.low %v374_v20, %v378_v21 }
 0x1a3   :  { %889 = vmatmul.mubr.bf16.gmra.mxu0 %v2340_v58  ;;  %962 = vmatmul.mubr.bf16.gmra.mxu1 %v2340_v58  ;;  %v480_v33 = vsel %vm464_vm0, %v456_v61, %v472_v22  ;;  %v1830_v38 = vcombine.low %v375_v24, %v379_v25  ;;  %v1821_v40 = vcombine.high %v366_v31, %v370_v34 }
 0x1a4   :  { %997 = vmatpush1.bf16.msra.mxu0 %v1860_v52  ;;  %1070 = vmatpush1.bf16.msra.mxu1 %v1862_v54  ;;  %v479_v32 = vsel %vm463_vm1, %v455_v10, %v471_v23  ;;  %v1823_v41 = vcombine.high %v367_v35, %v371_v36  ;;  %v1820_v42 = vcombine.low %v366_v31, %v370_v34  ;;  %v1244_v52 = vld [vmem:[%s3206_s10] sm:$0xff] }
 0x1a5   :  { %998 = vmatprep.subr.bf16.mxu0 %v1853_v56  ;;  %1071 = vmatprep.subr.bf16.mxu1 %v1855_v59  ;;  %v484_v39 = vpack.c.bf16 %v480_v33, %v479_v32  ;;  %v1822_v43 = vcombine.low %v367_v35, %v371_v36 }
 0x1a6   :  { %898 = vmatprep.mubr.bf16.mxu0 %v1989_v55  ;;  %971 = vmatprep.mubr.bf16.mxu1 %v1989_v55 }
 0x1a8   :  { %999 = vmatpush1.bf16.msra.mxu0 %v1852_v5  ;;  %1072 = vmatpush1.bf16.msra.mxu1 %v1854_v6 }
 0x1a9   :  { %1000 = vmatprep.subr.bf16.mxu0 %v1845_v7  ;;  %1073 = vmatprep.subr.bf16.mxu1 %v1847_v8 }
 0x1ab   :  { %899 = vmatmul.mubr.bf16.gmra.mxu0 %v483_v17  ;;  %972 = vmatmul.mubr.bf16.gmra.mxu1 %v483_v17 }
 0x1ac   :  { %1001 = vmatpush1.bf16.msra.mxu0 %v1844_v15  ;;  %1074 = vmatpush1.bf16.msra.mxu1 %v1846_v16 }
 0x1ad   :  { %1002 = vmatprep.subr.bf16.mxu0 %v1837_v18  ;;  %1075 = vmatprep.subr.bf16.mxu1 %v1839_v19 }
 0x1ae   :  { %908 = vmatprep.mubr.bf16.mxu0 %v1989_v55  ;;  %981 = vmatprep.mubr.bf16.mxu1 %v1989_v55 }
 0x1b0   :  { %1003 = vmatpush1.bf16.msra.mxu0 %v1836_v27  ;;  %1076 = vmatpush1.bf16.msra.mxu1 %v1838_v28 }
 0x1b1   :  { %1004 = vmatprep.subr.bf16.mxu0 %v1829_v29  ;;  %1077 = vmatprep.subr.bf16.mxu1 %v1831_v30 }
 0x1b3   :  { %909 = vmatmul.mubr.bf16.gmra.mxu0 %v484_v39  ;;  %982 = vmatmul.mubr.bf16.gmra.mxu1 %v484_v39 }
 0x1b4   :  { %1005 = vmatpush1.bf16.msra.mxu0 %v1828_v37  ;;  %1078 = vmatpush1.bf16.msra.mxu1 %v1830_v38 }
 0x1b5   :  { %1006 = vmatprep.subr.bf16.mxu0 %v1821_v40  ;;  %1079 = vmatprep.subr.bf16.mxu1 %v1823_v41 }
 0x1b6   :  { %1024 = vmatprep.mubr.bf16.mxu0 %v1989_v55  ;;  %1097 = vmatprep.mubr.bf16.mxu1 %v1989_v55 }
 0x1b8   :  { %1007 = vmatpush1.bf16.msra.mxu0 %v1820_v42  ;;  %1080 = vmatpush1.bf16.msra.mxu1 %v1822_v43 }
 0x1bb   :  { %1025 = vmatmul.mubr.bf16.vlgmr.msra.gmra.mxu0 %v2300_v26  ;;  %1098 = vmatmul.mubr.bf16.vlgmr.msra.gmra.mxu1 %v2300_v26  ;;  %v486_v26 = vlaneseq }
 0x1bc   :  { %1034 = vmatprep.mubr.bf16.mxu0 %v1989_v55  ;;  %1107 = vmatprep.mubr.bf16.mxu1 %v1989_v55 }
 0x1bd   :  { %v487_v44 = vshrl.u32 %v486_v26, 7 }
 0x1bf   :  { %v488_v45 = vsub.s32 0, %v487_v44  ;;  %v496_v46 = vsub.s32 2, %v487_v44  ;;  %v492_v48 = vsub.s32 1, %v487_v44  ;;  %v504_v9 = vsub.s32 4, %v487_v44 }
 0x1c0   :  { %v512_v10 = vsub.s32 6, %v487_v44  ;;  %v508_v63 = vsub.s32 5, %v487_v44  ;;  %v516_v15 = vsub.s32 7, %v487_v44 }
 0x1c1   :  { %v2417_v49 = vrot.slane %v428_v47, %v488_v45  ;;  %v2424_v51 = vrot.slane %v428_v47, %v496_v46  ;;  %v2429_v53 = vrot.slane %v428_v47, %v492_v48  ;;  %v2432_v56 = vrot.slane %v2422_v50, %v488_v45 }
 0x1c2   :  { %v2438_v60 = vrot.slane %v1244_v52, %v488_v45  ;;  %v2448_v2 = vrot.slane %v1244_v52, %v496_v46  ;;  %v2451_v4 = vrot.slane %v2422_v50, %v492_v48  ;;  %v2453_v5 = vrot.slane %v1244_v52, %v492_v48 }
 0x1c3   :  { %1035 = vmatmul.mubr.bf16.gmra.mxu0 %v2340_v58  ;;  %1108 = vmatmul.mubr.bf16.gmra.mxu1 %v2340_v58  ;;  %v2435_v58 = vrot.slane %v2422_v50, %v496_v46  ;;  %v2463_v12 = vrot.slane %v2443_v62, %v488_v45  ;;  %v2470_v18 = vrot.slane %v2443_v62, %v492_v48 }
 0x1c4   :  { %1044 = vmatprep.mubr.bf16.mxu0 %v1989_v55  ;;  %1117 = vmatprep.mubr.bf16.mxu1 %v1989_v55  ;;  %v2479_v27 = vrot.slane %v428_v47, %v504_v9  ;;  %v2482_v28 = vrot.slane %v2422_v50, %v504_v9  ;;  %v2484_v29 = vrot.slane %v428_v47, %v512_v10 }
 0x1c5   :  { %v2487_v30 = vrot.slane %v2422_v50, %v512_v10  ;;  %v2490_v34 = vrot.slane %v1244_v52, %v504_v9  ;;  %v2492_v35 = vrot.slane %v428_v47, %v508_v63  ;;  %v2494_v36 = vrot.slane %v428_v47, %v516_v15 }
 0x1c6   :  { %v2499_v40 = vrot.slane %v1244_v52, %v512_v10  ;;  %v2505_v45 = vrot.slane %v2422_v50, %v508_v63  ;;  %v2511_v48 = vrot.slane %v2422_v50, %v516_v15 }
 0x1c8   :  { %3223 = vst [vmem:[#allocation4_spill] sm:$0xff] %v2511_v48 }
 0x1cb   :  { %1045 = vmatmul.mubr.bf16.gmra.mxu0 %v483_v17  ;;  %1118 = vmatmul.mubr.bf16.gmra.mxu1 %v483_v17  ;;  %v2467_v17 = vrot.slane %v2443_v62, %v496_v46 }
 0x1cc   :  { %1054 = vmatprep.mubr.bf16.mxu0 %v1989_v55  ;;  %1127 = vmatprep.mubr.bf16.mxu1 %v1989_v55  ;;  %v500_v55 = vsub.s32 3, %v487_v44 }
 0x1ce   :  { %v2446_v1 = vrot.slane %v428_v47, %v500_v55  ;;  %v2456_v61 = vrot.slane %v2422_v50, %v500_v55  ;;  %v2459_v8 = vrot.slane %v1244_v52, %v500_v55  ;;  %v2477_v25 = vrot.slane %v2443_v62, %v500_v55 }
 0x1cf   :  { %v2508_v47 = vrot.slane %v1244_v52, %v508_v63  ;;  %v2513_v55 = vrot.slane %v1244_v52, %v516_v15 }
 0x1d1   :  { %3222 = vst [vmem:[#allocation3_spill] sm:$0xff] %v2508_v47  ;;  %3224 = vst [vmem:[#allocation5_spill] sm:$0xff] %v2513_v55 }
 0x1d3   :  { %1055 = vmatmul.mubr.bf16.gmra.mxu0 %v484_v39  ;;  %1128 = vmatmul.mubr.bf16.gmra.mxu1 %v484_v39 }
 0x25b   :  { %v880_v54 = vpop.f32.mrf.mxu0  ;;  %v953_v57 = vpop.f32.mrf.mxu1 }
 0x25c   :  { %v881_v59 = vadd.f32 %v880_v54, %v2417_v49  ;;  %v954_v0 = vadd.f32 %v953_v57, %v2424_v51 }
 0x25d   :  { %v882_v3 = vpop.f32.mrf.mxu0  ;;  %v955_v6 = vpop.f32.mrf.mxu1 }
 0x25e   :  { %v883_v7 = vadd.f32 %v882_v3, %v2429_v53  ;;  %v1180_v11 = vmul.f32 %v2432_v56, %v881_v59  ;;  %v1182_v16 = vmul.f32 %v2435_v58, %v954_v0  ;;  %v956_v19 = vadd.f32 %v955_v6, %v2446_v1 }
 0x25f   :  { %v884_v13 = vpop.f32.mrf.mxu0  ;;  %v957_v14 = vpop.f32.mrf.mxu1  ;;  %v2518_v6 = vrot.slane %v2443_v62, %v504_v9 }
 0x260   :  { %v1181_v20 = vmul.f32 %v2451_v4, %v883_v7  ;;  %v885_v21 = vadd.f32 %v884_v13, %v2417_v49  ;;  %v958_v22 = vadd.f32 %v957_v14, %v2424_v51  ;;  %v1286_v31 = vadd.f32 %v2438_v60, %v1180_v11 }
 0x261   :  { %v886_v23 = vpop.f32.mrf.mxu0  ;;  %v959_v24 = vpop.f32.mrf.mxu1  ;;  %v1288_v37 = vadd.f32 %v2448_v2, %v1182_v16  ;;  %v1183_v38 = vmul.f32 %v2456_v61, %v956_v19  ;;  %3225 = vst [vmem:[#allocation6_spill] sm:$0xff] %v2518_v6  ;;  %v2522_v13 = vrot.slane %v2443_v62, %v512_v10 }
 0x262   :  { %v887_v39 = vadd.f32 %v886_v23, %v2429_v53  ;;  %v1287_v41 = vadd.f32 %v2453_v5, %v1181_v20  ;;  %v1188_v42 = vmul.f32 %v2432_v56, %v885_v21  ;;  %v1190_v43 = vmul.f32 %v2435_v58, %v958_v22 }
 0x263   :  { %v890_v32 = vpop.f32.mrf.mxu0  ;;  %v963_v33 = vpop.f32.mrf.mxu1  ;;  %v960_v46 = vadd.f32 %v959_v24, %v2446_v1  ;;  %v1414_v54 = vmul.f32 0.2, %v1286_v31  ;;  %vm1350_vm2 = vcmp.gt.f32.partialorder %v1286_v31, 0.0  ;;  %v1416_v7 = vmul.f32 0.2, %v1288_v37  ;;  %3226 = vst [vmem:[#allocation7_spill] sm:$0xff] %v2522_v13 }
 0x264   :  { %v1189_v57 = vmul.f32 %v2451_v4, %v887_v39  ;;  %v891_v59 = vadd.f32 %v890_v32, %v2417_v49  ;;  %v1289_v11 = vadd.f32 %v2459_v8, %v1183_v38  ;;  %vm1352_vm3 = vcmp.gt.f32.partialorder %v1288_v37, 0.0 }
 0x265   :  { %v892_v26 = vpop.f32.mrf.mxu0  ;;  %v965_v44 = vpop.f32.mrf.mxu1  ;;  %v1415_v50 = vmul.f32 0.2, %v1287_v41  ;;  %v1294_v52 = vadd.f32 %v2438_v60, %v1188_v42  ;;  %v1296_v14 = vadd.f32 %v2448_v2, %v1190_v43  ;;  %vm1351_vm4 = vcmp.gt.f32.partialorder %v1287_v41, 0.0 }
 0x266   :  { %v1295_v20 = vadd.f32 %v2453_v5, %v1189_v57  ;;  %v1191_v9 = vmul.f32 %v2456_v61, %v960_v46  ;;  %v964_v21 = vadd.f32 %v963_v33, %v2424_v51  ;;  %v1478_v22 = vsel %vm1350_vm2, %v1286_v31, %v1414_v54 }
 0x267   :  { %v894_v0 = vpop.f32.mrf.mxu0  ;;  %v967_v3 = vpop.f32.mrf.mxu1  ;;  %v1196_v23 = vmul.f32 %v2432_v56, %v891_v59  ;;  %v2531_v32 = vrot.slane %v2443_v62, %v508_v63  ;;  %v2534_v38 = vrot.slane %v2443_v62, %v516_v15  ;;  %v1480_v39 = vsel %vm1352_vm3, %v1288_v37, %v1416_v7 }
 0x268   :  { %vm1353_vm5 = vcmp.gt.f32.partialorder %v1289_v11, 0.0  ;;  %v1417_v42 = vmul.f32 0.2, %v1289_v11  ;;  %v893_v43 = vadd.f32 %v892_v26, %v2429_v53  ;;  %v1479_v46 = vsel %vm1351_vm4, %v1287_v41, %v1415_v50 }
 0x269   :  { %v896_v16 = vpop.f32.mrf.mxu0  ;;  %v969_v19 = vpop.f32.mrf.mxu1  ;;  %3227 = vst [vmem:[#allocation8_spill] sm:$0xff] %v2531_v32  ;;  %3228 = vst [vmem:[#allocation9_spill] sm:$0xff] %v2534_v38  ;;  %v1422_v57 = vmul.f32 0.2, %v1294_v52  ;;  %v1424_v33 = vmul.f32 0.2, %v1296_v14  ;;  %v1198_v31 = vmul.f32 %v2435_v58, %v964_v21  ;;  %v1297_v13 = vadd.f32 %v2459_v8, %v1191_v9 }
 0x26a   :  { %vm1358_vm6 = vcmp.gt.f32.partialorder %v1294_v52, 0.0  ;;  %vm1360_vm7 = vcmp.gt.f32.partialorder %v1296_v14, 0.0  ;;  %v1423_v63 = vmul.f32 0.2, %v1295_v20  ;;  %v2541_v62 = vmul.f32 %v2463_v12, %v1478_v22 }
 0x26b   :  { %v900_v10 = vpop.f32.mrf.mxu0  ;;  %v973_v24 = vpop.f32.mrf.mxu1  ;;  %v2544_v15 = vmul.f32 %v2467_v17, %v1480_v39  ;;  %vm1359_vm8 = vcmp.gt.f32.partialorder %v1295_v20, 0.0  ;;  %v1302_v37 = vadd.f32 %v2438_v60, %v1196_v23  ;;  %v2552_v7 = vmul.f32 %v2470_v18, %v1479_v46 }
 0x26c   :  { %3229 = vst [vmem:[#allocation10_spill] sm:$0xff] %v2541_v62  ;;  %v1304_v50 = vadd.f32 %v2448_v2, %v1198_v31  ;;  %v1197_v9 = vmul.f32 %v2451_v4, %v893_v43  ;;  %v966_v21 = vadd.f32 %v965_v44, %v2446_v1  ;;  %v2558_v22 = vsel %vm1353_vm5, %v1289_v11, %v1417_v42 }
 0x26d   :  { %v902_v54 = vpop.f32.mrf.mxu0  ;;  %v975_v59 = vpop.f32.mrf.mxu1  ;;  %3230 = vst [vmem:[#allocation11_spill] sm:$0xff] %v2544_v15  ;;  %3231 = vst [vmem:[#allocation12_spill] sm:$0xff] %v2552_v7  ;;  %v1486_v39 = vsel %vm1358_vm6, %v1294_v52, %v1422_v57  ;;  %v1488_v38 = vsel %vm1360_vm7, %v1296_v14, %v1424_v33  ;;  %v895_v23 = vadd.f32 %v894_v0, %v2417_v49  ;;  %vm1361_vm9 = vcmp.gt.f32.partialorder %v1297_v13, 0.0 }
 0x26e   :  { %3232 = vst [vmem:[#allocation13_spill] sm:$0xff] %v2558_v22  ;;  %v1487_v6 = vsel %vm1359_vm8, %v1295_v20, %v1423_v63  ;;  %v1425_v46 = vmul.f32 0.2, %v1297_v13  ;;  %v968_v31 = vadd.f32 %v967_v3, %v2424_v51  ;;  %v1430_v7 = vmul.f32 0.2, %v1302_v37 }
 0x26f   :  { %v2547_v41 = vpop.f32.mrf.mxu0  ;;  %v2549_v26 = vpop.f32.mrf.mxu1  ;;  %v897_v43 = vadd.f32 %v896_v16, %v2429_v53  ;;  %v970_v44 = vadd.f32 %v969_v19, %v2446_v1  ;;  %v901_v11 = vadd.f32 %v900_v10, %v2417_v49  ;;  %vm1366_vm10 = vcmp.gt.f32.partialorder %v1302_v37, 0.0 }
 0x270   :  { %v1432_v0 = vmul.f32 0.2, %v1304_v50  ;;  %v1303_v42 = vadd.f32 %v2453_v5, %v1197_v9  ;;  %v1199_v20 = vmul.f32 %v2456_v61, %v966_v21  ;;  %v1592_v57 = vmul.f32 %v2463_v12, %v1486_v39 }
 0x271   :  { %v2561_v32 = vpop.f32.mrf.mxu0  ;;  %v2563_v15 = vpop.f32.mrf.mxu1  ;;  %vm1368_vm11 = vcmp.gt.f32.partialorder %v1304_v50, 0.0  ;;  %v1204_v3 = vmul.f32 %v2432_v56, %v895_v23  ;;  %v1205_v16 = vmul.f32 %v2451_v4, %v897_v43  ;;  %v2583_v33 = vmul.f32 %v2467_v17, %v1488_v38 }
 0x272   :  { %v1593_v63 = vmul.f32 %v2470_v18, %v1487_v6  ;;  %v1206_v9 = vmul.f32 %v2435_v58, %v968_v31  ;;  %v974_v21 = vadd.f32 %v973_v24, %v2424_v51  ;;  %v1489_v39 = vsel %vm1361_vm9, %v1297_v13, %v1425_v46 }
 0x273   :  { %v2569_v52 = vpop.f32.mrf.mxu0  ;;  %v2571_v14 = vpop.f32.mrf.mxu1  ;;  %3233 = vst [vmem:[#allocation14_spill] sm:$0xff] %v2583_v33  ;;  %v1494_v22 = vsel %vm1366_vm10, %v1302_v37, %v1430_v7  ;;  %v1207_v23 = vmul.f32 %v2456_v61, %v970_v44  ;;  %v1212_v43 = vmul.f32 %v2432_v56, %v901_v11  ;;  %v1496_v62 = vsel %vm1368_vm11, %v1304_v50, %v1432_v0 }
 0x274   :  { %vm1367_vm12 = vcmp.gt.f32.partialorder %v1303_v42, 0.0  ;;  %v1431_v55 = vmul.f32 0.2, %v1303_v42  ;;  %v1305_v48 = vadd.f32 %v2459_v8, %v1199_v20  ;;  %v1310_v6 = vadd.f32 %v2438_v60, %v1204_v3 }
 0x275   :  { %v2578_v19 = vpop.f32.mrf.mxu0  ;;  %v2580_v10 = vpop.f32.mrf.mxu1  ;;  %v1311_v24 = vadd.f32 %v2453_v5, %v1205_v16  ;;  %v903_v13 = vadd.f32 %v902_v54, %v2429_v53  ;;  %v976_v37 = vadd.f32 %v975_v59, %v2446_v1  ;;  %v2600_v7 = vadd.f32 %v1593_v63, %v1592_v57 }
 0x276   :  { %v2603_v50 = vmul.f32 %v2477_v25, %v1489_v39  ;;  %v1312_v46 = vadd.f32 %v2448_v2, %v1206_v9  ;;  %v1214_v31 = vmul.f32 %v2435_v58, %v974_v21  ;;  %v2608_v44 = vmul.f32 %v2463_v12, %v1494_v22 }
 0x277   :  { %v2592_v38 = vpop.f32.mrf.mxu0  ;;  %v2594_v33 = vpop.f32.mrf.mxu1  ;;  %3234 = vst [vmem:[#allocation15_spill] sm:$0xff] %v2600_v7  ;;  %v2611_v11 = vmul.f32 %v2467_v17, %v1496_v62  ;;  %v1313_v0 = vadd.f32 %v2459_v8, %v1207_v23  ;;  %v1318_v54 = vadd.f32 %v2438_v60, %v1212_v43  ;;  %v1495_v59 = vsel %vm1367_vm12, %v1303_v42, %v1431_v55 }
 0x278   :  { %3235 = vst [vmem:[#allocation16_spill] sm:$0xff] %v2603_v50  ;;  %3236 = vst [vmem:[#allocation17_spill] sm:$0xff] %v2608_v44  ;;  %v1433_v20 = vmul.f32 0.2, %v1305_v48  ;;  %v1213_v57 = vmul.f32 %v2451_v4, %v903_v13  ;;  %v1215_v3 = vmul.f32 %v2456_v61, %v976_v37  ;;  %vm1369_vm13 = vcmp.gt.f32.partialorder %v1305_v48, 0.0 }
 0x279   :  { %3237 = vst [vmem:[#allocation18_spill] sm:$0xff] %v2611_v11  ;;  %v2618_v16 = vpop.f32.mrf.mxu0  ;;  %v2620_v63 = vpop.f32.mrf.mxu1  ;;  %vm1374_vm14 = vcmp.gt.f32.partialorder %v1310_v6, 0.0  ;;  %v1438_v22 = vmul.f32 0.2, %v1310_v6  ;;  %v1439_v62 = vmul.f32 0.2, %v1311_v24  ;;  %v1320_v21 = vadd.f32 %v2448_v2, %v1214_v31 }
 0x27a   :  { %v1440_v9 = vmul.f32 0.2, %v1312_v46  ;;  %vm1375_vm15 = vcmp.gt.f32.partialorder %v1311_v24, 0.0  ;;  %v905_v55 = vadd.f32 %v2547_v41, %v2417_v49  ;;  %vm1376_vm0 = vcmp.gt.f32.partialorder %v1312_v46, 0.0 }
 0x27b   :  { %vm1377_vm1 = vcmp.gt.f32.partialorder %v1313_v0, 0.0  ;;  %v1441_v42 = vmul.f32 0.2, %v1313_v0  ;;  %v1446_v39 = vmul.f32 0.2, %v1318_v54  ;;  %v1319_v23 = vadd.f32 %v2453_v5, %v1213_v57  ;;  %v2631_v11 = vpop.f32.mrf.mxu0  ;;  %v2633_v31 = vpop.f32.mrf.mxu1 }
 0x27c   :  { %v1321_v43 = vadd.f32 %v2459_v8, %v1215_v3  ;;  %v978_v13 = vadd.f32 %v2549_v26, %v2424_v51  ;;  %v907_v37 = vadd.f32 %v2561_v32, %v2429_v53  ;;  %v2636_v41 = vmul.f32 %v2470_v18, %v1495_v59 }
 0x27d   :  { %v2639_v44 = vsel %vm1369_vm13, %v1305_v48, %v1433_v20  ;;  %v1503_v50 = vsel %vm1375_vm15, %v1311_v24, %v1439_v62  ;;  %vm1382_vm2 = vcmp.gt.f32.partialorder %v1318_v54, 0.0  ;;  %v1448_v57 = vmul.f32 0.2, %v1320_v21  ;;  %v2649_v62 = vpop.f32.mrf.mxu0 }
 0x27e   :  { %3238 = vst [vmem:[#allocation19_spill] sm:$0xff] %v2636_v41  ;;  %v1220_v3 = vmul.f32 %v2432_v56, %v905_v55  ;;  %v1222_v26 = vmul.f32 %v2435_v58, %v978_v13  ;;  %v980_v32 = vadd.f32 %v2563_v15, %v2446_v1  ;;  %v1502_v7 = vsel %vm1374_vm14, %v1310_v6, %v1438_v22  ;;  %v2651_v55 = vpop.f32.mrf.mxu1 }
 0x27f   :  { %v1504_v47 = vsel %vm1376_vm0, %v1312_v46, %v1440_v9  ;;  %v1505_v59 = vsel %vm1377_vm1, %v1313_v0, %v1441_v42  ;;  %vm1384_vm3 = vcmp.gt.f32.partialorder %v1320_v21, 0.0  ;;  %v1510_v41 = vsel %vm1382_vm2, %v1318_v54, %v1446_v39 }
 0x280   :  { %v1447_v48 = vmul.f32 0.2, %v1319_v23  ;;  %v1449_v20 = vmul.f32 0.2, %v1321_v43  ;;  %v1221_v24 = vmul.f32 %v2451_v4, %v907_v37  ;;  %v1609_v13 = vmul.f32 %v2470_v18, %v1503_v50 }
 0x281   :  { %vm1383_vm4 = vcmp.gt.f32.partialorder %v1319_v23, 0.0  ;;  %vm1385_vm5 = vcmp.gt.f32.partialorder %v1321_v43, 0.0  ;;  %v911_v15 = vadd.f32 %v2569_v52, %v2417_v49  ;;  %v1512_v6 = vsel %vm1384_vm3, %v1320_v21, %v1448_v57  ;;  %v2670_v57 = vpop.f32.mrf.mxu0 }
 0x282   :  { %v1326_v46 = vadd.f32 %v2438_v60, %v1220_v3  ;;  %v1328_v0 = vadd.f32 %v2448_v2, %v1222_v26  ;;  %v1223_v54 = vmul.f32 %v2456_v61, %v980_v32  ;;  %v1608_v22 = vmul.f32 %v2463_v12, %v1502_v7  ;;  %v2672_v3 = vpop.f32.mrf.mxu1 }
 0x283   :  { %v2661_v9 = vmul.f32 %v2467_v17, %v1504_v47  ;;  %v2664_v42 = vmul.f32 %v2477_v25, %v1505_v59  ;;  %v1616_v50 = vmul.f32 %v2463_v12, %v1510_v41  ;;  %v1511_v39 = vsel %vm1383_vm4, %v1319_v23, %v1447_v48 }
 0x284   :  { %v1513_v37 = vsel %vm1385_vm5, %v1321_v43, %v1449_v20  ;;  %v1327_v52 = vadd.f32 %v2453_v5, %v1221_v24  ;;  %v984_v21 = vadd.f32 %v2571_v14, %v2424_v51  ;;  %v2674_v7 = vadd.f32 %v1609_v13, %v1608_v22 }
 0x285   :  { %3239 = vst [vmem:[#allocation20_spill] sm:$0xff] %v2661_v9  ;;  %3240 = vst [vmem:[#allocation21_spill] sm:$0xff] %v2664_v42  ;;  %v2677_v47 = vmul.f32 %v2467_v17, %v1512_v6  ;;  %v1228_v26 = vmul.f32 %v2432_v56, %v911_v15  ;;  %v913_v23 = vadd.f32 %v2578_v19, %v2429_v53  ;;  %v1454_v43 = vmul.f32 0.2, %v1326_v46  ;;  %v2693_v15 = vpop.f32.mrf.mxu0  ;;  %v2695_v6 = vpop.f32.mrf.mxu1 }
 0x286   :  { %3241 = vst [vmem:[#allocation22_spill] sm:$0xff] %v2674_v7  ;;  %v1456_v41 = vmul.f32 0.2, %v1328_v0  ;;  %v1329_v32 = vadd.f32 %v2459_v8, %v1223_v54  ;;  %v986_v14 = vadd.f32 %v2580_v10, %v2446_v1  ;;  %v1617_v59 = vmul.f32 %v2470_v18, %v1511_v39 }
 0x287   :  { %3242 = vst [vmem:[#allocation23_spill] sm:$0xff] %v2677_v47  ;;  %v2687_v48 = vmul.f32 %v2477_v25, %v1513_v37  ;;  %vm1390_vm6 = vcmp.gt.f32.partialorder %v1326_v46, 0.0  ;;  %vm1392_vm7 = vcmp.gt.f32.partialorder %v1328_v0, 0.0  ;;  %v1455_v20 = vmul.f32 0.2, %v1327_v52 }
 0x288   :  { %v1230_v24 = vmul.f32 %v2435_v58, %v984_v21  ;;  %v1229_v13 = vmul.f32 %v2451_v4, %v913_v23  ;;  %v915_v19 = vadd.f32 %v2592_v38, %v2417_v49  ;;  %vm1391_vm8 = vcmp.gt.f32.partialorder %v1327_v52, 0.0 }
 0x289   :  { %3243 = vst [vmem:[#allocation24_spill] sm:$0xff] %v2687_v48  ;;  %v1334_v10 = vadd.f32 %v2438_v60, %v1228_v26  ;;  %v988_v54 = vadd.f32 %v2594_v33, %v2424_v51  ;;  %v917_v22 = vadd.f32 %v2618_v16, %v2429_v53  ;;  %v1518_v39 = vsel %vm1390_vm6, %v1326_v46, %v1454_v43  ;;  %v2710_v53 = vpop.f32.mrf.mxu0  ;;  %v2712_v33 = vpop.f32.mrf.mxu1 }
 0x28a   :  { %v1520_v37 = vsel %vm1392_vm7, %v1328_v0, %v1456_v41  ;;  %v1457_v21 = vmul.f32 0.2, %v1329_v32  ;;  %v1231_v23 = vmul.f32 %v2456_v61, %v986_v14  ;;  %v1335_v49 = vadd.f32 %v2453_v5, %v1229_v13 }
 0x28b   :  { %v1236_v38 = vmul.f32 %v2432_v56, %v915_v19  ;;  %v1238_v48 = vmul.f32 %v2435_v58, %v988_v54  ;;  %v1237_v47 = vmul.f32 %v2451_v4, %v917_v22  ;;  %v2707_v26 = vadd.f32 %v1617_v59, %v1616_v50 }
 0x28c   :  { %v1519_v42 = vsel %vm1391_vm8, %v1327_v52, %v1455_v20  ;;  %vm1393_vm9 = vcmp.gt.f32.partialorder %v1329_v32, 0.0  ;;  %v1336_v51 = vadd.f32 %v2448_v2, %v1230_v24  ;;  %v1624_v16 = vmul.f32 %v2463_v12, %v1518_v39 }
 0x28d   :  { %3244 = vst [vmem:[#allocation25_spill] sm:$0xff] %v2707_v26  ;;  %v1462_v46 = vmul.f32 0.2, %v1334_v10  ;;  %v1343_v0 = vadd.f32 %v2453_v5, %v1237_v47  ;;  %v990_v56 = vadd.f32 %v2620_v63, %v2446_v1  ;;  %v2719_v58 = vmul.f32 %v2467_v17, %v1520_v37  ;;  %v2727_v63 = vpop.f32.mrf.mxu0  ;;  %v2729_v47 = vpop.f32.mrf.mxu1 }
 0x28e   :  { %vm1398_vm10 = vcmp.gt.f32.partialorder %v1334_v10, 0.0  ;;  %v1337_v4 = vadd.f32 %v2459_v8, %v1231_v23  ;;  %v1342_v50 = vadd.f32 %v2438_v60, %v1236_v38  ;;  %v1625_v52 = vmul.f32 %v2470_v18, %v1519_v42 }
 0x28f   :  { %3245 = vst [vmem:[#allocation26_spill] sm:$0xff] %v2719_v58  ;;  %v1521_v43 = vsel %vm1393_vm9, %v1329_v32, %v1457_v21  ;;  %v1463_v41 = vmul.f32 0.2, %v1335_v49  ;;  %v1344_v14 = vadd.f32 %v2448_v2, %v1238_v48  ;;  %vm1400_vm11 = vcmp.gt.f32.partialorder %v1336_v51, 0.0  ;;  %v1113_v54 = vpop.f32.mrf.mxu1 }
 0x290   :  { %vm1399_vm12 = vcmp.gt.f32.partialorder %v1335_v49, 0.0  ;;  %v1471_v5 = vmul.f32 0.2, %v1343_v0  ;;  %v1027_v1 = vadd.f32 %v2631_v11, %v2479_v27  ;;  %v1526_v59 = vsel %vm1398_vm10, %v1334_v10, %v1462_v46 }
 0x291   :  { %v1464_v20 = vmul.f32 0.2, %v1336_v51  ;;  %vm1407_vm13 = vcmp.gt.f32.partialorder %v1343_v0, 0.0  ;;  %v1239_v60 = vmul.f32 %v2456_v61, %v990_v56  ;;  %vm1401_vm14 = vcmp.gt.f32.partialorder %v1337_v4, 0.0  ;;  %v1040_v61 = vpop.f32.mrf.mxu0 }
 0x292   :  { %v1465_v42 = vmul.f32 0.2, %v1337_v4  ;;  %v1470_v32 = vmul.f32 0.2, %v1342_v50  ;;  %v1100_v2 = vadd.f32 %v2633_v31, %v2484_v29  ;;  %v1527_v48 = vsel %vm1399_vm12, %v1335_v49, %v1463_v41 }
 0x293   :  { %vm1406_vm15 = vcmp.gt.f32.partialorder %v1342_v50, 0.0  ;;  %vm1408_vm0 = vcmp.gt.f32.partialorder %v1344_v14, 0.0  ;;  %v1472_v24 = vmul.f32 0.2, %v1344_v14  ;;  %v1535_v11 = vsel %vm1407_vm13, %v1343_v0, %v1471_v5 }
 0x294   :  { %v1184_v13 = vmul.f32 %v2482_v28, %v1027_v1  ;;  %v1029_v19 = vadd.f32 %v2649_v62, %v2492_v35  ;;  %v1031_v10 = vadd.f32 %v2670_v57, %v2479_v27  ;;  %v2739_v22 = vadd.f32 %v1625_v52, %v1624_v16 }
 0x295   :  { %v2742_v39 = vmul.f32 %v2477_v25, %v1521_v43  ;;  %v1632_v31 = vmul.f32 %v2463_v12, %v1526_v59  ;;  %v1345_v37 = vadd.f32 %v2459_v8, %v1239_v60  ;;  %v1528_v21 = vsel %vm1400_vm11, %v1336_v51, %v1464_v20  ;;  %v3253_v20 = vld [vmem:[#allocation3_spill] sm:$0xff] }
 0x296   :  { %3246 = vst [vmem:[#allocation27_spill] sm:$0xff] %v2739_v22  ;;  %v1529_v23 = vsel %vm1401_vm14, %v1337_v4, %v1465_v42  ;;  %v1534_v49 = vsel %vm1406_vm15, %v1342_v50, %v1470_v32  ;;  %v1186_v62 = vmul.f32 %v2487_v30, %v1100_v2  ;;  %v1633_v57 = vmul.f32 %v2470_v18, %v1527_v48  ;;  %v1042_v4 = vpop.f32.mrf.mxu0  ;;  %v1115_v50 = vpop.f32.mrf.mxu1  ;;  %v3254_v42 = vld [vmem:[#allocation4_spill] sm:$0xff] }
 0x297   :  { %3247 = vst [vmem:[#allocation28_spill] sm:$0xff] %v2742_v39  ;;  %v1536_v38 = vsel %vm1408_vm0, %v1344_v14, %v1472_v24  ;;  %v1641_v16 = vmul.f32 %v2470_v18, %v1535_v11  ;;  %v1192_v46 = vmul.f32 %v2482_v28, %v1031_v10  ;;  %v2754_v0 = vadd.f32 %v2490_v34, %v1184_v13  ;;  %v3263_v39 = vld [vmem:[#allocation12_spill] sm:$0xff] }
 0x298   :  { %v1185_v8 = vmul.f32 %v2505_v45, %v1029_v19  ;;  %v1102_v51 = vadd.f32 %v2651_v55, %v2494_v36  ;;  %v1104_v56 = vadd.f32 %v2672_v3, %v2484_v29  ;;  %v2762_v52 = vmul.f32 %v2467_v17, %v1528_v21  ;;  %v1046_v2 = vpop.f32.mrf.mxu0  ;;  %v1119_v48 = vpop.f32.mrf.mxu1 }
 0x299   :  { %v1640_v18 = vmul.f32 %v2463_v12, %v1534_v49  ;;  %v1473_v43 = vmul.f32 0.2, %v1345_v37  ;;  %v1033_v41 = vadd.f32 %v2693_v15, %v2492_v35  ;;  %vm1409_vm1 = vcmp.gt.f32.partialorder %v1345_v37, 0.0 }
 0x29a   :  { %3248 = vst [vmem:[#allocation29_spill] sm:$0xff] %v2762_v52  ;;  %v2768_v14 = vadd.f32 %v2499_v40, %v1186_v62  ;;  %v1298_v55 = vadd.f32 %v2490_v34, %v1192_v46  ;;  %v1106_v3 = vadd.f32 %v2695_v6, %v2494_v36  ;;  %v2773_v5 = vadd.f32 %v1633_v57, %v1632_v31  ;;  %v3256_v62 = vld [vmem:[#allocation5_spill] sm:$0xff]  ;;  %v3262_v52 = vld [vmem:[#allocation10_spill] sm:$0xff] }
 0x29b   :  { %v2776_v1 = vmul.f32 %v2477_v25, %v1529_v23  ;;  %v2779_v12 = vmul.f32 %v2467_v17, %v1536_v38  ;;  %v2781_v59 = vadd.f32 %v1641_v16, %v1640_v18  ;;  %v2784_v15 = vmul.f32 0.2, %v2754_v0  ;;  %v1121_v16 = vpop.f32.mrf.mxu1 }
 0x29c   :  { %3249 = vst [vmem:[#allocation30_spill] sm:$0xff] %v2773_v5  ;;  %v2787_v60 = vadd.f32 %v3253_v20, %v1185_v8  ;;  %v1187_v32 = vmul.f32 %v3254_v42, %v1102_v51  ;;  %v1194_v6 = vmul.f32 %v2487_v30, %v1104_v56  ;;  %v1537_v24 = vsel %vm1409_vm1, %v1345_v37, %v1473_v43 }
 0x29d   :  { %3250 = vst [vmem:[#allocation31_spill] sm:$0xff] %v2776_v1  ;;  %3251 = vst [vmem:[#allocation32_spill] sm:$0xff] %v2779_v12  ;;  %v1193_v11 = vmul.f32 %v2505_v45, %v1033_v41  ;;  %v1037_v17 = vadd.f32 %v2710_v53, %v2479_v27  ;;  %v1110_v13 = vadd.f32 %v2712_v33, %v2484_v29  ;;  %v2797_v19 = vmul.f32 0.2, %v2768_v14 }
 0x29e   :  { %3252 = vst [vmem:[#allocation33_spill] sm:$0xff] %v2781_v59  ;;  %v1426_v10 = vmul.f32 0.2, %v1298_v55  ;;  %v1195_v31 = vmul.f32 %v3254_v42, %v1106_v3  ;;  %v1039_v21 = vadd.f32 %v2727_v63, %v2492_v35  ;;  %vm1362_vm2 = vcmp.gt.f32.partialorder %v1298_v55, 0.0  ;;  %v1048_v63 = vpop.f32.mrf.mxu0 }
 0x29f   :  { %v1041_v37 = vadd.f32 %v1040_v61, %v2479_v27  ;;  %v1114_v23 = vadd.f32 %v1113_v54, %v2484_v29  ;;  %v1043_v49 = vadd.f32 %v1042_v4, %v2492_v35  ;;  %v2806_v53 = vmul.f32 %v2477_v25, %v1537_v24 }
 0x2a0   :  { %v2809_v33 = vmul.f32 0.2, %v2787_v60  ;;  %v2812_v57 = vadd.f32 %v3256_v62, %v1187_v32  ;;  %v2815_v38 = vadd.f32 %v2499_v40, %v1194_v6  ;;  %v2818_v61 = vadd.f32 %v3253_v20, %v1193_v11  ;;  %v1050_v11 = vpop.f32.mrf.mxu0 }
 0x2a1   :  { %3255 = vst [vmem:[#allocation3_spill] sm:$0xff] %v2806_v53  ;;  %v1200_v54 = vmul.f32 %v2482_v28, %v1037_v17  ;;  %v1202_v46 = vmul.f32 %v2487_v30, %v1110_v13  ;;  %v1208_v8 = vmul.f32 %v2482_v28, %v1041_v37  ;;  %v2823_v51 = vsel %vm1362_vm2, %v1298_v55, %v1426_v10  ;;  %v1123_v17 = vpop.f32.mrf.mxu1 }
 0x2a2   :  { %v2826_v56 = vadd.f32 %v3256_v62, %v1195_v31  ;;  %v1201_v4 = vmul.f32 %v2505_v45, %v1039_v21  ;;  %v1047_v18 = vadd.f32 %v1046_v2, %v2479_v27  ;;  %vm1354_vm3 = vcmp.gt.f32.partialorder %v2754_v0, 0.0 }
 0x2a3   :  { %v1112_v43 = vadd.f32 %v2729_v47, %v2494_v36  ;;  %v1210_v41 = vmul.f32 %v2487_v30, %v1114_v23  ;;  %v1209_v3 = vmul.f32 %v2505_v45, %v1043_v49  ;;  %v1116_v32 = vadd.f32 %v1115_v50, %v2494_v36 }
 0x2a4   :  { %vm1355_vm4 = vcmp.gt.f32.partialorder %v2787_v60, 0.0  ;;  %v1314_v55 = vadd.f32 %v2490_v34, %v1208_v8  ;;  %v1216_v6 = vmul.f32 %v2482_v28, %v1047_v18  ;;  %v1120_v24 = vadd.f32 %v1119_v48, %v2484_v29 }
 0x2a5   :  { %v1049_v2 = vadd.f32 %v1048_v63, %v2492_v35  ;;  %v2842_v47 = vmul.f32 0.2, %v2815_v38  ;;  %v2845_v13 = vmul.f32 0.2, %v2818_v61  ;;  %v2848_v50 = vadd.f32 %v2490_v34, %v1200_v54 }
 0x2a6   :  { %v2851_v10 = vadd.f32 %v2499_v40, %v1202_v46  ;;  %v2854_v31 = vadd.f32 %v3253_v20, %v1201_v4  ;;  %v1322_v48 = vadd.f32 %v2490_v34, %v1216_v6  ;;  %v1218_v21 = vmul.f32 %v2487_v30, %v1120_v24  ;;  %v1052_v24 = vpop.f32.mrf.mxu0 }
 0x2a7   :  { %v1217_v37 = vmul.f32 %v2505_v45, %v1049_v2  ;;  %v1203_v23 = vmul.f32 %v3254_v42, %v1112_v43  ;;  %v1211_v49 = vmul.f32 %v3254_v42, %v1116_v32  ;;  %v1051_v63 = vadd.f32 %v1050_v11, %v2479_v27  ;;  %v1125_v2 = vpop.f32.mrf.mxu1 }
 0x2a8   :  { %v1124_v54 = vadd.f32 %v1123_v17, %v2484_v29  ;;  %v1442_v8 = vmul.f32 0.2, %v1314_v55  ;;  %v2864_v46 = vadd.f32 %v2499_v40, %v1210_v41  ;;  %v2867_v4 = vadd.f32 %v3253_v20, %v1209_v3 }
 0x2a9   :  { %v1122_v18 = vadd.f32 %v1121_v16, %v2494_v36  ;;  %v2871_v6 = vmul.f32 0.2, %v2848_v50  ;;  %vm1378_vm5 = vcmp.gt.f32.partialorder %v1314_v55, 0.0  ;;  %v1450_v43 = vmul.f32 0.2, %v1322_v48 }
 0x2aa   :  { %v2874_v32 = vadd.f32 %v2499_v40, %v1218_v21  ;;  %v2877_v11 = vmul.f32 0.2, %v2851_v10  ;;  %vm1386_vm6 = vcmp.gt.f32.partialorder %v1322_v48, 0.0  ;;  %v2880_v41 = vadd.f32 %v3253_v20, %v1217_v37 }
 0x2ab   :  { %v1224_v3 = vmul.f32 %v2482_v28, %v1051_v63  ;;  %vm1363_vm7 = vcmp.gt.f32.partialorder %v2818_v61, 0.0  ;;  %v2885_v16 = vmul.f32 0.2, %v2854_v31  ;;  %v2888_v17 = vadd.f32 %v3256_v62, %v1203_v23 }
 0x2ac   :  { %3257 = vst [vmem:[#allocation4_spill] sm:$0xff] %v2874_v32  ;;  %v2891_v21 = vadd.f32 %v3256_v62, %v1211_v49  ;;  %v1226_v53 = vmul.f32 %v2487_v30, %v1124_v54  ;;  %v2894_v59 = vsel %vm1378_vm5, %v1314_v55, %v1442_v8  ;;  %v2897_v37 = vmul.f32 0.2, %v2864_v46  ;;  %v1056_v54 = vpop.f32.mrf.mxu0  ;;  %v1129_v55 = vpop.f32.mrf.mxu1 }
 0x2ad   :  { %v2900_v63 = vmul.f32 0.2, %v2867_v4  ;;  %v1219_v12 = vmul.f32 %v3254_v42, %v1122_v18  ;;  %v2903_v1 = vsel %vm1386_vm6, %v1322_v48, %v1450_v43  ;;  %v2906_v23 = vmul.f32 0.2, %v2874_v32 }
 0x2ae   :  { %3258 = vst [vmem:[#allocation5_spill] sm:$0xff] %v2903_v1  ;;  %vm1356_vm8 = vcmp.gt.f32.partialorder %v2768_v14, 0.0  ;;  %v1421_v49 = vmul.f32 0.2, %v2812_v57  ;;  %v2911_v8 = vmul.f32 0.2, %v2880_v41  ;;  %v2914_v5 = vadd.f32 %v2490_v34, %v1224_v3 }
 0x2af   :  { %3259 = vst [vmem:[#allocation34_spill] sm:$0xff] %v2906_v23  ;;  %vm1357_vm9 = vcmp.gt.f32.partialorder %v2812_v57, 0.0  ;;  %v1482_v48 = vsel %vm1354_vm3, %v2754_v0, %v2784_v15  ;;  %v2922_v18 = vadd.f32 %v2499_v40, %v1226_v53  ;;  %v1483_v43 = vsel %vm1355_vm4, %v2787_v60, %v2809_v33  ;;  %v3264_v23 = vld [vmem:[#allocation13_spill] sm:$0xff]  ;;  %v3265_v1 = vld [vmem:[#allocation6_spill] sm:$0xff]  ;;  %v3266_v60 = vld [vmem:[#allocation11_spill] sm:$0xff] }
 0x2b0   :  { %3260 = vst [vmem:[#allocation35_spill] sm:$0xff] %v2911_v8  ;;  %v1648_v22 = vadd.f32 %v3263_v39, %v3262_v52  ;;  %v1053_v3 = vadd.f32 %v1052_v24, %v2492_v35  ;;  %v1484_v58 = vsel %vm1356_vm8, %v2768_v14, %v2797_v19  ;;  %v1587_v26 = vmul.f32 %v2477_v25, %v3264_v23  ;;  %v1058_v52 = vpop.f32.mrf.mxu0  ;;  %v1131_v24 = vpop.f32.mrf.mxu1 }
 0x2b1   :  { %3261 = vst [vmem:[#allocation36_spill] sm:$0xff] %v2922_v18  ;;  %v1057_v0 = vadd.f32 %v1056_v54, %v2479_v27  ;;  %v1130_v15 = vadd.f32 %v1129_v55, %v2484_v29  ;;  %v1485_v53 = vsel %vm1357_vm9, %v2812_v57, %v1421_v49  ;;  %v1588_v8 = vmul.f32 %v3265_v1, %v1482_v48  ;;  %v3268_v57 = vld [vmem:[#allocation8_spill] sm:$0xff] }
 0x2b2   :  { %v1649_v33 = vadd.f32 %v1648_v22, %v3266_v60  ;;  %v1126_v39 = vadd.f32 %v1125_v2, %v2494_v36  ;;  %v2942_v32 = vadd.f32 %v3256_v62, %v1219_v12  ;;  %vm1394_vm10 = vcmp.gt.f32.partialorder %v2914_v5, 0.0  ;;  %v3270_v2 = vld [vmem:[#allocation7_spill] sm:$0xff]  ;;  %v3271_v12 = vld [vmem:[#allocation9_spill] sm:$0xff] }
 0x2b3   :  { %v1225_v14 = vmul.f32 %v2505_v45, %v1053_v3  ;;  %v1232_v19 = vmul.f32 %v2482_v28, %v1057_v0  ;;  %v1458_v23 = vmul.f32 0.2, %v2914_v5  ;;  %v1589_v49 = vmul.f32 %v3268_v57, %v1483_v43  ;;  %v1060_v43 = vpop.f32.mrf.mxu0 }
 0x2b4   :  { %3267 = vst [vmem:[#allocation10_spill] sm:$0xff] %v2942_v32  ;;  %v1650_v54 = vadd.f32 %v1649_v33, %v1587_v26  ;;  %vm1364_vm11 = vcmp.gt.f32.partialorder %v2815_v38, 0.0  ;;  %v2951_v22 = vmul.f32 0.2, %v2922_v18  ;;  %v1590_v55 = vmul.f32 %v3270_v2, %v1484_v58  ;;  %v1133_v33 = vpop.f32.mrf.mxu1  ;;  %v3273_v18 = vld [vmem:[#allocation15_spill] sm:$0xff] }
 0x2b5   :  { %v1591_v48 = vmul.f32 %v3271_v12, %v1485_v53  ;;  %v1234_v60 = vmul.f32 %v2487_v30, %v1130_v15  ;;  %vm1370_vm12 = vcmp.gt.f32.partialorder %v2848_v50, 0.0  ;;  %vm1371_vm13 = vcmp.gt.f32.partialorder %v2854_v31, 0.0 }
 0x2b6   :  { %3269 = vst [vmem:[#allocation12_spill] sm:$0xff] %v2951_v22  ;;  %v1651_v3 = vadd.f32 %v1650_v54, %v1588_v8  ;;  %v1227_v0 = vmul.f32 %v3254_v42, %v1126_v39  ;;  %vm1365_vm14 = vcmp.gt.f32.partialorder %v2826_v56, 0.0  ;;  %v1429_v26 = vmul.f32 0.2, %v2826_v56  ;;  %v3272_v54 = vld [vmem:[#allocation14_spill] sm:$0xff] }
 0x2b7   :  { %v2962_v22 = vadd.f32 %v3253_v20, %v1225_v14  ;;  %v1338_v58 = vadd.f32 %v2490_v34, %v1232_v19  ;;  %v1491_v15 = vsel %vm1363_vm7, %v2818_v61, %v2845_v13  ;;  %v1492_v8 = vsel %vm1364_vm11, %v2815_v38, %v2842_v47  ;;  %v3274_v47 = vld [vmem:[#allocation16_spill] sm:$0xff] }
 0x2b8   :  { %v1652_v53 = vadd.f32 %v1651_v3, %v1589_v49  ;;  %v1596_v39 = vmul.f32 %v3265_v1, %v2823_v51  ;;  %v1658_v14 = vadd.f32 %v3273_v18, %v3272_v54  ;;  %v1059_v32 = vadd.f32 %v1058_v52, %v2492_v35  ;;  %v3276_v54 = vld [vmem:[#allocation19_spill] sm:$0xff] }
 0x2b9   :  { %v2979_v19 = vadd.f32 %v2499_v40, %v1234_v60  ;;  %v1132_v7 = vadd.f32 %v1131_v24, %v2494_v36  ;;  %v1061_v61 = vadd.f32 %v1060_v43, %v2479_v27  ;;  %v1134_v13 = vadd.f32 %v1133_v33, %v2484_v29 }
 0x2ba   :  { %v1653_v9 = vadd.f32 %v1652_v53, %v1590_v55  ;;  %v1597_v38 = vmul.f32 %v3268_v57, %v1491_v15  ;;  %v1659_v49 = vadd.f32 %v1658_v14, %v3274_v47  ;;  %v1233_v51 = vmul.f32 %v2505_v45, %v1059_v32 }
 0x2bb   :  { %vm1379_vm15 = vcmp.gt.f32.partialorder %v2867_v4, 0.0  ;;  %vm1402_vm0 = vcmp.gt.f32.partialorder %v1338_v58, 0.0  ;;  %v1466_v18 = vmul.f32 0.2, %v1338_v58  ;;  %v1493_v52 = vsel %vm1365_vm14, %v2826_v56, %v1429_v26 }
 0x2bc   :  { %v1240_v24 = vmul.f32 %v2482_v28, %v1061_v61  ;;  %v1654_v27 = vadd.f32 %v1653_v9, %v1591_v48  ;;  %v1660_v60 = vadd.f32 %v1659_v49, %v1596_v39  ;;  %v1235_v29 = vmul.f32 %v3254_v42, %v1132_v7  ;;  %v1135_v48 = vpop.f32.mrf.mxu1  ;;  %v3275_v39 = vld [vmem:[#allocation17_spill] sm:$0xff] }
 0x2bd   :  { %v1242_v55 = vmul.f32 %v2487_v30, %v1134_v13  ;;  %v2997_v32 = vsel %vm1394_vm10, %v2914_v5, %v1458_v23  ;;  %v3000_v3 = vadd.f32 %v3256_v62, %v1227_v0  ;;  %v3003_v43 = vadd.f32 %v3253_v20, %v1233_v51 }
 0x2be   :  { %v1346_v56 = vadd.f32 %v2490_v34, %v1240_v24  ;;  %1655 = vadd.xlane.f32.xlu0 %v1654_v27  ;;  %v3007_v28 = vmul.f32 0.2, %v2962_v22  ;;  %v3010_v9 = vmul.f32 0.2, %v2979_v19  ;;  %v1598_v30 = vmul.f32 %v3270_v2, %v1492_v8  ;;  %v1062_v34 = vpop.f32.mrf.mxu0  ;;  %v3278_v24 = vld [vmem:[#allocation20_spill] sm:$0xff] }
 0x2bf   :  { %v1661_v7 = vadd.f32 %v1660_v60, %v1597_v38  ;;  %vm1387_vm1 = vcmp.gt.f32.partialorder %v2880_v41, 0.0  ;;  %v3015_v5 = vsel %vm1402_vm0, %v1338_v58, %v1466_v18  ;;  %v1599_v23 = vmul.f32 %v3271_v12, %v1493_v52 }
 0x2c0   :  { %vm1372_vm2 = vcmp.gt.f32.partialorder %v2851_v10, 0.0  ;;  %vm1373_vm3 = vcmp.gt.f32.partialorder %v2888_v17, 0.0  ;;  %v3021_v26 = vadd.f32 %v3256_v62, %v1235_v29  ;;  %v3024_v33 = vadd.f32 %v2499_v40, %v1242_v55  ;;  %v3280_v55 = vld [vmem:[#allocation21_spill] sm:$0xff] }
 0x2c1   :  { %v1662_v0 = vadd.f32 %v1661_v7, %v1598_v30  ;;  %v1437_v15 = vmul.f32 0.2, %v2888_v17  ;;  %v3028_v58 = vmul.f32 0.2, %v3003_v43  ;;  %vm1410_vm4 = vcmp.gt.f32.partialorder %v1346_v56, 0.0 }
 0x2c2   :  { %v1498_v8 = vsel %vm1370_vm12, %v2848_v50, %v2871_v6  ;;  %v1499_v53 = vsel %vm1371_vm13, %v2854_v31, %v2885_v16  ;;  %vm1395_vm5 = vcmp.gt.f32.partialorder %v2962_v22, 0.0  ;;  %v1666_v14 = vadd.f32 %v3276_v54, %v3275_v39  ;;  %v3277_v6 = vld [vmem:[#allocation18_spill] sm:$0xff] }
 0x2c3   :  { %v1663_v40 = vadd.f32 %v1662_v0, %v1599_v23  ;;  %v1063_v61 = vadd.f32 %v1062_v34, %v2492_v35  ;;  %v1136_v13 = vadd.f32 %v1135_v48, %v2494_v36  ;;  %v1474_v38 = vmul.f32 0.2, %v1346_v56  ;;  %v3282_v23 = vld [vmem:[#allocation35_spill] sm:$0xff]  ;;  %v3283_v48 = vld [vmem:[#allocation10_spill] sm:$0xff] }
 0x2c4   :  { %v1603_v47 = vmul.f32 %v2477_v25, %v2639_v44  ;;  %vm1380_vm6 = vcmp.gt.f32.partialorder %v2864_v46, 0.0  ;;  %v1445_v50 = vmul.f32 0.2, %v2891_v21  ;;  %v1604_v31 = vmul.f32 %v3265_v1, %v1498_v8 }
 0x2c5   :  { %1664 = vadd.xlane.f32.xlu0 %v1663_v40  ;;  %v1667_v16 = vadd.f32 %v1666_v14, %v3277_v6  ;;  %v1241_v49 = vmul.f32 %v2505_v45, %v1063_v61  ;;  %vm1381_vm7 = vcmp.gt.f32.partialorder %v2891_v21, 0.0  ;;  %v3052_v35 = vmul.f32 0.2, %v3024_v33  ;;  %v3286_v40 = vld [vmem:[#allocation25_spill] sm:$0xff] }
 0x2c6   :  { %v1500_v25 = vsel %vm1372_vm2, %v2851_v10, %v2877_v11  ;;  %v1501_v36 = vsel %vm1373_vm3, %v2888_v17, %v1437_v15  ;;  %v1605_v44 = vmul.f32 %v3268_v57, %v1499_v53  ;;  %v1243_v18 = vmul.f32 %v3254_v42, %v1136_v13  ;;  %v3279_v42 = vld [vmem:[#allocation22_spill] sm:$0xff]  ;;  %v3284_v15 = vld [vmem:[#allocation5_spill] sm:$0xff]  ;;  %v3285_v53 = vld [vmem:[#allocation23_spill] sm:$0xff] }
 0x2c7   :  { %v1668_v51 = vadd.f32 %v1667_v16, %v1603_v47  ;;  %v1507_v45 = vsel %vm1379_vm15, %v2867_v4, %v2900_v63  ;;  %v1508_v52 = vsel %vm1380_vm6, %v2864_v46, %v2897_v37  ;;  %vm1403_vm8 = vcmp.gt.f32.partialorder %v3003_v43, 0.0  ;;  %v3290_v16 = vld [vmem:[#allocation26_spill] sm:$0xff] }
 0x2c8   :  { %v3071_v10 = vsel %vm1410_vm4, %v1346_v56, %v1474_v38  ;;  %v1509_v11 = vsel %vm1381_vm7, %v2891_v21, %v1445_v50  ;;  %v1612_v17 = vmul.f32 %v3265_v1, %v2894_v59  ;;  %v1676_v27 = vadd.f32 %v3279_v42, %v3278_v24  ;;  %v3281_v21 = vld [vmem:[#allocation4_spill] sm:$0xff] }
 0x2c9   :  { %v1606_v60 = vmul.f32 %v3270_v2, %v1500_v25  ;;  %v1607_v4 = vmul.f32 %v3271_v12, %v1501_v36  ;;  %v1669_v63 = vadd.f32 %v1668_v51, %v1604_v31  ;;  %v1347_v46 = vadd.f32 %v3253_v20, %v1241_v49  ;;  %v3289_v31 = vld [vmem:[#allocation36_spill] sm:$0xff]  ;;  %v3291_v49 = vld [vmem:[#allocation27_spill] sm:$0xff] }
 0x2ca   :  { %v1613_v37 = vmul.f32 %v3268_v57, %v1507_v45  ;;  %v1614_v29 = vmul.f32 %v3270_v2, %v1508_v52  ;;  %v1677_v56 = vadd.f32 %v1676_v27, %v3280_v55  ;;  %vm1388_vm9 = vcmp.gt.f32.partialorder %v3281_v21, 0.0  ;;  %v3293_v24 = vld [vmem:[#allocation12_spill] sm:$0xff]  ;;  %v3294_v55 = vld [vmem:[#allocation29_spill] sm:$0xff] }
 0x2cb   :  { %v1670_v30 = vadd.f32 %v1669_v63, %v1605_v44  ;;  %v3086_v59 = vadd.f32 %v3256_v62, %v1243_v18  ;;  %v1615_v7 = vmul.f32 %v3271_v12, %v1509_v11  ;;  %v1515_v34 = vsel %vm1387_vm1, %v2880_v41, %v3282_v23  ;;  %v3287_v62 = vld [vmem:[#allocation34_spill] sm:$0xff]  ;;  %v3288_v41 = vld [vmem:[#allocation24_spill] sm:$0xff] }
 0x2cc   :  { %v1678_v20 = vadd.f32 %v1677_v56, %v1612_v17  ;;  %v1453_v0 = vmul.f32 0.2, %v3283_v48  ;;  %v1620_v8 = vmul.f32 %v3265_v1, %v3284_v15  ;;  %v1685_v39 = vadd.f32 %v3286_v40, %v3285_v53  ;;  %v3295_v56 = vld [vmem:[#allocation30_spill] sm:$0xff]  ;;  %v3297_v53 = vld [vmem:[#allocation32_spill] sm:$0xff]  ;;  %v3298_v40 = vld [vmem:[#allocation33_spill] sm:$0xff] }
 0x2cd   :  { %v1671_v54 = vadd.f32 %v1670_v30, %v1606_v60  ;;  %vm1411_vm10 = vcmp.gt.f32.partialorder %v1347_v46, 0.0  ;;  %vm1389_vm11 = vcmp.gt.f32.partialorder %v3283_v48, 0.0  ;;  %v1516_v14 = vsel %vm1388_vm9, %v3281_v21, %v3287_v62 }
 0x2ce   :  { %v1679_v61 = vadd.f32 %v1678_v20, %v1613_v37  ;;  %v1621_v13 = vmul.f32 %v3268_v57, %v1515_v34  ;;  %v1686_v38 = vadd.f32 %v1685_v39, %v3288_v41  ;;  %v1523_v47 = vsel %vm1395_vm5, %v2962_v22, %v3007_v28  ;;  %v3292_v28 = vld [vmem:[#allocation28_spill] sm:$0xff] }
 0x2cf   :  { %v1672_v50 = vadd.f32 %v1671_v54, %v1607_v4  ;;  %vm1396_vm12 = vcmp.gt.f32.partialorder %v3289_v31, 0.0  ;;  %v1628_v6 = vmul.f32 %v3265_v1, %v2997_v32  ;;  %v1694_v25 = vadd.f32 %v3291_v49, %v3290_v16 }
 0x2d0   :  { %v1680_v36 = vadd.f32 %v1679_v61, %v1614_v29  ;;  %v1517_v44 = vsel %vm1389_vm11, %v3283_v48, %v1453_v0  ;;  %v1687_v51 = vadd.f32 %v1686_v38, %v1620_v8  ;;  %v1461_v18 = vmul.f32 0.2, %v3000_v3 }
 0x2d1   :  { %1673 = vadd.xlane.f32.xlu1 %v1672_v50  ;;  %v1475_v45 = vmul.f32 0.2, %v1347_v46  ;;  %vm1397_vm13 = vcmp.gt.f32.partialorder %v3000_v3, 0.0  ;;  %v1629_v22 = vmul.f32 %v3268_v57, %v1523_v47  ;;  %v1695_v52 = vadd.f32 %v1694_v25, %v3292_v28 }
 0x2d2   :  { %v1681_v11 = vadd.f32 %v1680_v36, %v1615_v7  ;;  %v1622_v32 = vmul.f32 %v3270_v2, %v1516_v14  ;;  %v1688_v17 = vadd.f32 %v1687_v51, %v1621_v13  ;;  %v1524_v42 = vsel %vm1396_vm12, %v3289_v31, %v3293_v24 }
 0x2d3   :  { %v1623_v27 = vmul.f32 %v3271_v12, %v1517_v44  ;;  %v1696_v60 = vadd.f32 %v1695_v52, %v1628_v6  ;;  %vm1404_vm14 = vcmp.gt.f32.partialorder %v2979_v19, 0.0  ;;  %v1531_v4 = vsel %vm1403_vm8, %v3003_v43, %v3028_v58  ;;  %v3296_v58 = vld [vmem:[#allocation31_spill] sm:$0xff] }
 0x2d4   :  { %v1689_v63 = vadd.f32 %v1688_v17, %v1622_v32  ;;  %v1525_v37 = vsel %vm1397_vm13, %v3000_v3, %v1461_v18  ;;  %v1636_v29 = vmul.f32 %v3265_v1, %v3015_v5  ;;  %v1703_v21 = vadd.f32 %v3295_v56, %v3294_v55 }
 0x2d5   :  { %1682 = vadd.xlane.f32.xlu1 %v1681_v11  ;;  %v1630_v30 = vmul.f32 %v3270_v2, %v1524_v42  ;;  %v1697_v7 = vadd.f32 %v1696_v60, %v1629_v22  ;;  %vm1405_vm15 = vcmp.gt.f32.partialorder %v3021_v26, 0.0  ;;  %v1469_v23 = vmul.f32 0.2, %v3021_v26 }
 0x2d6   :  { %v1690_v34 = vadd.f32 %v1689_v63, %v1623_v27  ;;  %v1532_v43 = vsel %vm1404_vm14, %v2979_v19, %v3010_v9  ;;  %v1637_v3 = vmul.f32 %v3268_v57, %v1531_v4  ;;  %v1704_v20 = vadd.f32 %v1703_v21, %v3296_v58 }
 0x2d7   :  { %v1631_v5 = vmul.f32 %v3271_v12, %v1525_v37  ;;  %v1698_v48 = vadd.f32 %v1697_v7, %v1630_v30  ;;  %vm1412_vm0 = vcmp.gt.f32.partialorder %v3024_v33, 0.0  ;;  %v1539_v0 = vsel %vm1411_vm10, %v1347_v46, %v1475_v45 }
 0x2d8   :  { %1691 = vadd.xlane.f32.xlu0 %v1690_v34  ;;  %v1705_v15 = vadd.f32 %v1704_v20, %v1636_v29  ;;  %v1644_v8 = vmul.f32 %v3265_v1, %v3071_v10  ;;  %v1712_v39 = vadd.f32 %v3298_v40, %v3297_v53  ;;  %v18_v19 = vstv %s3208_s12  ;;  %v3299_v10 = vld [vmem:[#allocation3_spill] sm:$0xff] }
 0x2d9   :  { %v1699_v9 = vadd.f32 %v1698_v48, %v1631_v5  ;;  %v1533_v54 = vsel %vm1405_vm15, %v3021_v26, %v1469_v23  ;;  %v1638_v62 = vmul.f32 %v3270_v2, %v1532_v43  ;;  %v1477_v46 = vmul.f32 0.2, %v3086_v59  ;;  %19 = vst [vmem:[#allocation2] sm:$0x1] %v18_v19 }
 0x2da   :  { %v1706_v14 = vadd.f32 %v1705_v15, %v1637_v3  ;;  %vm1413_vm1 = vcmp.gt.f32.partialorder %v3086_v59, 0.0  ;;  %v1645_v1 = vmul.f32 %v3268_v57, %v1539_v0  ;;  %v1713_v61 = vadd.f32 %v1712_v39, %v3299_v10 }
 0x2db   :  { %1700 = vadd.xlane.f32.xlu1 %v1699_v9  ;;  %v1540_v13 = vsel %vm1412_vm0, %v3024_v33, %v3052_v35  ;;  %v1639_v26 = vmul.f32 %v3271_v12, %v1533_v54  ;;  %v1541_v47 = vsel %vm1413_vm1, %v3086_v59, %v1477_v46  ;;  %vm1783_vm2 = vcmask 7168  }
 0x2dc   :  { %v1707_v41 = vadd.f32 %v1706_v14, %v1638_v62  ;;  %v1714_v38 = vadd.f32 %v1713_v61, %v1644_v8  ;;  %v1646_v31 = vmul.f32 %v3270_v2, %v1540_v13  ;;  %v1647_v57 = vmul.f32 %v3271_v12, %v1541_v47 }
 0x2de   :  { %v1708_v50 = vadd.f32 %v1707_v41, %v1639_v26  ;;  %v1715_v6 = vadd.f32 %v1714_v38, %v1645_v1 }
 0x2e0   :  { %1709 = vadd.xlane.f32.xlu0 %v1708_v50  ;;  %v1716_v16 = vadd.f32 %v1715_v6, %v1646_v31  ;;  %v1880_v25 = vld [vmem:[#allocation2] ss:$0 sm:$0xff] }
 0x2e2   :  { %v1717_v49 = vadd.f32 %v1716_v16, %v1647_v57 }
 0x2e4   :  { %1718 = vadd.xlane.f32.xlu1 %v1717_v49 }
 0x347   :  { %v1656_v36 = vpop.xlane.xlu0 %1655 }
 0x348   :  { %v1727_v44 = vadd.f32 %v1880_v25, %v1656_v36 }
 0x34a   :  { %v1881_v33 = vmul.f32 -1.442695, %v1727_v44 }
 0x34c   :  { %1957 = vpow2.f32 %v1881_v33 }
 0x34e   :  { %v1665_v35 = vpop.xlane.xlu0 %1664 }
 0x34f   :  { %v1728_v51 = vadd.f32 %v1880_v25, %v1665_v35 }
 0x351   :  { %v1882_v18 = vmul.f32 -1.442695, %v1728_v51 }
 0x353   :  { %1959 = vpow2.f32 %v1882_v18 }
 0x359   :  { %v1958_v59 = vpop.eup %1957 }
 0x35a   :  { %v1674_v45 = vpop.xlane.xlu1 %1673  ;;  %v1759_v22 = vadd.f32 1.0, %v1958_v59 }
 0x35b   :  { %v1729_v2 = vadd.f32 %v1880_v25, %v1674_v45 }
 0x35c   :  { %1961 = vrcp.f32 %v1759_v22 }
 0x35d   :  { %v1883_v28 = vmul.f32 -1.442695, %v1729_v2 }
 0x35e   :  { %v1683_v52 = vpop.xlane.xlu1 %1682 }
 0x35f   :  { %1963 = vpow2.f32 %v1883_v28  ;;  %v1730_v12 = vadd.f32 %v1880_v25, %v1683_v52 }
 0x360   :  { %v1960_v11 = vpop.eup %1959 }
 0x361   :  { %v1760_v32 = vadd.f32 1.0, %v1960_v11  ;;  %v1884_v17 = vmul.f32 -1.442695, %v1730_v12  ;;  %v1692_v24 = vpop.xlane.xlu0 %1691 }
 0x362   :  { %v1731_v42 = vadd.f32 %v1880_v25, %v1692_v24 }
 0x363   :  { %1965 = vrcp.f32 %v1760_v32 }
 0x364   :  { %1967 = vpow2.f32 %v1884_v17  ;;  %v1885_v27 = vmul.f32 -1.442695, %v1731_v42  ;;  %v1701_v60 = vpop.xlane.xlu1 %1700 }
 0x365   :  { %v1732_v4 = vadd.f32 %v1880_v25, %v1701_v60 }
 0x366   :  { %1969 = vpow2.f32 %v1885_v27 }
 0x367   :  { %v1886_v63 = vmul.f32 -1.442695, %v1732_v4 }
 0x369   :  { %1971 = vpow2.f32 %v1886_v63  ;;  %v1710_v37 = vpop.xlane.xlu0 %1709  ;;  %v1962_v29 = vpop.eup %1961 }
 0x36a   :  { %v1733_v55 = vadd.f32 %v1880_v25, %v1710_v37  ;;  %1784 = vst.msk [vmem:[%s3209_s13] sm:$0xff] %vm1783_vm2, %v1962_v29 }
 0x36c   :  { %v1964_v56 = vpop.eup %1963  ;;  %v1887_v21 = vmul.f32 -1.442695, %v1733_v55 }
 0x36d   :  { %v1761_v30 = vadd.f32 1.0, %v1964_v56  ;;  %v1719_v7 = vpop.xlane.xlu1 %1718 }
 0x36e   :  { %1973 = vpow2.f32 %v1887_v21  ;;  %v1734_v23 = vadd.f32 %v1880_v25, %v1719_v7 }
 0x36f   :  { %1975 = vrcp.f32 %v1761_v30 }
 0x370   :  { %v1966_v34 = vpop.eup %1965  ;;  %v1888_v43 = vmul.f32 -1.442695, %v1734_v23 }
 0x371   :  { %v1968_v3 = vpop.eup %1967  ;;  %1785 = vst.msk [vmem:[%s3209_s13 + $0x8] sm:$0xff] %vm1783_vm2, %v1966_v34 }
 0x372   :  { %v1762_v58 = vadd.f32 1.0, %v1968_v3  ;;  %1977 = vpow2.f32 %v1888_v43 }
 0x373   :  { %v1970_v20 = vpop.eup %1969 }
 0x374   :  { %1979 = vrcp.f32 %v1762_v58  ;;  %v1763_v5 = vadd.f32 1.0, %v1970_v20 }
 0x376   :  { %v1972_v48 = vpop.eup %1971  ;;  %1981 = vrcp.f32 %v1763_v5 }
 0x377   :  { %v1764_v0 = vadd.f32 1.0, %v1972_v48 }
 0x379   :  { %1983 = vrcp.f32 %v1764_v0 }
 0x37b   :  { %v1974_v15 = vpop.eup %1973 }
 0x37c   :  { %v1976_v8 = vpop.eup %1975  ;;  %v1765_v53 = vadd.f32 1.0, %v1974_v15 }
 0x37d   :  { %1786 = vst.msk [vmem:[%s3209_s13 + $0x10] sm:$0xff] %vm1783_vm2, %v1976_v8 }
 0x37e   :  { %1985 = vrcp.f32 %v1765_v53 }
 0x37f   :  { %v1978_v40 = vpop.eup %1977 }
 0x380   :  { %v1766_v39 = vadd.f32 1.0, %v1978_v40 }
 0x381   :  { %v1980_v19 = vpop.eup %1979 }
 0x382   :  { %1787 = vst.msk [vmem:[%s3209_s13 + $0x18] sm:$0xff] %vm1783_vm2, %v1980_v19  ;;  %1987 = vrcp.f32 %v1766_v39 }
 0x383   :  { %v1982_v9 = vpop.eup %1981 }
 0x384   :  { %1788 = vst.msk [vmem:[%s3209_s13 + $0x20] sm:$0xff] %vm1783_vm2, %v1982_v9 }
 0x386   :  { %v1984_v54 = vpop.eup %1983 }
 0x387   :  { %1789 = vst.msk [vmem:[%s3209_s13 + $0x28] sm:$0xff] %vm1783_vm2, %v1984_v54 }
 0x38b   :  { %v1986_v62 = vpop.eup %1985 }
 0x38c   :  { %1790 = vst.msk [vmem:[%s3209_s13 + $0x30] sm:$0xff] %vm1783_vm2, %v1986_v62 }
 0x38f   :  { %v1988_v46 = vpop.eup %1987 }
 0x390   :  { %1791 = vst.msk [vmem:[%s3209_s13 + $0x38] sm:$0xff] %vm1783_vm2, %v1988_v46 }

</bundles_post_ra>
